<compile_context>
chip_gen: v7x
topology: tpu7x:2x2x1
jax: 0.10.0
libtpu: 0.0.40
codegen_flags: <defaults>
</compile_context>

<pallas_src>
import jax
import jax.numpy as jnp
from jax.experimental import pallas as pl
from jax.experimental.pallas import tpu as pltpu

# ---------------- model config (matches the __init__ defaults above) ---------
N_IN = 32   # n_in
NV0 = 16    # block0 n_sout == n_vout
NH0 = 32    # block0 n_hidden
NH1 = 16    # block1 n_hidden (== block1 n_sin)


def _silu(x):
    return x * jax.nn.sigmoid(x)


def _round_up(x, m):
    return ((x + m - 1) // m) * m


# ---------------- Pallas kernel ----------------------------------------------
def gated_equivariant_head_kernel(l0_ref, l1_ref, wbd_ref, wsc0_ref,
                                  w2sg0_ref, w1a1_ref, rows_ref, out_ref):
    # l0_ref  : [tN, 32]   scalar representation
    # l1_ref  : [tN, 96]   vector representation, lane-packed [x(32) | y(32) | z(32)]
    # wbd_ref : [96, 96]   block-diag of [wmix0_v | wmix0_w] per component
    # wsc0_ref: [48, 32]   [w1a0 ; w1b0]
    # w2sg0   : [32, 32]   [w2s0 | w2g0]
    # w1a1    : [16, 16]
    # rows_ref: [8, 32]    small bias / block-1 weight rows
    # out_ref : [tN, 3]
    tN = l0_ref.shape[0]

    s_in = l0_ref[...]                                                    # [tN, 32]
    l1f = l1_ref[...]                                                     # [tN, 96]

    b1_0 = rows_ref[0:1, 0:NH0]            # [1, 32]
    b2sg0 = rows_ref[1:2, 0:2 * NV0]       # [1, 32]
    wmix1_v = rows_ref[2:3, 0:NV0]         # [1, 16]
    wmix1_w = rows_ref[3:4, 0:NV0]         # [1, 16]
    w1b1 = rows_ref[4:5, 0:NH1]            # [1, 16]
    b1_1 = rows_ref[5:6, 0:NH1]            # [1, 16]
    w2g1 = rows_ref[6:7, 0:NH1]            # [1, 16]
    b2g1 = rows_ref[7:8, 0:1]              # [1, 1]

    # ---------------- block 0 (sactivation = silu) ----------------
    # one lane-packed matmul: per component c, lanes [c*32 : c*32+16] = V_c,
    # lanes [c*32+16 : c*32+32] = W_c  (block-diagonal RHS => exact zeros off-diag).
    mix = jnp.dot(l1f, wbd_ref[...], preferred_element_type=jnp.float32)  # [tN, 96]
    Vx, Wx = mix[:, 0:NV0], mix[:, NV0:2 * NV0]
    Vy, Wy = mix[:, 32:32 + NV0], mix[:, 32 + NV0:32 + 2 * NV0]
    Vz, Wz = mix[:, 64:64 + NV0], mix[:, 64 + NV0:64 + 2 * NV0]
    # torch.norm(V, dim=-2): 2-norm over the 3 spatial components
    vn = jnp.sqrt(Vx * Vx + Vy * Vy + Vz * Vz)                            # [tN, 16]

    # scalar_net[0]: fused ctx = [scalars | Vn] -> single [tN,48] @ [48,32]
    ctx = jnp.concatenate([s_in, vn], axis=1)                             # [tN, 48]
    h = _silu(jnp.dot(ctx, wsc0_ref[...],
                      preferred_element_type=jnp.float32) + b1_0)         # [tN, 32]
    # fused scalar/gate projection: columns 0:16 = scalar, 16:32 = gate
    sg = jnp.dot(h, w2sg0_ref[...], preferred_element_type=jnp.float32) + b2sg0
    s_out0 = _silu(sg[:, 0:NV0])                                          # [tN, 16]
    gate0 = sg[:, NV0:2 * NV0]                                            # [tN, 16]

    # ---------------- block 1 (n_vout = 1, no sactivation) ----------------
    # K=16 -> 1 contractions stay on the VPU/XLU (MXU would be <1% utilized)
    def mix1(Wc):
        v = gate0 * Wc                                                    # [tN, 16]
        return (jnp.sum(v * wmix1_v, axis=1, keepdims=True),
                jnp.sum(v * wmix1_w, axis=1, keepdims=True))

    V1x, W1x = mix1(Wx)
    V1y, W1y = mix1(Wy)
    V1z, W1z = mix1(Wz)
    vn1 = jnp.sqrt(V1x * V1x + V1y * V1y + V1z * V1z)                     # [tN, 1]

    h1 = _silu(jnp.dot(s_out0, w1a1_ref[...], preferred_element_type=jnp.float32)
               + vn1 * w1b1                       # K=1 contraction as broadcast
               + b1_1)                                                    # [tN, 16]
    gate1 = jnp.sum(h1 * w2g1, axis=1, keepdims=True) + b2g1              # [tN, 1]
    # (scalar output of the last block is discarded by the head, so not computed)

    # assemble eps_pred[:, c] = gate1 * W1_c; [tN, 3] output accepted knowingly
    # (store bytes are negligible here).
    lane = jax.lax.broadcasted_iota(jnp.int32, (tN, 3), 1)
    out = jnp.where(lane == 0, W1x, jnp.where(lane == 1, W1y, W1z)) * gate1
    out_ref[...] = out.astype(out_ref.dtype)


# ---------------- weight packing ----------------------------------------------
def pack_weights(p):
    """Build the 5 lane-dense weight arrays consumed by the kernel."""
    wmix0 = jnp.concatenate([p["wmix0_v"], p["wmix0_w"]], axis=1).astype(jnp.float32)  # [32,32]
    wbd = jnp.zeros((3 * N_IN, 3 * N_IN), jnp.float32)
    for c in range(3):
        wbd = wbd.at[c * N_IN:(c + 1) * N_IN, c * N_IN:(c + 1) * N_IN].set(wmix0)      # [96,96]

    wsc0 = jnp.concatenate([p["w1a0"], p["w1b0"]], axis=0).astype(jnp.float32)         # [48,32]
    w2sg0 = jnp.concatenate([p["w2s0"], p["w2g0"]], axis=1).astype(jnp.float32)        # [32,32]
    w1a1 = p["w1a1"].astype(jnp.float32)                                               # [16,16]

    rows = jnp.zeros((8, 32), jnp.float32)
    rows = rows.at[0, 0:NH0].set(p["b1_0"][0].astype(jnp.float32))
    rows = rows.at[1, 0:2 * NV0].set(
        jnp.concatenate([p["b2s0"], p["b2g0"]], axis=1)[0].astype(jnp.float32))
    rows = rows.at[2, 0:NV0].set(p["wmix1_v"][0].astype(jnp.float32))
    rows = rows.at[3, 0:NV0].set(p["wmix1_w"][0].astype(jnp.float32))
    rows = rows.at[4, 0:NH1].set(p["w1b1"][0].astype(jnp.float32))
    rows = rows.at[5, 0:NH1].set(p["b1_1"][0].astype(jnp.float32))
    rows = rows.at[6, 0:NH1].set(p["w2g1"][0].astype(jnp.float32))
    rows = rows.at[7, 0].set(p["b2g1"][0, 0].astype(jnp.float32))
    return wbd, wsc0, w2sg0, w1a1, rows


# ---------------- wrapper -----------------------------------------------------
def time_aware_equivariant_forward(l0, l1_nchw, params, *, tile_n=None):
    """l0: [N, n_in], l1_nchw: [N, 3, n_in] (PyTorch layout). Returns eps_pred [N, 3]."""
    N, F = l0.shape
    assert F == N_IN

    # Free, contiguous reshape — per-row lane layout is [x(32) | y(32) | z(32)].
    l1f = jnp.reshape(l1_nchw, (N, 3 * N_IN))

    if tile_n is None:
        # Big tiles amortize the ~0.35us fixed per-grid-step cost; per-step VMEM
        # at tN=1024 is only ~2-3 MiB, far under every generation's scoped limit.
        tile_n = 1024
    if tile_n >= N:
        tile_n = N                       # single full block ("== full dim" rule)
    else:
        tile_n = max(8, _round_up(tile_n, 8))
    num_tiles = pl.cdiv(N, tile_n)

    wbd, wsc0, w2sg0, w1a1, rows = pack_weights(params)

    # Ragged N: no padding — the last (partial) block's tail rows are unspecified
    # in VMEM but every op is row-wise and the output writeback is masked.
    # TODO(synk): for very large N on v7x, pltpu.CORE_PARALLEL on the N axis would
    # shard the grid across both TensorCores; plain "parallel" is kept here.
    out = pl.pallas_call(
        gated_equivariant_head_kernel,
        out_shape=jax.ShapeDtypeStruct((N, 3), l0.dtype),
        grid_spec=pltpu.PrefetchScalarGridSpec(
            num_scalar_prefetch=0,
            grid=(num_tiles,),
            in_specs=[
                pl.BlockSpec((tile_n, N_IN), lambda i: (i, 0)),           # l0
                pl.BlockSpec((tile_n, 3 * N_IN), lambda i: (i, 0)),       # l1 lane-packed
                pl.BlockSpec((3 * N_IN, 3 * N_IN), lambda i: (0, 0)),     # block-diag mix
                pl.BlockSpec((N_IN + NV0, NH0), lambda i: (0, 0)),        # [w1a0 ; w1b0]
                pl.BlockSpec((NH0, 2 * NV0), lambda i: (0, 0)),           # [w2s0 | w2g0]
                pl.BlockSpec((NV0, NH1), lambda i: (0, 0)),               # w1a1
                pl.BlockSpec((8, 32), lambda i: (0, 0)),                  # bias / tiny rows
            ],
            out_specs=pl.BlockSpec((tile_n, 3), lambda i: (i, 0)),
        ),
        compiler_params=pltpu.CompilerParams(dimension_semantics=("parallel",)),
    )(l0, l1f, wbd, wsc0, w2sg0, w1a1, rows)
    return out


# ---------------- deterministic synthetic parameters --------------------------
def init_params(key):
    ks = jax.random.split(key, 16)

    def w(k, shape, fan_in):
        return (jax.random.normal(k, shape, jnp.float32) / jnp.sqrt(fan_in)).astype(jnp.float32)

    p = {
        # block 0: mix_vectors (no bias) split into V / W halves, [in, out] layout
        "wmix0_v": w(ks[0], (N_IN, NV0), N_IN),
        "wmix0_w": w(ks[1], (N_IN, NV0), N_IN),
        # block 0: scalar_net[0]  (ctx = [scalars | Vn])
        "w1a0": w(ks[2], (N_IN, NH0), N_IN + NV0),
        "w1b0": w(ks[3], (NV0, NH0), N_IN + NV0),
        "b1_0": w(ks[4], (1, NH0), 1.0),
        # block 0: scalar_net[1] split into scalar / gate halves
        "w2s0": w(ks[5], (NH0, NV0), NH0),
        "b2s0": w(ks[6], (1, NV0), 1.0),
        "w2g0": w(ks[7], (NH0, NV0), NH0),
        "b2g0": w(ks[8], (1, NV0), 1.0),
        # block 1: mix_vectors (n_vout=1), stored as [1, 16] rows
        "wmix1_v": w(ks[9], (1, NV0), NV0),
        "wmix1_w": w(ks[10], (1, NV0), NV0),
        # block 1: scalar_net[0]
        "w1a1": w(ks[11], (NV0, NH1), NV0 + 1),
        "w1b1": w(ks[12], (1, NH1), NV0 + 1),
        "b1_1": w(ks[13], (1, NH1), 1.0),
        # block 1: scalar_net[1], gate row only (scalar output is discarded)
        "w2g1": w(ks[14], (1, NH1), NH1),
        "b2g1": w(ks[15], (1, 1), 1.0),
    }
    return p


# ---------------- pure-JAX reference (mirrors the torch forward) --------------
def reference_forward(l0, l1_nchw, p):
    hp = jax.lax.Precision.HIGHEST
    # block 0
    V = jnp.einsum("ncf,fo->nco", l1_nchw, p["wmix0_v"], precision=hp)
    W = jnp.einsum("ncf,fo->nco", l1_nchw, p["wmix0_w"], precision=hp)
    vn = jnp.linalg.norm(V, axis=-2)
    h = _silu(l0 @ p["w1a0"] + vn @ p["w1b0"] + p["b1_0"])
    s = _silu(h @ p["w2s0"] + p["b2s0"])
    gate = h @ p["w2g0"] + p["b2g0"]
    vecs = gate[:, None, :] * W
    # block 1
    V1 = jnp.einsum("ncf,of->nco", vecs, p["wmix1_v"], precision=hp)
    W1v = jnp.einsum("ncf,of->nco", vecs, p["wmix1_w"], precision=hp)
    vn1 = jnp.linalg.norm(V1, axis=-2)
    h1 = _silu(s @ p["w1a1"] + vn1 * p["w1b1"] + p["b1_1"])
    gate1 = jnp.sum(h1 * p["w2g1"], axis=-1, keepdims=True) + p["b2g1"]
    v_out = gate1[:, None, :] * W1v
    return jnp.squeeze(v_out, -1)       # eps_pred [N, 3]


if __name__ == "__main__":
    key = jax.random.PRNGKey(0)
    k_p, k_s, k_v = jax.random.split(key, 3)

    N = 128                                               # number of atoms
    params = init_params(k_p)
    l0 = jax.random.normal(k_s, (N, N_IN), jnp.float32)          # scalar_representation
    l1 = jax.random.normal(k_v, (N, 3, N_IN), jnp.float32)       # vector_representation

    eps_pred = time_aware_equivariant_forward(l0, l1, params)
    eps_pred = jax.block_until_ready(eps_pred)

    ref = reference_forward(l0, l1, params)
    assert eps_pred.shape == (N, 3)
    assert bool(jnp.allclose(eps_pred, ref, atol=2e-3, rtol=2e-3)), (
        "mismatch vs reference: max abs err = %e" % float(jnp.max(jnp.abs(eps_pred - ref)))
    )

    # ragged atom count (single partial block, N not a multiple of 8)
    Nr = 100
    eps_r = jax.block_until_ready(time_aware_equivariant_forward(l0[:Nr], l1[:Nr], params))
    ref_r = reference_forward(l0[:Nr], l1[:Nr], params)
    assert eps_r.shape == (Nr, 3)
    assert bool(jnp.allclose(eps_r, ref_r, atol=2e-3, rtol=2e-3)), (
        "ragged mismatch: max abs err = %e" % float(jnp.max(jnp.abs(eps_r - ref_r)))
    )

    # multi-step grid with a partial edge block (tile_n < N, N % tile_n != 0)
    eps_t = jax.block_until_ready(time_aware_equivariant_forward(l0, l1, params, tile_n=48))
    assert eps_t.shape == (N, 3)
    assert bool(jnp.allclose(eps_t, ref, atol=2e-3, rtol=2e-3)), (
        "tiled mismatch: max abs err = %e" % float(jnp.max(jnp.abs(eps_t - ref)))
    )

    print("KERNEL_OK")
</pallas_src>

<mosaic_0001>
module attributes {stable_mosaic.version = 11 : i64} {
  func.func @gated_equivariant_head_kernel(%arg0: i32, %arg1: memref<128x32xf32, #tpu.memory_space<vmem>>, %arg2: memref<128x96xf32, #tpu.memory_space<vmem>>, %arg3: memref<96x96xf32, #tpu.memory_space<vmem>>, %arg4: memref<48x32xf32, #tpu.memory_space<vmem>>, %arg5: memref<32x32xf32, #tpu.memory_space<vmem>>, %arg6: memref<16x16xf32, #tpu.memory_space<vmem>>, %arg7: memref<8x32xf32, #tpu.memory_space<vmem>>, %arg8: memref<128x3xf32, #tpu.memory_space<vmem>>) attributes {dimension_semantics = [#tpu.dimension_semantics<parallel>], iteration_bounds = array<i64: 1>, scalar_prefetch = 0 : i64, scratch_operands = 0 : i64, tpu.core_type = #tpu.core_type<tc>, window_params = [{transform_indices = @transform_0, window_bounds = array<i64: 128, 32>}, {transform_indices = @transform_1, window_bounds = array<i64: 128, 96>}, {pipeline_mode = #tpu.pipeline_mode<synchronous>, transform_indices = @transform_2, window_bounds = array<i64: 96, 96>}, {pipeline_mode = #tpu.pipeline_mode<synchronous>, transform_indices = @transform_3, window_bounds = array<i64: 48, 32>}, {pipeline_mode = #tpu.pipeline_mode<synchronous>, transform_indices = @transform_4, window_bounds = array<i64: 32, 32>}, {pipeline_mode = #tpu.pipeline_mode<synchronous>, transform_indices = @transform_5, window_bounds = array<i64: 16, 16>}, {pipeline_mode = #tpu.pipeline_mode<synchronous>, transform_indices = @transform_6, window_bounds = array<i64: 8, 32>}, {transform_indices = @transform_7, window_bounds = array<i64: 128, 3>}]} {
    %c0 = arith.constant 0 : index
    %c0_0 = arith.constant 0 : index
    %0 = vector.load %arg1[%c0, %c0_0] : memref<128x32xf32, #tpu.memory_space<vmem>>, vector<128x32xf32>
    %c0_1 = arith.constant 0 : index
    %c0_2 = arith.constant 0 : index
    %1 = vector.load %arg2[%c0_1, %c0_2] : memref<128x96xf32, #tpu.memory_space<vmem>>, vector<128x96xf32>
    %c0_3 = arith.constant 0 : index
    %c0_4 = arith.constant 0 : index
    %2 = vector.load %arg7[%c0_3, %c0_4] : memref<8x32xf32, #tpu.memory_space<vmem>>, vector<1x32xf32>
    %c1 = arith.constant 1 : index
    %c0_5 = arith.constant 0 : index
    %3 = vector.load %arg7[%c1, %c0_5] : memref<8x32xf32, #tpu.memory_space<vmem>>, vector<1x32xf32>
    %c2 = arith.constant 2 : index
    %c0_6 = arith.constant 0 : index
    %4 = vector.load %arg7[%c2, %c0_6] : memref<8x32xf32, #tpu.memory_space<vmem>>, vector<1x16xf32>
    %c3 = arith.constant 3 : index
    %c0_7 = arith.constant 0 : index
    %5 = vector.load %arg7[%c3, %c0_7] : memref<8x32xf32, #tpu.memory_space<vmem>>, vector<1x16xf32>
    %c4 = arith.constant 4 : index
    %c0_8 = arith.constant 0 : index
    %6 = vector.load %arg7[%c4, %c0_8] : memref<8x32xf32, #tpu.memory_space<vmem>>, vector<1x16xf32>
    %c5 = arith.constant 5 : index
    %c0_9 = arith.constant 0 : index
    %7 = vector.load %arg7[%c5, %c0_9] : memref<8x32xf32, #tpu.memory_space<vmem>>, vector<1x16xf32>
    %c6 = arith.constant 6 : index
    %c0_10 = arith.constant 0 : index
    %8 = vector.load %arg7[%c6, %c0_10] : memref<8x32xf32, #tpu.memory_space<vmem>>, vector<1x16xf32>
    %c7 = arith.constant 7 : index
    %c0_11 = arith.constant 0 : index
    %9 = vector.load %arg7[%c7, %c0_11] : memref<8x32xf32, #tpu.memory_space<vmem>>, vector<1x1xf32>
    %c0_12 = arith.constant 0 : index
    %c0_13 = arith.constant 0 : index
    %10 = vector.load %arg3[%c0_12, %c0_13] : memref<96x96xf32, #tpu.memory_space<vmem>>, vector<96x96xf32>
    %cst = arith.constant dense<0.000000e+00> : vector<128x96xf32>
    %11 = tpu.matmul %1, %10, %cst {dimension_numbers = #tpu.dot_dimension_numbers<[1], [0], [0], [1], [0, 0, 1, 1], [], []>} : vector<128x96xf32>, vector<96x96xf32>, vector<128x96xf32> -> vector<128x96xf32>
    %12 = vector.extract_strided_slice %11 {offsets = [0, 0], sizes = [128, 16], strides = [1, 1]} : vector<128x96xf32> to vector<128x16xf32>
    %13 = vector.extract_strided_slice %11 {offsets = [0, 16], sizes = [128, 16], strides = [1, 1]} : vector<128x96xf32> to vector<128x16xf32>
    %14 = vector.extract_strided_slice %11 {offsets = [0, 32], sizes = [128, 16], strides = [1, 1]} : vector<128x96xf32> to vector<128x16xf32>
    %15 = vector.extract_strided_slice %11 {offsets = [0, 48], sizes = [128, 16], strides = [1, 1]} : vector<128x96xf32> to vector<128x16xf32>
    %16 = vector.extract_strided_slice %11 {offsets = [0, 64], sizes = [128, 16], strides = [1, 1]} : vector<128x96xf32> to vector<128x16xf32>
    %17 = vector.extract_strided_slice %11 {offsets = [0, 80], sizes = [128, 16], strides = [1, 1]} : vector<128x96xf32> to vector<128x16xf32>
    %18 = arith.mulf %12, %12 : vector<128x16xf32>
    %19 = arith.mulf %14, %14 : vector<128x16xf32>
    %20 = arith.addf %18, %19 : vector<128x16xf32>
    %21 = arith.mulf %16, %16 : vector<128x16xf32>
    %22 = arith.addf %20, %21 : vector<128x16xf32>
    %23 = math.sqrt %22 : vector<128x16xf32>
    %24 = tpu.concatenate %0, %23 in 1 : vector<128x32xf32>, vector<128x16xf32> -> vector<128x48xf32>
    %c0_14 = arith.constant 0 : index
    %c0_15 = arith.constant 0 : index
    %25 = vector.load %arg4[%c0_14, %c0_15] : memref<48x32xf32, #tpu.memory_space<vmem>>, vector<48x32xf32>
    %cst_16 = arith.constant dense<0.000000e+00> : vector<128x32xf32>
    %26 = tpu.matmul %24, %25, %cst_16 {dimension_numbers = #tpu.dot_dimension_numbers<[1], [0], [0], [1], [0, 0, 1, 1], [], []>} : vector<128x48xf32>, vector<48x32xf32>, vector<128x32xf32> -> vector<128x32xf32>
    %27 = vector.broadcast %2 : vector<1x32xf32> to vector<128x32xf32>
    %28 = arith.addf %26, %27 : vector<128x32xf32>
    %29 = arith.negf %28 : vector<128x32xf32>
    %30 = math.exp %29 : vector<128x32xf32>
    %cst_17 = arith.constant 1.000000e+00 : f32
    %31 = vector.broadcast %cst_17 : f32 to vector<128x32xf32>
    %32 = arith.addf %31, %30 : vector<128x32xf32>
    %33 = arith.divf %31, %32 : vector<128x32xf32>
    %34 = arith.mulf %28, %33 : vector<128x32xf32>
    %c0_18 = arith.constant 0 : index
    %c0_19 = arith.constant 0 : index
    %35 = vector.load %arg5[%c0_18, %c0_19] : memref<32x32xf32, #tpu.memory_space<vmem>>, vector<32x32xf32>
    %cst_20 = arith.constant dense<0.000000e+00> : vector<128x32xf32>
    %36 = tpu.matmul %34, %35, %cst_20 {dimension_numbers = #tpu.dot_dimension_numbers<[1], [0], [0], [1], [0, 0, 1, 1], [], []>} : vector<128x32xf32>, vector<32x32xf32>, vector<128x32xf32> -> vector<128x32xf32>
    %37 = vector.broadcast %3 : vector<1x32xf32> to vector<128x32xf32>
    %38 = arith.addf %36, %37 : vector<128x32xf32>
    %39 = vector.extract_strided_slice %38 {offsets = [0, 0], sizes = [128, 16], strides = [1, 1]} : vector<128x32xf32> to vector<128x16xf32>
    %40 = arith.negf %39 : vector<128x16xf32>
    %41 = math.exp %40 : vector<128x16xf32>
    %cst_21 = arith.constant 1.000000e+00 : f32
    %42 = vector.broadcast %cst_21 : f32 to vector<128x16xf32>
    %43 = arith.addf %42, %41 : vector<128x16xf32>
    %44 = arith.divf %42, %43 : vector<128x16xf32>
    %45 = arith.mulf %39, %44 : vector<128x16xf32>
    %46 = vector.extract_strided_slice %38 {offsets = [0, 16], sizes = [128, 16], strides = [1, 1]} : vector<128x32xf32> to vector<128x16xf32>
    %47 = arith.mulf %46, %13 : vector<128x16xf32>
    %48 = vector.broadcast %4 : vector<1x16xf32> to vector<128x16xf32>
    %49 = arith.mulf %47, %48 : vector<128x16xf32>
    %cst_22 = arith.constant dense<0.000000e+00> : vector<128xf32>
    %50 = vector.multi_reduction <add>, %49, %cst_22 [1] : vector<128x16xf32> to vector<128xf32>
    %51 = vector.shape_cast %50 : vector<128xf32> to vector<128x1xf32>
    %52 = vector.broadcast %5 : vector<1x16xf32> to vector<128x16xf32>
    %53 = arith.mulf %47, %52 : vector<128x16xf32>
    %cst_23 = arith.constant dense<0.000000e+00> : vector<128xf32>
    %54 = vector.multi_reduction <add>, %53, %cst_23 [1] : vector<128x16xf32> to vector<128xf32>
    %55 = vector.shape_cast %54 : vector<128xf32> to vector<128x1xf32>
    %56 = arith.mulf %46, %15 : vector<128x16xf32>
    %57 = vector.broadcast %4 : vector<1x16xf32> to vector<128x16xf32>
    %58 = arith.mulf %56, %57 : vector<128x16xf32>
    %cst_24 = arith.constant dense<0.000000e+00> : vector<128xf32>
    %59 = vector.multi_reduction <add>, %58, %cst_24 [1] : vector<128x16xf32> to vector<128xf32>
    %60 = vector.shape_cast %59 : vector<128xf32> to vector<128x1xf32>
    %61 = vector.broadcast %5 : vector<1x16xf32> to vector<128x16xf32>
    %62 = arith.mulf %56, %61 : vector<128x16xf32>
    %cst_25 = arith.constant dense<0.000000e+00> : vector<128xf32>
    %63 = vector.multi_reduction <add>, %62, %cst_25 [1] : vector<128x16xf32> to vector<128xf32>
    %64 = vector.shape_cast %63 : vector<128xf32> to vector<128x1xf32>
    %65 = arith.mulf %46, %17 : vector<128x16xf32>
    %66 = vector.broadcast %4 : vector<1x16xf32> to vector<128x16xf32>
    %67 = arith.mulf %65, %66 : vector<128x16xf32>
    %cst_26 = arith.constant dense<0.000000e+00> : vector<128xf32>
    %68 = vector.multi_reduction <add>, %67, %cst_26 [1] : vector<128x16xf32> to vector<128xf32>
    %69 = vector.shape_cast %68 : vector<128xf32> to vector<128x1xf32>
    %70 = vector.broadcast %5 : vector<1x16xf32> to vector<128x16xf32>
    %71 = arith.mulf %65, %70 : vector<128x16xf32>
    %cst_27 = arith.constant dense<0.000000e+00> : vector<128xf32>
    %72 = vector.multi_reduction <add>, %71, %cst_27 [1] : vector<128x16xf32> to vector<128xf32>
    %73 = vector.shape_cast %72 : vector<128xf32> to vector<128x1xf32>
    %74 = arith.mulf %51, %51 : vector<128x1xf32>
    %75 = arith.mulf %60, %60 : vector<128x1xf32>
    %76 = arith.addf %74, %75 : vector<128x1xf32>
    %77 = arith.mulf %69, %69 : vector<128x1xf32>
    %78 = arith.addf %76, %77 : vector<128x1xf32>
    %79 = math.sqrt %78 : vector<128x1xf32>
    %c0_28 = arith.constant 0 : index
    %c0_29 = arith.constant 0 : index
    %80 = vector.load %arg6[%c0_28, %c0_29] : memref<16x16xf32, #tpu.memory_space<vmem>>, vector<16x16xf32>
    %cst_30 = arith.constant dense<0.000000e+00> : vector<128x16xf32>
    %81 = tpu.matmul %45, %80, %cst_30 {dimension_numbers = #tpu.dot_dimension_numbers<[1], [0], [0], [1], [0, 0, 1, 1], [], []>} : vector<128x16xf32>, vector<16x16xf32>, vector<128x16xf32> -> vector<128x16xf32>
    %82 = vector.broadcast %79 : vector<128x1xf32> to vector<128x16xf32>
    %83 = vector.broadcast %6 : vector<1x16xf32> to vector<128x16xf32>
    %84 = arith.mulf %82, %83 : vector<128x16xf32>
    %85 = arith.addf %81, %84 : vector<128x16xf32>
    %86 = vector.broadcast %7 : vector<1x16xf32> to vector<128x16xf32>
    %87 = arith.addf %85, %86 : vector<128x16xf32>
    %88 = arith.negf %87 : vector<128x16xf32>
    %89 = math.exp %88 : vector<128x16xf32>
    %cst_31 = arith.constant 1.000000e+00 : f32
    %90 = vector.broadcast %cst_31 : f32 to vector<128x16xf32>
    %91 = arith.addf %90, %89 : vector<128x16xf32>
    %92 = arith.divf %90, %91 : vector<128x16xf32>
    %93 = arith.mulf %87, %92 : vector<128x16xf32>
    %94 = vector.broadcast %8 : vector<1x16xf32> to vector<128x16xf32>
    %95 = arith.mulf %93, %94 : vector<128x16xf32>
    %cst_32 = arith.constant dense<0.000000e+00> : vector<128xf32>
    %96 = vector.multi_reduction <add>, %95, %cst_32 [1] : vector<128x16xf32> to vector<128xf32>
    %97 = vector.shape_cast %96 : vector<128xf32> to vector<128x1xf32>
    %98 = vector.broadcast %9 : vector<1x1xf32> to vector<128x1xf32>
    %99 = arith.addf %97, %98 : vector<128x1xf32>
    %100 = tpu.iota {dimensions = array<i32: 1>} : vector<128x3xi32>
    %c0_i32 = arith.constant 0 : i32
    %101 = vector.broadcast %c0_i32 : i32 to vector<128x3xi32>
    %102 = arith.cmpi eq, %100, %101 : vector<128x3xi32>
    %c1_i32 = arith.constant 1 : i32
    %103 = vector.broadcast %c1_i32 : i32 to vector<128x3xi32>
    %104 = arith.cmpi eq, %100, %103 : vector<128x3xi32>
    %105 = vector.shape_cast %64 : vector<128x1xf32> to vector<128x1xf32>
    %106 = vector.broadcast %105 : vector<128x1xf32> to vector<128x3xf32>
    %107 = vector.shape_cast %73 : vector<128x1xf32> to vector<128x1xf32>
    %108 = vector.broadcast %107 : vector<128x1xf32> to vector<128x3xf32>
    %109 = arith.select %104, %106, %108 : vector<128x3xi1>, vector<128x3xf32>
    %110 = vector.shape_cast %55 : vector<128x1xf32> to vector<128x1xf32>
    %111 = vector.broadcast %110 : vector<128x1xf32> to vector<128x3xf32>
    %112 = arith.select %102, %111, %109 : vector<128x3xi1>, vector<128x3xf32>
    %113 = vector.broadcast %99 : vector<128x1xf32> to vector<128x3xf32>
    %114 = arith.mulf %112, %113 : vector<128x3xf32>
    %c0_33 = arith.constant 0 : index
    %c0_34 = arith.constant 0 : index
    %115 = vector.load %arg8[%c0_33, %c0_34] : memref<128x3xf32, #tpu.memory_space<vmem>>, vector<128x3xf32>
    tpu.vector_store %arg8[%c0_33, %c0_34], %114 {strides = array<i32>} : memref<128x3xf32, #tpu.memory_space<vmem>>, vector<128x3xf32>,
    return
  }
  func.func @transform_0(%arg0: i32) -> (i32, i32) {
    %c0_i32 = arith.constant 0 : i32
    %c0_i32_0 = arith.constant 0 : i32
    return %arg0, %c0_i32 : i32, i32
  }
  func.func @transform_1(%arg0: i32) -> (i32, i32) {
    %c0_i32 = arith.constant 0 : i32
    %c0_i32_0 = arith.constant 0 : i32
    return %arg0, %c0_i32 : i32, i32
  }
  func.func @transform_2(%arg0: i32) -> (i32, i32) {
    %c0_i32 = arith.constant 0 : i32
    %c0_i32_0 = arith.constant 0 : i32
    %c0_i32_1 = arith.constant 0 : i32
    return %c0_i32, %c0_i32_0 : i32, i32
  }
  func.func @transform_3(%arg0: i32) -> (i32, i32) {
    %c0_i32 = arith.constant 0 : i32
    %c0_i32_0 = arith.constant 0 : i32
    %c0_i32_1 = arith.constant 0 : i32
    return %c0_i32, %c0_i32_0 : i32, i32
  }
  func.func @transform_4(%arg0: i32) -> (i32, i32) {
    %c0_i32 = arith.constant 0 : i32
    %c0_i32_0 = arith.constant 0 : i32
    %c0_i32_1 = arith.constant 0 : i32
    return %c0_i32, %c0_i32_0 : i32, i32
  }
  func.func @transform_5(%arg0: i32) -> (i32, i32) {
    %c0_i32 = arith.constant 0 : i32
    %c0_i32_0 = arith.constant 0 : i32
    %c0_i32_1 = arith.constant 0 : i32
    return %c0_i32, %c0_i32_0 : i32, i32
  }
  func.func @transform_6(%arg0: i32) -> (i32, i32) {
    %c0_i32 = arith.constant 0 : i32
    %c0_i32_0 = arith.constant 0 : i32
    %c0_i32_1 = arith.constant 0 : i32
    return %c0_i32, %c0_i32_0 : i32, i32
  }
  func.func @transform_7(%arg0: i32) -> (i32, i32) {
    %c0_i32 = arith.constant 0 : i32
    %c0_i32_0 = arith.constant 0 : i32
    return %arg0, %c0_i32 : i32, i32
  }
}

</mosaic_0001>

<bundles_post_ra>
// kernel: tpu_custom_call.1
= control target key start
LH: loop header
LB: loop body
LE: loop exit
PB: predicated region body
PF: predicated region fallthrough
CT: control target
= control target key end

     0   :  { %vm78_vm0 = vcmask 785408   ;;  %s3645_s9 = smov 64   ;;  %s3646_s10 = smov 96   ;;  %s5569_s2 = inlined_call_operand.vmem [shape: f32[96,96], index: 2, kind: input, shape index: {}]   ;;  %s5570_s1 = inlined_call_operand.vmem [shape: f32[128,96], index: 1, kind: input, shape index: {}]   ;;  %s5571_s3 = inlined_call_operand.vmem [shape: f32[48,32], index: 3, kind: input, shape index: {}]   ;;  %s5572_s6 = inlined_call_operand.vmem [shape: f32[8,32], index: 6, kind: input, shape index: {}]   ;;  %s5573_s0 = inlined_call_operand.vmem [shape: f32[128,32], index: 0, kind: input, shape index: {}]   ;;  %s5574_s4 = inlined_call_operand.vmem [shape: f32[32,32], index: 4, kind: input, shape index: {}]   ;;  %s5575_s5 = inlined_call_operand.vmem [shape: f32[16,16], index: 5, kind: input, shape index: {}]   ;;  %s5576_s7 = inlined_call_operand.vmem [shape: f32[128,3], index: 7, kind: output, shape index: {}]  }
   0x1   :  { %v66_v0 = vld [vmem:[%s5569_s2] sm:$0xff]  ;;  %v67_v1 = vld [vmem:[%s5569_s2 + $0x8] sm:$0xff]  ;;  %v68_v2 = vld [vmem:[%s5569_s2 + $0x10] sm:$0xff]  ;;  %s3648_s24 = smov 16   ;;  %s3649_s21 = smov 112  }
   0x2   :  { %v3331_v3 = vpack.c.bf16 %v67_v1, %v66_v0  ;;  %v69_v4 = vld [vmem:[%s5569_s2 + $0x18] sm:$0xff]  ;;  %v70_v6 = vld [vmem:[%s5569_s2 + $0x20] sm:$0xff]  ;;  %v71_v7 = vld [vmem:[%s5569_s2 + $0x28] sm:$0xff] }
   0x3   :  { %v3335_v5 = vpack.c.bf16 %v69_v4, %v68_v2  ;;  %v42_v8 = vld [vmem:[%s5570_s1] sm:$0xff]  ;;  %v3339_v9 = vpack.c.bf16 %v71_v7, %v70_v6  ;;  %v72_v10 = vld [vmem:[%s5569_s2 + $0x30] sm:$0xff]  ;;  %v73_v11 = vld [vmem:[%s5569_s2 + $0x38] sm:$0xff] }
   0x4   :  { %3332 = vmatprep.subr.bf16.mxu0 %v3331_v3  ;;  %3211 = vmatprep.mubr.msk.f32.mxu0 %vm78_vm0, %v42_v8  ;;  %v3343_v12 = vpack.c.bf16 %v73_v11, %v72_v10  ;;  %v74_v13 = vld [vmem:[%s5569_s2 + $0x40] sm:$0xff]  ;;  %v75_v14 = vld [vmem:[%s5569_s2 + $0x48] sm:$0xff]  ;;  %v76_v16 = vld [vmem:[%s5569_s2 + $0x50] sm:$0xff] }
   0x5   :  { %3334 = vmatpush3.bf16.msra.mxu0 %v3331_v3  ;;  %v3347_v15 = vpack.c.bf16 %v75_v14, %v74_v13  ;;  %v77_v17 = vld [vmem:[%s5569_s2 + $0x58] sm:$0xff]  ;;  %v43_v19 = vld [vmem:[%s5570_s1 + $0x8] sm:$0xff]  ;;  %v44_v20 = vld [vmem:[%s5570_s1 + $0x10] sm:$0xff] }
   0x6   :  { %3336 = vmatprep.subr.bf16.mxu0 %v3335_v5  ;;  %v3351_v18 = vpack.c.bf16 %v77_v17, %v76_v16  ;;  %v45_v21 = vld [vmem:[%s5570_s1 + $0x18] sm:$0xff]  ;;  %v46_v22 = vld [vmem:[%s5570_s1 + $0x20] sm:$0xff]  ;;  %v47_v23 = vld [vmem:[%s5570_s1 + $0x28] sm:$0xff] }
   0x7   :  { %v48_v24 = vld [vmem:[%s5570_s1 + $0x30] sm:$0xff]  ;;  %v49_v25 = vld [vmem:[%s5570_s1 + $0x38] sm:$0xff]  ;;  %v50_v26 = vld [vmem:[%s5570_s1 + $0x40] sm:$0xff] }
   0x8   :  { %v51_v27 = vld [vmem:[%s5570_s1 + $0x48] sm:$0xff]  ;;  %v52_v28 = vld [vmem:[%s5570_s1 + $0x50] sm:$0xff]  ;;  %v53_v29 = vld [vmem:[%s5570_s1 + $0x58] sm:$0xff] }
   0x9   :  { %3338 = vmatpush3.bf16.msra.mxu0 %v3335_v5  ;;  %v54_v30 = vld [vmem:[%s5570_s1 + $0x60] sm:$0xff]  ;;  %v55_v31 = vld [vmem:[%s5570_s1 + $0x68] sm:$0xff]  ;;  %v56_v32 = vld [vmem:[%s5570_s1 + $0x70] sm:$0xff] }
   0xa   :  { %3340 = vmatprep.subr.bf16.mxu0 %v3339_v9  ;;  %v57_v33 = vld [vmem:[%s5570_s1 + $0x78] sm:$0xff]  ;;  %v625_v4 = vld [vmem:[%s5571_s3] sm:$0xff]  ;;  %v626_v5 = vld [vmem:[%s5571_s3 + $0x8] sm:$0xff] }
   0xb   :  { %v3355_v7 = vpack.c.bf16 %v626_v5, %v625_v4  ;;  %v628_v10 = vld [vmem:[%s5571_s3 + $0x18] sm:$0xff]  ;;  %v629_v16 = vld [vmem:[%s5571_s3 + $0x20] sm:$0xff]  ;;  %v630_v17 = vld [vmem:[%s5571_s3 + $0x28] sm:$0xff] }
   0xd   :  { %3342 = vmatpush3.bf16.msra.mxu0 %v3339_v9  ;;  %3356 = vmatprep.subr.bf16.mxu1 %v3355_v7  ;;  %v627_v9 = vld [vmem:[%s5571_s3 + $0x10] sm:$0xff]  ;;  %s3647_s3 = smov 32  }
   0xe   :  { %3344 = vmatprep.subr.bf16.mxu0 %v3343_v12  ;;  %3358 = vmatpush3.bf16.msra.mxu1 %v3355_v7  ;;  %v3359_v13 = vpack.c.bf16 %v628_v10, %v627_v9 }
  0x10   :  { %3360 = vmatprep.subr.bf16.mxu1 %v3359_v13 }
  0x11   :  { %3346 = vmatpush3.bf16.msra.mxu0 %v3343_v12 }
  0x12   :  { %3348 = vmatprep.subr.bf16.mxu0 %v3347_v15  ;;  %3362 = vmatpush3.bf16.msra.mxu1 %v3359_v13 }
  0x15   :  { %3350 = vmatpush3.bf16.msra.mxu0 %v3347_v15 }
  0x16   :  { %3352 = vmatprep.subr.bf16.mxu0 %v3351_v18 }
  0x19   :  { %3354 = vmatpush3.bf16.msra.mxu0 %v3351_v18 }
  0x1c   :  { %3212 = vmatmul.mubr.msk.f32.vlgmr.msra.gmra.mrb[0].mxu0 %vm78_vm0, %v43_v19 }
  0x1d   :  { %3214 = vmatprep.mubr.msk.f32.mxu0 %vm78_vm0, %v44_v20  ;;  %v3363_v20 = vpack.c.bf16 %v630_v17, %v629_v16 }
  0x1f   :  { %3364 = vmatprep.subr.bf16.mxu1 %v3363_v20 }
  0x20   :  { %3215 = vmatmul.mubr.msk.f32.gmra.mrb[2].mxu0 %vm78_vm0, %v45_v21  ;;  %3366 = vmatpush3.bf16.msra.mxu1 %v3363_v20 }
  0x21   :  { %3217 = vmatprep.mubr.msk.f32.mxu0 %vm78_vm0, %v46_v22 }
  0x24   :  { %3218 = vmatmul.mubr.msk.f32.gmra.mrb[4].mxu0 %vm78_vm0, %v47_v23 }
  0x25   :  { %3220 = vmatprep.mubr.msk.f32.mxu0 %vm78_vm0, %v48_v24 }
  0x28   :  { %3221 = vmatmul.mubr.msk.f32.gmra.mrb[6].mxu0 %vm78_vm0, %v49_v25 }
  0x29   :  { %3223 = vmatprep.mubr.msk.f32.mxu0 %vm78_vm0, %v50_v26 }
  0x2c   :  { %3224 = vmatmul.mubr.msk.f32.gmra.mrb[8].mxu0 %vm78_vm0, %v51_v27 }
  0x2d   :  { %3226 = vmatprep.mubr.msk.f32.mxu0 %vm78_vm0, %v52_v28 }
  0x30   :  { %3227 = vmatmul.mubr.msk.f32.gmra.mrb[10].mxu0 %vm78_vm0, %v53_v29 }
  0x31   :  { %3229 = vmatprep.mubr.msk.f32.mxu0 %vm78_vm0, %v54_v30 }
  0x34   :  { %3230 = vmatmul.mubr.msk.f32.gmra.mrb[12].mxu0 %vm78_vm0, %v55_v31 }
  0x35   :  { %3232 = vmatprep.mubr.msk.f32.mxu0 %vm78_vm0, %v56_v32 }
  0x38   :  { %3233 = vmatmul.mubr.msk.f32.gmra.mrb[14].mxu0 %vm78_vm0, %v57_v33 }
  0xef   :  { %v3791_v34 = vpop.f32.mrb[0].mxu0 }
  0xf0   :  { %v3793_v35 = vpop.f32.mrb[1].mxu0  ;;  %v3797_v36 = vmul.f32 %v3791_v34, %v3791_v34 }
  0xf1   :  { %v3807_v38 = vmul.f32 %v3793_v35, %v3793_v35 }
  0xf2   :  { %370 = vrot.lane.b32.xlu1 %v3797_v36, %s3645_s9  ;;  %306 = vrot.lane.b32.xlu0 %v3797_v36, %s3646_s10 }
  0xf3   :  { %v3803_v37 = vpop.f32.mrb[2].mxu0 }
  0xf4   :  { %v3809_v39 = vpop.f32.mrb[3].mxu0  ;;  %v3817_v40 = vmul.f32 %v3803_v37, %v3803_v37 }
  0xf5   :  { %v3821_v41 = vmul.f32 %v3809_v39, %v3809_v39 }
  0xf6   :  { %368 = vrot.lane.b32.xlu1 %v3807_v38, %s3645_s9  ;;  %304 = vrot.lane.b32.xlu0 %v3807_v38, %s3646_s10 }
  0xf7   :  { %v3823_v42 = vpop.f32.mrb[4].mxu0 }
  0xf8   :  { %v3825_v43 = vpop.f32.mrb[5].mxu0  ;;  %v3841_v46 = vmul.f32 %v3823_v42, %v3823_v42 }
  0xf9   :  { %v3845_v47 = vmul.f32 %v3825_v43, %v3825_v43 }
  0xfa   :  { %310 = vrot.lane.b32.xlu1 %v3817_v40, %s3646_s10  ;;  %308 = vrot.lane.b32.xlu0 %v3821_v41, %s3646_s10 }
  0xfb   :  { %v3831_v44 = vpop.f32.mrb[6].mxu0 }
  0xfc   :  { %v3833_v45 = vpop.f32.mrb[7].mxu0  ;;  %v3865_v52 = vmul.f32 %v3831_v44, %v3831_v44 }
  0xfd   :  { %v3869_v53 = vmul.f32 %v3833_v45, %v3833_v45 }
  0xfe   :  { %374 = vrot.lane.b32.xlu1 %v3817_v40, %s3645_s9  ;;  %372 = vrot.lane.b32.xlu0 %v3821_v41, %s3645_s9 }
  0xff   :  { %v3847_v48 = vpop.f32.mrb[8].mxu0 }
 0x100   :  { %v3849_v49 = vpop.f32.mrb[9].mxu0  ;;  %v3889_v58 = vmul.f32 %v3847_v48, %v3847_v48 }
 0x101   :  { %v3893_v59 = vmul.f32 %v3849_v49, %v3849_v49 }
 0x102   :  { %314 = vrot.lane.b32.xlu1 %v3841_v46, %s3646_s10  ;;  %312 = vrot.lane.b32.xlu0 %v3845_v47, %s3646_s10 }
 0x103   :  { %v3855_v50 = vpop.f32.mrb[10].mxu0 }
 0x104   :  { %v3857_v51 = vpop.f32.mrb[11].mxu0  ;;  %v3905_v60 = vmul.f32 %v3855_v50, %v3855_v50 }
 0x105   :  { %v3909_v61 = vmul.f32 %v3857_v51, %v3857_v51 }
 0x106   :  { %378 = vrot.lane.b32.xlu1 %v3841_v46, %s3645_s9  ;;  %376 = vrot.lane.b32.xlu0 %v3845_v47, %s3645_s9 }
 0x107   :  { %v3871_v54 = vpop.f32.mrb[12].mxu0 }
 0x108   :  { %v3873_v55 = vpop.f32.mrb[13].mxu0  ;;  %v3921_v62 = vmul.f32 %v3871_v54, %v3871_v54 }
 0x109   :  { %v3925_v63 = vmul.f32 %v3873_v55, %v3873_v55 }
 0x10a   :  { %318 = vrot.lane.b32.xlu1 %v3865_v52, %s3646_s10  ;;  %316 = vrot.lane.b32.xlu0 %v3869_v53, %s3646_s10 }
 0x10b   :  { %v3879_v56 = vpop.f32.mrb[14].mxu0 }
 0x10c   :  { %v3881_v57 = vpop.f32.mrb[15].mxu0  ;;  %v3937_v0 = vmul.f32 %v3879_v56, %v3879_v56 }
 0x10d   :  { %v3941_v1 = vmul.f32 %v3881_v57, %v3881_v57 }
 0x10e   :  { %382 = vrot.lane.b32.xlu1 %v3865_v52, %s3645_s9  ;;  %380 = vrot.lane.b32.xlu0 %v3869_v53, %s3645_s9 }
 0x112   :  { %322 = vrot.lane.b32.xlu1 %v3889_v58, %s3646_s10  ;;  %320 = vrot.lane.b32.xlu0 %v3893_v59, %s3646_s10 }
 0x116   :  { %386 = vrot.lane.b32.xlu1 %v3889_v58, %s3645_s9  ;;  %384 = vrot.lane.b32.xlu0 %v3893_v59, %s3645_s9 }
 0x11a   :  { %326 = vrot.lane.b32.xlu1 %v3905_v60, %s3646_s10  ;;  %324 = vrot.lane.b32.xlu0 %v3909_v61, %s3646_s10 }
 0x11e   :  { %390 = vrot.lane.b32.xlu1 %v3905_v60, %s3645_s9  ;;  %388 = vrot.lane.b32.xlu0 %v3909_v61, %s3645_s9 }
 0x122   :  { %330 = vrot.lane.b32.xlu1 %v3921_v62, %s3646_s10  ;;  %328 = vrot.lane.b32.xlu0 %v3925_v63, %s3646_s10 }
 0x126   :  { %394 = vrot.lane.b32.xlu1 %v3921_v62, %s3645_s9  ;;  %392 = vrot.lane.b32.xlu0 %v3925_v63, %s3645_s9 }
 0x12a   :  { %334 = vrot.lane.b32.xlu1 %v3937_v0, %s3646_s10  ;;  %332 = vrot.lane.b32.xlu0 %v3941_v1, %s3646_s10 }
 0x12e   :  { %398 = vrot.lane.b32.xlu1 %v3937_v0, %s3645_s9  ;;  %396 = vrot.lane.b32.xlu0 %v3941_v1, %s3645_s9 }
 0x164   :  { %v371_v2 = vpop.permute.xlu1 %370  ;;  %v307_v3 = vpop.permute.xlu0 %306 }
 0x165   :  { %v353_v6 = vadd.f32 %v307_v3, %v3797_v36 }
 0x167   :  { %v417_v8 = vadd.f32 %v371_v2, %v353_v6 }
 0x168   :  { %v369_v11 = vpop.permute.xlu1 %368  ;;  %v305_v12 = vpop.permute.xlu0 %304 }
 0x169   :  { %v352_v14 = vadd.f32 %v305_v12, %v3807_v38  ;;  %3389 = vrsqrt.f32 %v417_v8  ;;  %vm441_vm1 = vcmp.eq.f32.partialorder %v417_v8, inf  ;;  %v444_v31 = vand.u32 2147483648, %v417_v8 }
 0x16a   :  { %vm443_vm2 = vcmp.eq.f32.partialorder %v417_v8, 0.0 }
 0x16b   :  { %v416_v15 = vadd.f32 %v369_v11, %v352_v14 }
 0x16c   :  { %v311_v18 = vpop.permute.xlu1 %310  ;;  %v309_v19 = vpop.permute.xlu0 %308 }
 0x16d   :  { %3391 = vrsqrt.f32 %v416_v15  ;;  %v355_v21 = vadd.f32 %v311_v18, %v3817_v40  ;;  %v354_v22 = vadd.f32 %v309_v19, %v3821_v41  ;;  %vm434_vm3 = vcmp.eq.f32.partialorder %v416_v15, inf }
 0x16e   :  { %v437_v6 = vand.u32 2147483648, %v416_v15  ;;  %vm436_vm4 = vcmp.eq.f32.partialorder %v416_v15, 0.0 }
 0x170   :  { %v375_v23 = vpop.permute.xlu1 %374  ;;  %v373_v24 = vpop.permute.xlu0 %372 }
 0x171   :  { %v419_v25 = vadd.f32 %v375_v23, %v355_v21  ;;  %v418_v26 = vadd.f32 %v373_v24, %v354_v22 }
 0x173   :  { %v3390_v27 = vpop.eup %3389  ;;  %3393 = vrsqrt.f32 %v419_v25  ;;  %vm455_vm5 = vcmp.eq.f32.partialorder %v419_v25, inf  ;;  %vm457_vm6 = vcmp.eq.f32.partialorder %v419_v25, 0.0  ;;  %v458_v14 = vand.u32 2147483648, %v419_v25 }
 0x174   :  { %v315_v28 = vpop.permute.xlu1 %314  ;;  %v313_v29 = vpop.permute.xlu0 %312  ;;  %v440_v30 = vmul.f32 %v3390_v27, %v417_v8  ;;  %3395 = vrsqrt.f32 %v418_v26  ;;  %vm448_vm7 = vcmp.eq.f32.partialorder %v418_v26, inf  ;;  %vm450_vm8 = vcmp.eq.f32.partialorder %v418_v26, 0.0 }
 0x175   :  { %v357_v36 = vadd.f32 %v315_v28, %v3841_v46  ;;  %v356_v38 = vadd.f32 %v313_v29, %v3845_v47  ;;  %v451_v19 = vand.u32 2147483648, %v418_v26 }
 0x176   :  { %v442_v32 = vsel %vm441_vm1, %v417_v8, %v440_v30 }
 0x177   :  { %v3392_v33 = vpop.eup %3391  ;;  %v445_v40 = vsel %vm443_vm2, %v444_v31, %v442_v32 }
 0x178   :  { %v379_v41 = vpop.permute.xlu1 %378  ;;  %v377_v2 = vpop.permute.xlu0 %376  ;;  %562 = vrot.lane.b32.xlu1 %v445_v40, %s3647_s3  ;;  %v433_v3 = vmul.f32 %v3392_v33, %v416_v15 }
 0x179   :  { %v421_v4 = vadd.f32 %v379_v41, %v357_v36  ;;  %v420_v5 = vadd.f32 %v377_v2, %v356_v38 }
 0x17a   :  { %v435_v7 = vsel %vm434_vm3, %v416_v15, %v433_v3 }
 0x17b   :  { %v438_v9 = vsel %vm436_vm4, %v437_v6, %v435_v7  ;;  %3397 = vrsqrt.f32 %v421_v4  ;;  %vm469_vm9 = vcmp.eq.f32.partialorder %v421_v4, inf  ;;  %vm471_vm10 = vcmp.eq.f32.partialorder %v421_v4, 0.0 }
 0x17c   :  { %v319_v8 = vpop.permute.xlu1 %318  ;;  %v317_v10 = vpop.permute.xlu0 %316  ;;  %560 = vrot.lane.b32.xlu0 %v438_v9, %s3647_s3  ;;  %3399 = vrsqrt.f32 %v420_v5  ;;  %v472_v31 = vand.u32 2147483648, %v421_v4  ;;  %vm462_vm11 = vcmp.eq.f32.partialorder %v420_v5, inf  ;;  %vm464_vm12 = vcmp.eq.f32.partialorder %v420_v5, 0.0 }
 0x17d   :  { %v3394_v46 = vpop.eup %3393  ;;  %v359_v12 = vadd.f32 %v319_v8, %v3865_v52  ;;  %v358_v13 = vadd.f32 %v317_v10, %v3869_v53  ;;  %v465_v38 = vand.u32 2147483648, %v420_v5 }
 0x17e   :  { %v3396_v47 = vpop.eup %3395  ;;  %v454_v11 = vmul.f32 %v3394_v46, %v419_v25 }
 0x17f   :  { %v447_v16 = vmul.f32 %v3396_v47, %v418_v26 }
 0x180   :  { %v383_v17 = vpop.permute.xlu1 %382  ;;  %v381_v15 = vpop.permute.xlu0 %380  ;;  %v456_v18 = vsel %vm455_vm5, %v419_v25, %v454_v11 }
 0x181   :  { %v423_v20 = vadd.f32 %v383_v17, %v359_v12  ;;  %v422_v21 = vadd.f32 %v381_v15, %v358_v13  ;;  %v459_v22 = vsel %vm457_vm6, %v458_v14, %v456_v18  ;;  %v449_v23 = vsel %vm448_vm7, %v418_v26, %v447_v16 }
 0x182   :  { %566 = vrot.lane.b32.xlu1 %v459_v22, %s3647_s3  ;;  %v452_v24 = vsel %vm450_vm8, %v451_v19, %v449_v23 }
 0x183   :  { %564 = vrot.lane.b32.xlu0 %v452_v24, %s3647_s3  ;;  %3401 = vrsqrt.f32 %v423_v20  ;;  %vm483_vm13 = vcmp.eq.f32.partialorder %v423_v20, inf  ;;  %vm485_vm14 = vcmp.eq.f32.partialorder %v423_v20, 0.0  ;;  %v486_v46 = vand.u32 2147483648, %v423_v20 }
 0x184   :  { %v323_v52 = vpop.permute.xlu1 %322  ;;  %v321_v53 = vpop.permute.xlu0 %320  ;;  %3403 = vrsqrt.f32 %v422_v21  ;;  %vm476_vm15 = vcmp.eq.f32.partialorder %v422_v21, inf  ;;  %vm478_vm0 = vcmp.eq.f32.partialorder %v422_v21, 0.0  ;;  %v479_v13 = vand.u32 2147483648, %v422_v21 }
 0x185   :  { %v3398_v27 = vpop.eup %3397  ;;  %v361_v25 = vadd.f32 %v323_v52, %v3889_v58  ;;  %v360_v30 = vadd.f32 %v321_v53, %v3893_v59 }
 0x186   :  { %v3400_v28 = vpop.eup %3399  ;;  %v468_v29 = vmul.f32 %v3398_v27, %v421_v4 }
 0x187   :  { %v461_v26 = vmul.f32 %v3400_v28, %v420_v5 }
 0x188   :  { %v387_v32 = vpop.permute.xlu1 %386  ;;  %v385_v33 = vpop.permute.xlu0 %384  ;;  %v470_v36 = vsel %vm469_vm9, %v421_v4, %v468_v29 }
 0x189   :  { %v425_v40 = vadd.f32 %v387_v32, %v361_v25  ;;  %v424_v41 = vadd.f32 %v385_v33, %v360_v30  ;;  %v473_v2 = vsel %vm471_vm10, %v472_v31, %v470_v36  ;;  %v463_v3 = vsel %vm462_vm11, %v420_v5, %v461_v26 }
 0x18a   :  { %570 = vrot.lane.b32.xlu1 %v473_v2, %s3647_s3  ;;  %v466_v6 = vsel %vm464_vm12, %v465_v38, %v463_v3 }
 0x18b   :  { %568 = vrot.lane.b32.xlu0 %v466_v6, %s3647_s3  ;;  %3405 = vrsqrt.f32 %v425_v40  ;;  %vm497_vm1 = vcmp.eq.f32.partialorder %v425_v40, inf  ;;  %vm499_vm2 = vcmp.eq.f32.partialorder %v425_v40, 0.0  ;;  %v500_v52 = vand.u32 2147483648, %v425_v40 }
 0x18c   :  { %v327_v58 = vpop.permute.xlu1 %326  ;;  %v325_v59 = vpop.permute.xlu0 %324  ;;  %3407 = vrsqrt.f32 %v424_v41  ;;  %vm490_vm3 = vcmp.eq.f32.partialorder %v424_v41, inf  ;;  %vm492_vm4 = vcmp.eq.f32.partialorder %v424_v41, 0.0  ;;  %v493_v29 = vand.u32 2147483648, %v424_v41 }
 0x18d   :  { %v3402_v7 = vpop.eup %3401  ;;  %v363_v4 = vadd.f32 %v327_v58, %v3905_v60  ;;  %v362_v10 = vadd.f32 %v325_v59, %v3909_v61 }
 0x18e   :  { %v3404_v9 = vpop.eup %3403  ;;  %v482_v8 = vmul.f32 %v3402_v7, %v423_v20 }
 0x18f   :  { %v475_v5 = vmul.f32 %v3404_v9, %v422_v21 }
 0x190   :  { %v391_v47 = vpop.permute.xlu1 %390  ;;  %v389_v11 = vpop.permute.xlu0 %388  ;;  %v484_v12 = vsel %vm483_vm13, %v423_v20, %v482_v8 }
 0x191   :  { %v427_v14 = vadd.f32 %v391_v47, %v363_v4  ;;  %v426_v16 = vadd.f32 %v389_v11, %v362_v10  ;;  %v487_v17 = vsel %vm485_vm14, %v486_v46, %v484_v12  ;;  %v477_v15 = vsel %vm476_vm15, %v422_v21, %v475_v5 }
 0x192   :  { %574 = vrot.lane.b32.xlu1 %v487_v17, %s3647_s3  ;;  %v480_v18 = vsel %vm478_vm0, %v479_v13, %v477_v15 }
 0x193   :  { %572 = vrot.lane.b32.xlu0 %v480_v18, %s3647_s3  ;;  %3409 = vrsqrt.f32 %v427_v14  ;;  %vm511_vm5 = vcmp.eq.f32.partialorder %v427_v14, inf  ;;  %vm513_vm6 = vcmp.eq.f32.partialorder %v427_v14, 0.0  ;;  %v514_v3 = vand.u32 2147483648, %v427_v14 }
 0x194   :  { %v331_v60 = vpop.permute.xlu1 %330  ;;  %v329_v61 = vpop.permute.xlu0 %328  ;;  %3411 = vrsqrt.f32 %v426_v16  ;;  %vm504_vm7 = vcmp.eq.f32.partialorder %v426_v16, inf  ;;  %vm506_vm8 = vcmp.eq.f32.partialorder %v426_v16, 0.0  ;;  %v507_v7 = vand.u32 2147483648, %v426_v16 }
 0x195   :  { %v3406_v19 = vpop.eup %3405  ;;  %v365_v20 = vadd.f32 %v331_v60, %v3921_v62  ;;  %v364_v24 = vadd.f32 %v329_v61, %v3925_v63 }
 0x196   :  { %v3408_v22 = vpop.eup %3407  ;;  %v496_v23 = vmul.f32 %v3406_v19, %v425_v40 }
 0x197   :  { %v489_v21 = vmul.f32 %v3408_v22, %v424_v41 }
 0x198   :  { %v395_v53 = vpop.permute.xlu1 %394  ;;  %v393_v27 = vpop.permute.xlu0 %392  ;;  %v498_v28 = vsel %vm497_vm1, %v425_v40, %v496_v23  ;;  %vm608_vm1 = vcmask 261120  }
 0x199   :  { %v429_v25 = vadd.f32 %v395_v53, %v365_v20  ;;  %v428_v30 = vadd.f32 %v393_v27, %v364_v24  ;;  %v501_v31 = vsel %vm499_vm2, %v500_v52, %v498_v28  ;;  %v491_v26 = vsel %vm490_vm3, %v424_v41, %v489_v21  ;;  %v3061_v21 = vld [vmem:[%s5572_s6 + $0x2] ss:$0 sm:$0xff]  ;;  %v3062_v53 = vld [vmem:[%s5572_s6 + $0x3] ss:$0 sm:$0xff] }
 0x19a   :  { %578 = vrot.lane.b32.xlu1 %v501_v31, %s3647_s3  ;;  %v494_v32 = vsel %vm492_vm4, %v493_v29, %v491_v26  ;;  %v26_v27 = vld [vmem:[%s5573_s0] sm:$0xff]  ;;  %v27_v29 = vld [vmem:[%s5573_s0 + $0x8] sm:$0xff]  ;;  %vm635_vm2 = vcmask 392192   ;;  %v29_v26 = vld [vmem:[%s5573_s0 + $0x18] sm:$0xff]  ;;  %vm1358_vm3 = vcmask 130048  }
 0x19b   :  { %576 = vrot.lane.b32.xlu0 %v494_v32, %s3647_s3  ;;  %3413 = vrsqrt.f32 %v429_v25  ;;  %vm525_vm9 = vcmp.eq.f32.partialorder %v429_v25, inf  ;;  %v528_v47 = vand.u32 2147483648, %v429_v25  ;;  %vm527_vm10 = vcmp.eq.f32.partialorder %v429_v25, 0.0  ;;  %v28_v32 = vld [vmem:[%s5573_s0 + $0x10] sm:$0xff] }
 0x19c   :  { %v335_v62 = vpop.permute.xlu1 %334  ;;  %v333_v63 = vpop.permute.xlu0 %332  ;;  %3415 = vrsqrt.f32 %v428_v30  ;;  %vm518_vm11 = vcmp.eq.f32.partialorder %v428_v30, inf  ;;  %v521_v13 = vand.u32 2147483648, %v428_v30  ;;  %vm520_vm12 = vcmp.eq.f32.partialorder %v428_v30, 0.0 }
 0x19d   :  { %v3410_v33 = vpop.eup %3409  ;;  %v367_v40 = vadd.f32 %v335_v62, %v3937_v0  ;;  %v366_v2 = vadd.f32 %v333_v63, %v3941_v1 }
 0x19e   :  { %v3412_v36 = vpop.eup %3411  ;;  %v510_v38 = vmul.f32 %v3410_v33, %v427_v14 }
 0x19f   :  { %v503_v41 = vmul.f32 %v3412_v36, %v426_v16 }
 0x1a0   :  { %v399_v6 = vpop.permute.xlu1 %398  ;;  %v397_v58 = vpop.permute.xlu0 %396  ;;  %v512_v59 = vsel %vm511_vm5, %v427_v14, %v510_v38  ;;  %v31_v38 = vld [vmem:[%s5573_s0 + $0x28] sm:$0xff] }
 0x1a1   :  { %v431_v9 = vadd.f32 %v399_v6, %v367_v40  ;;  %v430_v8 = vadd.f32 %v397_v58, %v366_v2  ;;  %v515_v4 = vsel %vm513_vm6, %v514_v3, %v512_v59  ;;  %v505_v10 = vsel %vm504_vm7, %v426_v16, %v503_v41  ;;  %v30_v40 = vld [vmem:[%s5573_s0 + $0x20] sm:$0xff]  ;;  %v33_v58 = vld [vmem:[%s5573_s0 + $0x38] sm:$0xff]  ;;  %v32_v59 = vld [vmem:[%s5573_s0 + $0x30] sm:$0xff] }
 0x1a2   :  { %582 = vrot.lane.b32.xlu1 %v515_v4, %s3647_s3  ;;  %v508_v46 = vsel %vm506_vm8, %v507_v7, %v505_v10  ;;  %v35_v10 = vld [vmem:[%s5573_s0 + $0x48] sm:$0xff] }
 0x1a3   :  { %580 = vrot.lane.b32.xlu0 %v508_v46, %s3647_s3  ;;  %3417 = vrsqrt.f32 %v431_v9  ;;  %vm539_vm13 = vcmp.eq.f32.partialorder %v431_v9, inf  ;;  %v542_v61 = vand.u32 2147483648, %v431_v9  ;;  %vm541_vm14 = vcmp.eq.f32.partialorder %v431_v9, 0.0  ;;  %v34_v46 = vld [vmem:[%s5573_s0 + $0x40] sm:$0xff] }
 0x1a4   :  { %3419 = vrsqrt.f32 %v430_v8  ;;  %vm532_vm15 = vcmp.eq.f32.partialorder %v430_v8, inf  ;;  %v535_v23 = vand.u32 2147483648, %v430_v8  ;;  %vm534_vm0 = vcmp.eq.f32.partialorder %v430_v8, 0.0 }
 0x1a5   :  { %v3414_v0 = vpop.eup %3413 }
 0x1a6   :  { %v3416_v1 = vpop.eup %3415  ;;  %v524_v5 = vmul.f32 %v3414_v0, %v429_v25 }
 0x1a7   :  { %v517_v11 = vmul.f32 %v3416_v1, %v428_v30 }
 0x1a8   :  { %v526_v12 = vsel %vm525_vm9, %v429_v25, %v524_v5 }
 0x1a9   :  { %v529_v14 = vsel %vm527_vm10, %v528_v47, %v526_v12  ;;  %v519_v17 = vsel %vm518_vm11, %v428_v30, %v517_v11  ;;  %v37_v11 = vld [vmem:[%s5573_s0 + $0x58] sm:$0xff]  ;;  %v36_v12 = vld [vmem:[%s5573_s0 + $0x50] sm:$0xff] }
 0x1aa   :  { %586 = vrot.lane.b32.xlu1 %v529_v14, %s3647_s3  ;;  %v522_v16 = vsel %vm520_vm12, %v521_v13, %v519_v17 }
 0x1ab   :  { %584 = vrot.lane.b32.xlu0 %v522_v16, %s3647_s3 }
 0x1ad   :  { %v3418_v15 = vpop.eup %3417 }
 0x1ae   :  { %v3420_v18 = vpop.eup %3419  ;;  %v538_v60 = vmul.f32 %v3418_v15, %v431_v9  ;;  %v39_v15 = vld [vmem:[%s5573_s0 + $0x68] sm:$0xff] }
 0x1af   :  { %v531_v19 = vmul.f32 %v3420_v18, %v430_v8  ;;  %v38_v18 = vld [vmem:[%s5573_s0 + $0x60] sm:$0xff] }
 0x1b0   :  { %v540_v22 = vsel %vm539_vm13, %v431_v9, %v538_v60 }
 0x1b1   :  { %v543_v20 = vsel %vm541_vm14, %v542_v61, %v540_v22  ;;  %v533_v24 = vsel %vm532_vm15, %v430_v8, %v531_v19 }
 0x1b2   :  { %590 = vrot.lane.b32.xlu1 %v543_v20, %s3647_s3  ;;  %v536_v52 = vsel %vm534_vm0, %v535_v23, %v533_v24  ;;  %v41_v23 = vld [vmem:[%s5573_s0 + $0x78] sm:$0xff]  ;;  %v40_v20 = vld [vmem:[%s5573_s0 + $0x70] sm:$0xff] }
 0x1b3   :  { %588 = vrot.lane.b32.xlu0 %v536_v52, %s3647_s3 }
 0x1b6   :  { %1559 = vrot.lane.b32.xlu1 %v3793_v35, %s3646_s10 }
 0x1b7   :  { %1275 = vrot.lane.b32.xlu0 %v3061_v21, %s3648_s24 }
 0x1ba   :  { %1563 = vrot.lane.b32.xlu1 %v3809_v39, %s3646_s10 }
 0x1bb   :  { %1412 = vrot.lane.b32.xlu0 %v3062_v53, %s3648_s24 }
 0x1be   :  { %1565 = vrot.lane.b32.xlu1 %v3803_v37, %s3646_s10 }
 0x1bf   :  { %1561 = vrot.lane.b32.xlu0 %v3791_v34, %s3646_s10 }
 0x1c2   :  { %1569 = vrot.lane.b32.xlu1 %v3823_v42, %s3646_s10 }
 0x1c3   :  { %1567 = vrot.lane.b32.xlu0 %v3825_v43, %s3646_s10 }
 0x1c6   :  { %1573 = vrot.lane.b32.xlu1 %v3831_v44, %s3646_s10 }
 0x1c7   :  { %1571 = vrot.lane.b32.xlu0 %v3833_v45, %s3646_s10 }
 0x1ca   :  { %1577 = vrot.lane.b32.xlu1 %v3847_v48, %s3646_s10 }
 0x1cb   :  { %1575 = vrot.lane.b32.xlu0 %v3849_v49, %s3646_s10 }
 0x1ce   :  { %1581 = vrot.lane.b32.xlu1 %v3855_v50, %s3646_s10 }
 0x1cf   :  { %1579 = vrot.lane.b32.xlu0 %v3857_v51, %s3646_s10 }
 0x1d2   :  { %1585 = vrot.lane.b32.xlu1 %v3871_v54, %s3646_s10 }
 0x1d3   :  { %1583 = vrot.lane.b32.xlu0 %v3873_v55, %s3646_s10 }
 0x1d6   :  { %1589 = vrot.lane.b32.xlu1 %v3879_v56, %s3646_s10 }
 0x1d7   :  { %1587 = vrot.lane.b32.xlu0 %v3881_v57, %s3646_s10 }
 0x1da   :  { %1881 = vrot.lane.b32.xlu1 %v3791_v34, %s3645_s9 }
 0x1db   :  { %1879 = vrot.lane.b32.xlu0 %v3793_v35, %s3645_s9 }
 0x1de   :  { %1885 = vrot.lane.b32.xlu1 %v3803_v37, %s3645_s9 }
 0x1df   :  { %1883 = vrot.lane.b32.xlu0 %v3809_v39, %s3645_s9 }
 0x1e2   :  { %1889 = vrot.lane.b32.xlu1 %v3823_v42, %s3645_s9 }
 0x1e3   :  { %1887 = vrot.lane.b32.xlu0 %v3825_v43, %s3645_s9 }
 0x1e6   :  { %1893 = vrot.lane.b32.xlu1 %v3831_v44, %s3645_s9 }
 0x1e7   :  { %1891 = vrot.lane.b32.xlu0 %v3833_v45, %s3645_s9 }
 0x1ea   :  { %1897 = vrot.lane.b32.xlu1 %v3847_v48, %s3645_s9  ;;  %v563_v28 = vpop.permute.xlu1 %562 }
 0x1eb   :  { %1895 = vrot.lane.b32.xlu0 %v3849_v49, %s3645_s9  ;;  %v610_v31 = vsel %vm608_vm1, %v27_v29, %v563_v28  ;;  %v942_v28 = vld [vmem:[%s5574_s4 + $0x8] sm:$0xff] }
 0x1ee   :  { %1901 = vrot.lane.b32.xlu1 %v3855_v50, %s3645_s9  ;;  %v561_v25 = vpop.permute.xlu0 %560 }
 0x1ef   :  { %1899 = vrot.lane.b32.xlu0 %v3857_v51, %s3645_s9  ;;  %v609_v30 = vsel %vm608_vm1, %v26_v27, %v561_v25  ;;  %v941_v27 = vld [vmem:[%s5574_s4] sm:$0xff]  ;;  %v943_v25 = vld [vmem:[%s5574_s4 + $0x10] sm:$0xff] }
 0x1f0   :  { %3247 = vmatprep.mubr.msk.f32.mxu1 %vm635_vm2, %v609_v30  ;;  %v3367_v29 = vpack.c.bf16 %v942_v28, %v941_v27  ;;  %v944_v30 = vld [vmem:[%s5574_s4 + $0x18] sm:$0xff] }
 0x1f1   :  { %3248 = vmatmul.mubr.msk.f32.vlgmr.msra.gmra.mrb[0].mxu1 %vm635_vm2, %v610_v31  ;;  %v3371_v31 = vpack.c.bf16 %v944_v30, %v943_v25 }
 0x1f2   :  { %1905 = vrot.lane.b32.xlu1 %v3871_v54, %s3645_s9  ;;  %3368 = vmatprep.subr.bf16.mxu1 %v3367_v29 }
 0x1f3   :  { %1903 = vrot.lane.b32.xlu0 %v3873_v55, %s3645_s9  ;;  %3370 = vmatpush3.bf16.msra.mxu1 %v3367_v29 }
 0x1f4   :  { %v567_v62 = vpop.permute.xlu1 %566  ;;  %3372 = vmatprep.subr.bf16.mxu1 %v3371_v31 }
 0x1f5   :  { %v612_v63 = vsel %vm608_vm1, %v29_v26, %v567_v62  ;;  %v565_v33 = vpop.permute.xlu0 %564  ;;  %v4166_v26 = vld [vmem:[%s5572_s6] ss:$0 sm:$0xff] }
 0x1f6   :  { %v611_v36 = vsel %vm608_vm1, %v28_v32, %v565_v33  ;;  %1909 = vrot.lane.b32.xlu1 %v3879_v56, %s3645_s9 }
 0x1f7   :  { %1907 = vrot.lane.b32.xlu0 %v3881_v57, %s3645_s9  ;;  %3250 = vmatprep.mubr.msk.f32.mxu1 %vm635_vm2, %v611_v36 }
 0x1f8   :  { %3251 = vmatmul.mubr.msk.f32.gmra.mrb[2].mxu1 %vm635_vm2, %v612_v63 }
 0x1f9   :  { %3374 = vmatpush3.bf16.msra.mxu1 %v3371_v31 }
 0x1fc   :  { %v571_v2 = vpop.permute.xlu1 %570 }
 0x1fd   :  { %v614_v3 = vsel %vm608_vm1, %v31_v38, %v571_v2  ;;  %v569_v41 = vpop.permute.xlu0 %568 }
 0x1fe   :  { %v613_v6 = vsel %vm608_vm1, %v30_v40, %v569_v41 }
 0x1ff   :  { %3253 = vmatprep.mubr.msk.f32.mxu1 %vm635_vm2, %v613_v6 }
 0x200   :  { %3254 = vmatmul.mubr.msk.f32.gmra.mrb[4].mxu1 %vm635_vm2, %v614_v3 }
 0x204   :  { %v575_v7 = vpop.permute.xlu1 %574 }
 0x205   :  { %v616_v9 = vsel %vm608_vm1, %v33_v58, %v575_v7  ;;  %v573_v8 = vpop.permute.xlu0 %572 }
 0x206   :  { %v615_v4 = vsel %vm608_vm1, %v32_v59, %v573_v8 }
 0x207   :  { %3256 = vmatprep.mubr.msk.f32.mxu1 %vm635_vm2, %v615_v4 }
 0x208   :  { %3257 = vmatmul.mubr.msk.f32.gmra.mrb[6].mxu1 %vm635_vm2, %v616_v9 }
 0x20c   :  { %v579_v0 = vpop.permute.xlu1 %578 }
 0x20d   :  { %v618_v1 = vsel %vm608_vm1, %v35_v10, %v579_v0  ;;  %v577_v5 = vpop.permute.xlu0 %576 }
 0x20e   :  { %v617_v47 = vsel %vm608_vm1, %v34_v46, %v577_v5 }
 0x20f   :  { %3259 = vmatprep.mubr.msk.f32.mxu1 %vm635_vm2, %v617_v47 }
 0x210   :  { %3260 = vmatmul.mubr.msk.f32.gmra.mrb[8].mxu1 %vm635_vm2, %v618_v1 }
 0x214   :  { %v583_v13 = vpop.permute.xlu1 %582 }
 0x215   :  { %v620_v14 = vsel %vm608_vm1, %v37_v11, %v583_v13  ;;  %v581_v17 = vpop.permute.xlu0 %580 }
 0x216   :  { %v619_v16 = vsel %vm608_vm1, %v36_v12, %v581_v17 }
 0x217   :  { %3262 = vmatprep.mubr.msk.f32.mxu1 %vm635_vm2, %v619_v16 }
 0x218   :  { %3263 = vmatmul.mubr.msk.f32.gmra.mrb[10].mxu1 %vm635_vm2, %v620_v14 }
 0x21c   :  { %v587_v60 = vpop.permute.xlu1 %586 }
 0x21d   :  { %v622_v61 = vsel %vm608_vm1, %v39_v15, %v587_v60  ;;  %v585_v19 = vpop.permute.xlu0 %584 }
 0x21e   :  { %v621_v22 = vsel %vm608_vm1, %v38_v18, %v585_v19 }
 0x21f   :  { %3265 = vmatprep.mubr.msk.f32.mxu1 %vm635_vm2, %v621_v22 }
 0x220   :  { %3266 = vmatmul.mubr.msk.f32.gmra.mrb[12].mxu1 %vm635_vm2, %v622_v61 }
 0x224   :  { %v591_v24 = vpop.permute.xlu1 %590 }
 0x225   :  { %v624_v52 = vsel %vm608_vm1, %v41_v23, %v591_v24  ;;  %v589_v21 = vpop.permute.xlu0 %588 }
 0x226   :  { %v623_v53 = vsel %vm608_vm1, %v40_v20, %v589_v21 }
 0x227   :  { %3268 = vmatprep.mubr.msk.f32.mxu1 %vm635_vm2, %v623_v53 }
 0x228   :  { %3269 = vmatmul.mubr.msk.f32.gmra.mrb[14].mxu1 %vm635_vm2, %v624_v52 }
 0x2c4   :  { %v3249_v32 = vpop.f32.mrb[0].mxu1 }
 0x2c5   :  { %v756_v62 = vadd.f32 %v3249_v32, %v4166_v26  ;;  %v750_v63 = vpop.f32.mrb[1].mxu1 }
 0x2c6   :  { %v751_v33 = vadd.f32 %v4166_v26, %v750_v63 }
 0x2c7   :  { %v3013_v36 = vmul.f32 -1.442695, %v756_v62 }
 0x2c8   :  { %v3012_v38 = vmul.f32 -1.442695, %v751_v33 }
 0x2c9   :  { %3421 = vpow2.f32 %v3013_v36 }
 0x2ca   :  { %3423 = vpow2.f32 %v3012_v38 }
 0x2cb   :  { %v3252_v40 = vpop.f32.mrb[2].mxu1 }
 0x2cc   :  { %v766_v2 = vadd.f32 %v3252_v40, %v4166_v26  ;;  %v760_v3 = vpop.f32.mrb[3].mxu1 }
 0x2cd   :  { %v761_v41 = vadd.f32 %v4166_v26, %v760_v3 }
 0x2ce   :  { %v3015_v6 = vmul.f32 -1.442695, %v766_v2 }
 0x2cf   :  { %v3014_v58 = vmul.f32 -1.442695, %v761_v41 }
 0x2d0   :  { %3425 = vpow2.f32 %v3015_v6 }
 0x2d1   :  { %3427 = vpow2.f32 %v3014_v58 }
 0x2d3   :  { %v3422_v59 = vpop.eup %3421  ;;  %v3255_v7 = vpop.f32.mrb[4].mxu1 }
 0x2d4   :  { %v3424_v9 = vpop.eup %3423  ;;  %v878_v8 = vadd.f32 1.0, %v3422_v59  ;;  %v4173_v4 = vadd.f32 %v3255_v7, %v4166_v26  ;;  %v770_v10 = vpop.f32.mrb[5].mxu1 }
 0x2d5   :  { %v877_v46 = vadd.f32 1.0, %v3424_v9  ;;  %v771_v0 = vadd.f32 %v4166_v26, %v770_v10 }
 0x2d6   :  { %3429 = vrcp.f32 %v878_v8  ;;  %v3017_v1 = vmul.f32 -1.442695, %v4173_v4 }
 0x2d7   :  { %3431 = vrcp.f32 %v877_v46  ;;  %v3016_v5 = vmul.f32 -1.442695, %v771_v0 }
 0x2d8   :  { %3433 = vpow2.f32 %v3017_v1 }
 0x2d9   :  { %3435 = vpow2.f32 %v3016_v5 }
 0x2da   :  { %v3426_v47 = vpop.eup %3425 }
 0x2db   :  { %v3428_v11 = vpop.eup %3427  ;;  %v880_v12 = vadd.f32 1.0, %v3426_v47  ;;  %v3258_v13 = vpop.f32.mrb[6].mxu1 }
 0x2dc   :  { %v879_v14 = vadd.f32 1.0, %v3428_v11  ;;  %v4178_v17 = vadd.f32 %v3258_v13, %v4166_v26  ;;  %v780_v16 = vpop.f32.mrb[7].mxu1 }
 0x2dd   :  { %3437 = vrcp.f32 %v880_v12  ;;  %v4181_v15 = vadd.f32 %v4166_v26, %v780_v16 }
 0x2de   :  { %3439 = vrcp.f32 %v879_v14  ;;  %v3019_v18 = vmul.f32 -1.442695, %v4178_v17 }
 0x2df   :  { %v3018_v60 = vmul.f32 -1.442695, %v4181_v15 }
 0x2e0   :  { %v3430_v61 = vpop.eup %3429  ;;  %3441 = vpow2.f32 %v3019_v18 }
 0x2e1   :  { %v3432_v19 = vpop.eup %3431  ;;  %3443 = vpow2.f32 %v3018_v60  ;;  %v926_v24 = vmul.f32 %v3430_v61, %v756_v62 }
 0x2e2   :  { %v3434_v22 = vpop.eup %3433  ;;  %v925_v23 = vmul.f32 %v3432_v19, %v751_v33 }
 0x2e3   :  { %v3436_v20 = vpop.eup %3435  ;;  %v882_v52 = vadd.f32 1.0, %v3434_v22  ;;  %v3261_v21 = vpop.f32.mrb[8].mxu1 }
 0x2e4   :  { %v881_v53 = vadd.f32 1.0, %v3436_v20  ;;  %v4186_v27 = vadd.f32 %v3261_v21, %v4166_v26  ;;  %v790_v28 = vpop.f32.mrb[9].mxu1  ;;  %3279 = vmatprep.mubr.msk.f32.mxu1 %vm608_vm1, %v925_v23 }
 0x2e5   :  { %3445 = vrcp.f32 %v882_v52  ;;  %v4190_v29 = vadd.f32 %v4166_v26, %v790_v28  ;;  %3280 = vmatmul.mubr.msk.f32.vlgmr.msra.gmra.mrb[16].mxu1 %vm608_vm1, %v926_v24 }
 0x2e6   :  { %3447 = vrcp.f32 %v881_v53  ;;  %v3021_v25 = vmul.f32 -1.442695, %v4186_v27 }
 0x2e7   :  { %v3438_v30 = vpop.eup %3437  ;;  %v3020_v31 = vmul.f32 -1.442695, %v4190_v29 }
 0x2e8   :  { %v3440_v32 = vpop.eup %3439  ;;  %3449 = vpow2.f32 %v3021_v25  ;;  %v928_v33 = vmul.f32 %v3438_v30, %v766_v2 }
 0x2e9   :  { %v927_v62 = vmul.f32 %v3440_v32, %v761_v41  ;;  %3451 = vpow2.f32 %v3020_v31 }
 0x2ea   :  { %v3442_v63 = vpop.eup %3441 }
 0x2eb   :  { %v3444_v36 = vpop.eup %3443  ;;  %v884_v38 = vadd.f32 1.0, %v3442_v63  ;;  %v3264_v40 = vpop.f32.mrb[10].mxu1  ;;  %3282 = vmatprep.mubr.msk.f32.mxu1 %vm608_vm1, %v927_v62 }
 0x2ec   :  { %v883_v3 = vadd.f32 1.0, %v3444_v36  ;;  %v4197_v6 = vadd.f32 %v3264_v40, %v4166_v26  ;;  %v800_v58 = vpop.f32.mrb[11].mxu1  ;;  %3283 = vmatmul.mubr.msk.f32.gmra.mrb[18].mxu1 %vm608_vm1, %v928_v33 }
 0x2ed   :  { %3453 = vrcp.f32 %v884_v38  ;;  %v801_v59 = vadd.f32 %v4166_v26, %v800_v58 }
 0x2ee   :  { %3455 = vrcp.f32 %v883_v3  ;;  %v3023_v41 = vmul.f32 -1.442695, %v4197_v6 }
 0x2ef   :  { %v3446_v7 = vpop.eup %3445  ;;  %v3022_v2 = vmul.f32 -1.442695, %v801_v59 }
 0x2f0   :  { %v3448_v9 = vpop.eup %3447  ;;  %3457 = vpow2.f32 %v3023_v41  ;;  %v930_v46 = vmul.f32 %v3446_v7, %v4173_v4 }
 0x2f1   :  { %v929_v8 = vmul.f32 %v3448_v9, %v771_v0  ;;  %3459 = vpow2.f32 %v3022_v2 }
 0x2f2   :  { %v3450_v10 = vpop.eup %3449 }
 0x2f3   :  { %v3452_v1 = vpop.eup %3451  ;;  %v886_v5 = vadd.f32 1.0, %v3450_v10  ;;  %v3267_v47 = vpop.f32.mrb[12].mxu1  ;;  %3285 = vmatprep.mubr.msk.f32.mxu1 %vm608_vm1, %v929_v8 }
 0x2f4   :  { %v885_v11 = vadd.f32 1.0, %v3452_v1  ;;  %v816_v12 = vadd.f32 %v3267_v47, %v4166_v26  ;;  %v810_v13 = vpop.f32.mrb[13].mxu1  ;;  %3286 = vmatmul.mubr.msk.f32.gmra.mrb[20].mxu1 %vm608_vm1, %v930_v46  ;;  %v2391_v46 = vld [vmem:[%s5575_s5] sm:$0xff]  ;;  %v2392_v1 = vld [vmem:[%s5575_s5 + $0x8] sm:$0xff]  ;;  %v1560_v47 = vpop.permute.xlu1 %1559 }
 0x2f5   :  { %3461 = vrcp.f32 %v886_v5  ;;  %v811_v14 = vadd.f32 %v4166_v26, %v810_v13  ;;  %v3375_v5 = vpack.c.bf16 %v2392_v1, %v2391_v46  ;;  %v4234_v13 = vpop.permute.xlu0 %1275 }
 0x2f6   :  { %3463 = vrcp.f32 %v885_v11  ;;  %v3025_v0 = vmul.f32 -1.442695, %v816_v12 }
 0x2f7   :  { %v3454_v16 = vpop.eup %3453  ;;  %v3024_v18 = vmul.f32 -1.442695, %v811_v14  ;;  %3376 = vmatprep.subr.bf16.mxu0 %v3375_v5  ;;  %3379 = vmatprep.subr.bf16.mxu1 %v3375_v5 }
 0x2f8   :  { %v3456_v60 = vpop.eup %3455  ;;  %3465 = vpow2.f32 %v3025_v0  ;;  %v932_v19 = vmul.f32 %v3454_v16, %v4178_v17  ;;  %3378 = vmatpush3.bf16.msra.mxu0 %v3375_v5  ;;  %3380 = vmatpush3.bf16.msra.mxu1 %v3375_v5  ;;  %v4230_v11 = vpop.permute.xlu1 %1563 }
 0x2f9   :  { %v931_v4 = vmul.f32 %v3456_v60, %v4181_v15  ;;  %3467 = vpow2.f32 %v3024_v18  ;;  %v4238_v0 = vpop.permute.xlu0 %1412 }
 0x2fa   :  { %v3458_v61 = vpop.eup %3457 }
 0x2fb   :  { %v3460_v22 = vpop.eup %3459  ;;  %v888_v23 = vadd.f32 1.0, %v3458_v61  ;;  %v3270_v20 = vpop.f32.mrb[14].mxu1  ;;  %3288 = vmatprep.mubr.msk.f32.mxu1 %vm608_vm1, %v931_v4 }
 0x2fc   :  { %v887_v24 = vadd.f32 1.0, %v3460_v22  ;;  %v826_v52 = vadd.f32 %v3270_v20, %v4166_v26  ;;  %v820_v21 = vpop.f32.mrb[15].mxu1  ;;  %3289 = vmatmul.mubr.msk.f32.gmra.mrb[22].mxu1 %vm608_vm1, %v932_v19 }
 0x2fd   :  { %3469 = vrcp.f32 %v888_v23  ;;  %v821_v53 = vadd.f32 %v4166_v26, %v820_v21  ;;  %v1562_v18 = vpop.permute.xlu0 %1561  ;;  %v4255_v23 = vld [vmem:[%s5572_s6 + $0x1] ss:$0 sm:$0xff] }
 0x2fe   :  { %3471 = vrcp.f32 %v887_v24  ;;  %v3027_v15 = vmul.f32 -1.442695, %v826_v52 }
 0x2ff   :  { %v3462_v28 = vpop.eup %3461  ;;  %v3026_v25 = vmul.f32 -1.442695, %v821_v53 }
 0x300   :  { %v3464_v30 = vpop.eup %3463  ;;  %3473 = vpow2.f32 %v3027_v15  ;;  %v934_v32 = vmul.f32 %v3462_v28, %v4186_v27 }
 0x301   :  { %v933_v17 = vmul.f32 %v3464_v30, %v4190_v29  ;;  %3475 = vpow2.f32 %v3026_v25  ;;  %v4244_v4 = vpop.permute.xlu0 %1567 }
 0x302   :  { %v3466_v31 = vpop.eup %3465 }
 0x303   :  { %v3468_v62 = vpop.eup %3467  ;;  %v890_v63 = vadd.f32 1.0, %v3466_v31  ;;  %3291 = vmatprep.mubr.msk.f32.mxu1 %vm608_vm1, %v933_v17 }
 0x304   :  { %v889_v33 = vadd.f32 1.0, %v3468_v62  ;;  %3292 = vmatmul.mubr.msk.f32.gmra.mrb[24].mxu1 %vm608_vm1, %v934_v32 }
 0x305   :  { %3477 = vrcp.f32 %v890_v63  ;;  %v4248_v19 = vpop.permute.xlu0 %1571 }
 0x306   :  { %3479 = vrcp.f32 %v889_v33 }
 0x307   :  { %v3470_v26 = vpop.eup %3469 }
 0x308   :  { %v3472_v36 = vpop.eup %3471  ;;  %v936_v3 = vmul.f32 %v3470_v26, %v4197_v6 }
 0x309   :  { %v935_v38 = vmul.f32 %v3472_v36, %v801_v59  ;;  %v4257_v20 = vpop.permute.xlu0 %1575 }
 0x30a   :  { %v3474_v40 = vpop.eup %3473 }
 0x30b   :  { %v3476_v29 = vpop.eup %3475  ;;  %v892_v58 = vadd.f32 1.0, %v3474_v40  ;;  %3294 = vmatprep.mubr.msk.f32.mxu1 %vm608_vm1, %v935_v38 }
 0x30c   :  { %v891_v27 = vadd.f32 1.0, %v3476_v29  ;;  %3295 = vmatmul.mubr.msk.f32.gmra.mrb[26].mxu1 %vm608_vm1, %v936_v3 }
 0x30d   :  { %3481 = vrcp.f32 %v892_v58  ;;  %v4273_v31 = vpop.permute.xlu0 %1579 }
 0x30e   :  { %3483 = vrcp.f32 %v891_v27 }
 0x30f   :  { %v3478_v41 = vpop.eup %3477 }
 0x310   :  { %v3480_v7 = vpop.eup %3479  ;;  %v938_v9 = vmul.f32 %v3478_v41, %v816_v12  ;;  %v4232_v12 = vpop.permute.xlu1 %1565 }
 0x311   :  { %v937_v2 = vmul.f32 %v3480_v7, %v811_v14  ;;  %v4297_v41 = vpop.permute.xlu0 %1583 }
 0x313   :  { %3297 = vmatprep.mubr.msk.f32.mxu1 %vm608_vm1, %v937_v2 }
 0x314   :  { %3298 = vmatmul.mubr.msk.f32.gmra.mrb[28].mxu1 %vm608_vm1, %v938_v9  ;;  %v4236_v14 = vpop.permute.xlu1 %1569 }
 0x315   :  { %v4314_v1 = vpop.permute.xlu0 %1587 }
 0x317   :  { %v3482_v59 = vpop.eup %3481 }
 0x318   :  { %v3484_v8 = vpop.eup %3483  ;;  %v940_v10 = vmul.f32 %v3482_v59, %v826_v52  ;;  %v4240_v16 = vpop.permute.xlu1 %1573 }
 0x319   :  { %v939_v6 = vmul.f32 %v3484_v8, %v821_v53 }
 0x31b   :  { %3300 = vmatprep.mubr.msk.f32.mxu1 %vm608_vm1, %v939_v6 }
 0x31c   :  { %3301 = vmatmul.mubr.msk.f32.gmra.mrb[30].mxu1 %vm608_vm1, %v940_v10  ;;  %v4242_v60 = vpop.permute.xlu1 %1577 }
 0x320   :  { %v4246_v61 = vpop.permute.xlu1 %1581 }
 0x324   :  { %v4250_v22 = vpop.permute.xlu1 %1585 }
 0x328   :  { %v4259_v52 = vpop.permute.xlu1 %1589 }
 0x32c   :  { %v1882_v33 = vpop.permute.xlu1 %1881 }
 0x3b8   :  { %v3281_v24 = vpop.f32.mrb[16].mxu1 }
 0x3b9   :  { %v4262_v21 = vadd.f32 %v3281_v24, %v4255_v23  ;;  %v1063_v53 = vpop.f32.mrb[17].mxu1 }
 0x3ba   :  { %v4265_v15 = vadd.f32 %v4255_v23, %v1063_v53 }
 0x3bb   :  { %v3046_v28 = vmul.f32 -1.442695, %v4262_v21  ;;  %v1255_v25 = vmul.f32 %v3791_v34, %v4262_v21  ;;  %v1608_v63 = vmul.f32 %v1562_v18, %v4262_v21  ;;  %v4284_v36 = vmul.f32 %v1882_v33, %v4262_v21 }
 0x3bc   :  { %v3045_v30 = vmul.f32 -1.442695, %v4265_v15  ;;  %v1254_v17 = vmul.f32 %v4265_v15, %v3793_v35  ;;  %v1607_v29 = vmul.f32 %v1560_v47, %v4265_v15 }
 0x3bd   :  { %3485 = vpow2.f32 %v3046_v28  ;;  %v1416_v32 = vmul.f32 %v4238_v0, %v1255_v25  ;;  %v1279_v62 = vmul.f32 %v4234_v13, %v1255_v25  ;;  %v1624_v40 = vmul.f32 %v1608_v63, %v4234_v13 }
 0x3be   :  { %3487 = vpow2.f32 %v3045_v30  ;;  %v1752_v3 = vmul.f32 %v1608_v63, %v4238_v0  ;;  %v1944_v9 = vmul.f32 %v4284_v36, %v4234_v13  ;;  %v1278_v24 = vmul.f32 %v4234_v13, %v1254_v17 }
 0x3bf   :  { %v3284_v26 = vpop.f32.mrb[18].mxu1  ;;  %1449 = vrot.lane.b32.xlu1 %v1416_v32, %s3649_s21  ;;  %1312 = vrot.lane.b32.xlu0 %v1279_v62, %s3649_s21  ;;  %v1415_v62 = vmul.f32 %v4238_v0, %v1254_v17 }
 0x3c0   :  { %v4281_v34 = vadd.f32 %v3284_v26, %v4255_v23  ;;  %v1073_v35 = vpop.f32.mrb[19].mxu1  ;;  %v1880_v26 = vpop.permute.xlu0 %1879 }
 0x3c1   :  { %v4287_v38 = vadd.f32 %v4255_v23, %v1073_v35  ;;  %v4347_v17 = vmul.f32 %v1880_v26, %v4265_v15 }
 0x3c2   :  { %v3048_v58 = vmul.f32 -1.442695, %v4281_v34  ;;  %v4295_v27 = vmul.f32 %v3803_v37, %v4281_v34  ;;  %v1623_v37 = vmul.f32 %v1607_v29, %v4234_v13 }
 0x3c3   :  { %v3047_v7 = vmul.f32 -1.442695, %v4287_v38  ;;  %1657 = vrot.lane.b32.xlu1 %v1624_v40, %s3649_s21  ;;  %1785 = vrot.lane.b32.xlu0 %v1752_v3, %s3649_s21  ;;  %v4304_v2 = vmul.f32 %v4287_v38, %v3809_v39 }
 0x3c4   :  { %3489 = vpow2.f32 %v3048_v58  ;;  %v1281_v18 = vmul.f32 %v4234_v13, %v4295_v27 }
 0x3c5   :  { %3491 = vpow2.f32 %v3047_v7  ;;  %v1417_v32 = vmul.f32 %v4238_v0, %v4304_v2 }
 0x3c7   :  { %v3486_v59 = vpop.eup %3485  ;;  %v3287_v8 = vpop.f32.mrb[20].mxu1  ;;  %1977 = vrot.lane.b32.xlu1 %v1944_v9, %s3649_s21  ;;  %1655 = vrot.lane.b32.xlu0 %v1623_v37, %s3649_s21  ;;  %v1751_v9 = vmul.f32 %v1607_v29, %v4238_v0 }
 0x3c8   :  { %v3488_v6 = vpop.eup %3487  ;;  %v1191_v10 = vadd.f32 1.0, %v3486_v59  ;;  %v4312_v46 = vadd.f32 %v3287_v8, %v4255_v23  ;;  %v1083_v39 = vpop.f32.mrb[21].mxu1 }
 0x3c9   :  { %v1190_v5 = vadd.f32 1.0, %v3488_v6  ;;  %v4317_v47 = vadd.f32 %v4255_v23, %v1083_v39 }
 0x3ca   :  { %3493 = vrcp.f32 %v1191_v10  ;;  %v3050_v53 = vmul.f32 -1.442695, %v4312_v46  ;;  %v4325_v28 = vmul.f32 %v3823_v42, %v4312_v46  ;;  %v4339_v42 = vmul.f32 %v4230_v11, %v4287_v38 }
 0x3cb   :  { %3495 = vrcp.f32 %v1190_v5  ;;  %v3049_v25 = vmul.f32 -1.442695, %v4317_v47  ;;  %1316 = vrot.lane.b32.xlu0 %v1281_v18, %s3649_s21  ;;  %1310 = vrot.lane.b32.xlu1 %v1278_v24, %s3649_s21  ;;  %v4332_v30 = vmul.f32 %v4317_v47, %v3825_v43  ;;  %v1611_v26 = vmul.f32 %v4244_v4, %v4317_v47 }
 0x3cc   :  { %3497 = vpow2.f32 %v3050_v53  ;;  %v1625_v7 = vmul.f32 %v4339_v42, %v4234_v13  ;;  %v1283_v39 = vmul.f32 %v4234_v13, %v4325_v28 }
 0x3cd   :  { %3499 = vpow2.f32 %v3049_v25 }
 0x3ce   :  { %v3490_v63 = vpop.eup %3489 }
 0x3cf   :  { %v3492_v33 = vpop.eup %3491  ;;  %v1193_v35 = vadd.f32 1.0, %v3490_v63  ;;  %v3290_v40 = vpop.f32.mrb[22].mxu1  ;;  %1451 = vrot.lane.b32.xlu0 %v1417_v32, %s3649_s21  ;;  %1447 = vrot.lane.b32.xlu1 %v1415_v62, %s3649_s21 }
 0x3d0   :  { %v1192_v43 = vadd.f32 1.0, %v3492_v33  ;;  %v4344_v3 = vadd.f32 %v3290_v40, %v4255_v23  ;;  %v1093_v58 = vpop.f32.mrb[23].mxu1  ;;  %v1418_v33 = vmul.f32 %v4238_v0, %v4295_v27  ;;  %v1610_v40 = vmul.f32 %v4232_v12, %v4281_v34 }
 0x3d1   :  { %3501 = vrcp.f32 %v1193_v35  ;;  %v4350_v11 = vadd.f32 %v4255_v23, %v1093_v58 }
 0x3d2   :  { %3503 = vrcp.f32 %v1192_v43  ;;  %v3052_v37 = vmul.f32 -1.442695, %v4344_v3  ;;  %v4358_v59 = vmul.f32 %v3831_v44, %v4344_v3  ;;  %v1943_v44 = vmul.f32 %v4347_v17, %v4234_v13 }
 0x3d3   :  { %v3051_v8 = vmul.f32 -1.442695, %v4350_v11  ;;  %1659 = vrot.lane.b32.xlu0 %v1625_v7, %s3649_s21  ;;  %1783 = vrot.lane.b32.xlu1 %v1751_v9, %s3649_s21  ;;  %v4365_v6 = vmul.f32 %v4350_v11, %v3833_v45  ;;  %v1627_v9 = vmul.f32 %v1611_v26, %v4234_v13 }
 0x3d4   :  { %v3494_v10 = vpop.eup %3493  ;;  %3505 = vpow2.f32 %v3052_v37  ;;  %v1626_v37 = vmul.f32 %v1610_v40, %v4234_v13 }
 0x3d5   :  { %v3496_v29 = vpop.eup %3495  ;;  %3507 = vpow2.f32 %v3051_v8  ;;  %v1239_v53 = vmul.f32 %v3494_v10, %v4262_v21  ;;  %v1419_v21 = vmul.f32 %v4238_v0, %v4332_v30 }
 0x3d6   :  { %v3498_v5 = vpop.eup %3497  ;;  %v1238_v18 = vmul.f32 %v3496_v29, %v4265_v15 }
 0x3d7   :  { %v3500_v24 = vpop.eup %3499  ;;  %v1195_v25 = vadd.f32 1.0, %v3498_v5  ;;  %v3293_v45 = vpop.f32.mrb[24].mxu1  ;;  %1320 = vrot.lane.b32.xlu0 %v1283_v39, %s3649_s21  ;;  %1975 = vrot.lane.b32.xlu1 %v1943_v44, %s3649_s21 }
 0x3d8   :  { %v1194_v32 = vadd.f32 1.0, %v3500_v24  ;;  %v4376_v62 = vadd.f32 %v3293_v45, %v4255_v23  ;;  %v1103_v63 = vpop.f32.mrb[25].mxu1  ;;  %3307 = vmatprep.mubr.msk.f32.mxu0 %vm1358_vm3, %v1238_v18 }
 0x3d9   :  { %3509 = vrcp.f32 %v1195_v25  ;;  %v4382_v15 = vadd.f32 %v4255_v23, %v1103_v63  ;;  %3308 = vmatmul.mubr.msk.f32.vlgmr.msra.gmra.mrb[16].mxu0 %vm1358_vm3, %v1239_v53  ;;  %v1755_v53 = vmul.f32 %v1611_v26, %v4238_v0 }
 0x3da   :  { %3511 = vrcp.f32 %v1194_v32  ;;  %v3054_v35 = vmul.f32 -1.442695, %v4376_v62  ;;  %v4394_v27 = vmul.f32 %v3847_v48, %v4376_v62  ;;  %v1754_v32 = vmul.f32 %v1610_v40, %v4238_v0 }
 0x3db   :  { %v3502_v43 = vpop.eup %3501  ;;  %v3053_v58 = vmul.f32 -1.442695, %v4382_v15  ;;  %1455 = vrot.lane.b32.xlu0 %v1419_v21, %s3649_s21  ;;  %1453 = vrot.lane.b32.xlu1 %v1418_v33, %s3649_s21  ;;  %v4401_v4 = vmul.f32 %v4382_v15, %v3849_v49  ;;  %v1886_v49 = vpop.permute.xlu1 %1885 }
 0x3dc   :  { %v3504_v7 = vpop.eup %3503  ;;  %3513 = vpow2.f32 %v3054_v35  ;;  %v1241_v8 = vmul.f32 %v3502_v43, %v4281_v34  ;;  %v4419_v25 = vmul.f32 %v1886_v49, %v4281_v34  ;;  %v1280_v49 = vmul.f32 %v4234_v13, %v4304_v2 }
 0x3dd   :  { %3515 = vpow2.f32 %v3053_v58  ;;  %v1240_v12 = vmul.f32 %v3504_v7, %v4287_v38 }
 0x3de   :  { %v3506_v48 = vpop.eup %3505  ;;  %v1946_v43 = vmul.f32 %v4419_v25, %v4234_v13 }
 0x3df   :  { %v3508_v10 = vpop.eup %3507  ;;  %v1197_v29 = vadd.f32 1.0, %v3506_v48  ;;  %v3296_v39 = vpop.f32.mrb[26].mxu1  ;;  %3310 = vmatprep.mubr.msk.f32.mxu0 %vm1358_vm3, %v1240_v12  ;;  %1663 = vrot.lane.b32.xlu0 %v1627_v9, %s3649_s21 }
 0x3e0   :  { %v1196_v44 = vadd.f32 1.0, %v3508_v10  ;;  %v4410_v5 = vadd.f32 %v3296_v39, %v4255_v23  ;;  %v1113_v18 = vpop.f32.mrb[27].mxu1  ;;  %1661 = vrot.lane.b32.xlu1 %v1626_v37, %s3649_s21  ;;  %3311 = vmatmul.mubr.msk.f32.gmra.mrb[18].mxu0 %vm1358_vm3, %v1241_v8  ;;  %v1421_v10 = vmul.f32 %v4238_v0, %v4365_v6 }
 0x3e1   :  { %3517 = vrcp.f32 %v1197_v29  ;;  %v4415_v24 = vadd.f32 %v4255_v23, %v1113_v18  ;;  %v1613_v29 = vmul.f32 %v4248_v19, %v4350_v11 }
 0x3e2   :  { %3519 = vrcp.f32 %v1196_v44  ;;  %v3056_v45 = vmul.f32 -1.442695, %v4410_v5  ;;  %v4425_v63 = vmul.f32 %v3855_v50, %v4410_v5  ;;  %v1285_v50 = vmul.f32 %v4234_v13, %v4358_v59 }
 0x3e3   :  { %v3510_v33 = vpop.eup %3509  ;;  %v3055_v21 = vmul.f32 -1.442695, %v4415_v24  ;;  %1791 = vrot.lane.b32.xlu0 %v1755_v53, %s3649_s21  ;;  %v4431_v26 = vmul.f32 %v4415_v24, %v3857_v51 }
 0x3e4   :  { %v3512_v34 = vpop.eup %3511  ;;  %3521 = vpow2.f32 %v3056_v45  ;;  %1789 = vrot.lane.b32.xlu1 %v1754_v32, %s3649_s21  ;;  %v1243_v58 = vmul.f32 %v3510_v33, %v4312_v46  ;;  %v1884_v32 = vpop.permute.xlu0 %1883 }
 0x3e5   :  { %3523 = vpow2.f32 %v3055_v21  ;;  %v1242_v35 = vmul.f32 %v3512_v34, %v4317_v47  ;;  %v1753_v21 = vmul.f32 %v4339_v42, %v4238_v0  ;;  %v1757_v42 = vmul.f32 %v1613_v29, %v4238_v0 }
 0x3e6   :  { %v3514_v40 = vpop.eup %3513 }
 0x3e7   :  { %v3516_v7 = vpop.eup %3515  ;;  %v1199_v12 = vadd.f32 1.0, %v3514_v40  ;;  %v3299_v51 = vpop.f32.mrb[28].mxu1  ;;  %3313 = vmatprep.mubr.msk.f32.mxu0 %vm1358_vm3, %v1242_v35  ;;  %1324 = vrot.lane.b32.xlu0 %v1285_v50, %s3649_s21  ;;  %v4474_v35 = vmul.f32 %v1884_v32, %v4287_v38 }
 0x3e8   :  { %v1198_v9 = vadd.f32 1.0, %v3516_v7  ;;  %v4443_v48 = vadd.f32 %v3299_v51, %v4255_v23  ;;  %v1123_v37 = vpop.f32.mrb[29].mxu1  ;;  %1981 = vrot.lane.b32.xlu1 %v1946_v43, %s3649_s21  ;;  %3314 = vmatmul.mubr.msk.f32.gmra.mrb[20].mxu0 %vm1358_vm3, %v1243_v58 }
 0x3e9   :  { %3525 = vrcp.f32 %v1199_v12  ;;  %v4448_v8 = vadd.f32 %v4255_v23, %v1123_v37  ;;  %v1945_v51 = vmul.f32 %v4474_v35, %v4234_v13 }
 0x3ea   :  { %3527 = vrcp.f32 %v1198_v9  ;;  %v3058_v39 = vmul.f32 -1.442695, %v4443_v48  ;;  %v4459_v44 = vmul.f32 %v3871_v54, %v4443_v48  ;;  %v1629_v54 = vmul.f32 %v1613_v29, %v4234_v13 }
 0x3eb   :  { %v3518_v18 = vpop.eup %3517  ;;  %v3057_v53 = vmul.f32 -1.442695, %v4448_v8  ;;  %1459 = vrot.lane.b32.xlu0 %v1421_v10, %s3649_s21  ;;  %v4465_v45 = vmul.f32 %v4448_v8, %v3873_v55 }
 0x3ec   :  { %v3520_v19 = vpop.eup %3519  ;;  %3529 = vpow2.f32 %v3058_v39  ;;  %1314 = vrot.lane.b32.xlu1 %v1280_v49, %s3649_s21  ;;  %v1245_v34 = vmul.f32 %v3518_v18, %v4344_v3  ;;  %v1888_v39 = vpop.permute.xlu0 %1887 }
 0x3ed   :  { %3531 = vpow2.f32 %v3057_v53  ;;  %v1244_v2 = vmul.f32 %v3520_v19, %v4350_v11  ;;  %v1420_v53 = vmul.f32 %v4238_v0, %v4325_v28  ;;  %v1423_v28 = vmul.f32 %v4238_v0, %v4401_v4 }
 0x3ee   :  { %v3522_v33 = vpop.eup %3521 }
 0x3ef   :  { %v3524_v55 = vpop.eup %3523  ;;  %v1201_v50 = vadd.f32 1.0, %v3522_v33  ;;  %v3302_v40 = vpop.f32.mrb[30].mxu1  ;;  %3316 = vmatprep.mubr.msk.f32.mxu0 %vm1358_vm3, %v1244_v2  ;;  %1667 = vrot.lane.b32.xlu0 %v1629_v54, %s3649_s21  ;;  %v1615_v33 = vmul.f32 %v4257_v20, %v4382_v15 }
 0x3f0   :  { %v1200_v43 = vadd.f32 1.0, %v3524_v55  ;;  %v4479_v58 = vadd.f32 %v3302_v40, %v4255_v23  ;;  %v1133_v7 = vpop.f32.mrb[31].mxu1  ;;  %1787 = vrot.lane.b32.xlu1 %v1753_v21, %s3649_s21  ;;  %3317 = vmatmul.mubr.msk.f32.gmra.mrb[22].mxu0 %vm1358_vm3, %v1245_v34  ;;  %v4517_v21 = vpop.permute.xlu0 %1891 }
 0x3f1   :  { %3533 = vrcp.f32 %v1201_v50  ;;  %v4484_v38 = vadd.f32 %v4255_v23, %v1133_v7  ;;  %v1890_v50 = vpop.permute.xlu1 %1889 }
 0x3f2   :  { %3535 = vrcp.f32 %v1200_v43  ;;  %v3060_v12 = vmul.f32 -1.442695, %v4479_v58  ;;  %v4492_v9 = vmul.f32 %v3879_v56, %v4479_v58  ;;  %v1287_v56 = vmul.f32 %v4234_v13, %v4394_v27 }
 0x3f3   :  { %v3526_v37 = vpop.eup %3525  ;;  %v3059_v10 = vmul.f32 -1.442695, %v4484_v38  ;;  %1795 = vrot.lane.b32.xlu0 %v1757_v42, %s3649_s21  ;;  %v4498_v23 = vmul.f32 %v4484_v38, %v3881_v57  ;;  %v1612_v57 = vmul.f32 %v4236_v14, %v4312_v46  ;;  %v1631_v43 = vmul.f32 %v1615_v33, %v4234_v13 }
 0x3f4   :  { %v3528_v29 = vpop.eup %3527  ;;  %3537 = vpow2.f32 %v3060_v12  ;;  %1979 = vrot.lane.b32.xlu1 %v1945_v51, %s3649_s21  ;;  %v1247_v19 = vmul.f32 %v3526_v37, %v4376_v62  ;;  %v4527_v12 = vmul.f32 %v1890_v50, %v4312_v46  ;;  %v1614_v50 = vmul.f32 %v4240_v16, %v4344_v3 }
 0x3f5   :  { %3539 = vpow2.f32 %v3059_v10  ;;  %v1246_v49 = vmul.f32 %v3528_v29, %v4382_v15  ;;  %v1628_v14 = vmul.f32 %v1612_v57, %v4234_v13  ;;  %v1756_v42 = vmul.f32 %v1612_v57, %v4238_v0  ;;  %v1896_v10 = vpop.permute.xlu0 %1895 }
 0x3f6   :  { %v3530_v18 = vpop.eup %3529  ;;  %v1948_v46 = vmul.f32 %v4527_v12, %v4234_v13 }
 0x3f7   :  { %v3532_v32 = vpop.eup %3531  ;;  %v1203_v2 = vadd.f32 1.0, %v3530_v18  ;;  %3319 = vmatprep.mubr.msk.f32.mxu0 %vm1358_vm3, %v1246_v49  ;;  %1328 = vrot.lane.b32.xlu0 %v1287_v56, %s3649_s21  ;;  %v1759_v49 = vmul.f32 %v1615_v33, %v4238_v0  ;;  %v4535_v56 = vmul.f32 %v1896_v10, %v4382_v15  ;;  %v1427_v10 = vmul.f32 %v4238_v0, %v4465_v45 }
 0x3f8   :  { %v1202_v54 = vadd.f32 1.0, %v3532_v32  ;;  %1457 = vrot.lane.b32.xlu1 %v1420_v53, %s3649_s21  ;;  %3320 = vmatmul.mubr.msk.f32.gmra.mrb[24].mxu0 %vm1358_vm3, %v1247_v19  ;;  %v1282_v32 = vmul.f32 %v4234_v13, %v4332_v30 }
 0x3f9   :  { %3541 = vrcp.f32 %v1203_v2  ;;  %v1951_v57 = vmul.f32 %v4535_v56, %v4234_v13  ;;  %v4548_v2 = vmul.f32 %v1888_v39, %v4317_v47  ;;  %v1425_v39 = vmul.f32 %v4238_v0, %v4431_v26 }
 0x3fa   :  { %3543 = vrcp.f32 %v1202_v54  ;;  %v1289_v54 = vmul.f32 %v4234_v13, %v4425_v63 }
 0x3fb   :  { %v3534_v34 = vpop.eup %3533  ;;  %1463 = vrot.lane.b32.xlu0 %v1423_v28, %s3649_s21  ;;  %v1947_v28 = vmul.f32 %v4548_v2, %v4234_v13 }
 0x3fc   :  { %v3536_v55 = vpop.eup %3535  ;;  %1665 = vrot.lane.b32.xlu1 %v1628_v14, %s3649_s21  ;;  %v1249_v20 = vmul.f32 %v3534_v34, %v4410_v5  ;;  %v1617_v14 = vmul.f32 %v4273_v31, %v4415_v24  ;;  %v1630_v31 = vmul.f32 %v1614_v50, %v4234_v13 }
 0x3fd   :  { %v1248_v40 = vmul.f32 %v3536_v55, %v4415_v24  ;;  %v1422_v55 = vmul.f32 %v4238_v0, %v4358_v59 }
 0x3fe   :  { %v3538_v7 = vpop.eup %3537  ;;  %v1761_v59 = vmul.f32 %v1617_v14, %v4238_v0 }
 0x3ff   :  { %v3540_v51 = vpop.eup %3539  ;;  %v1205_v37 = vadd.f32 1.0, %v3538_v7  ;;  %3322 = vmatprep.mubr.msk.f32.mxu0 %vm1358_vm3, %v1248_v40  ;;  %1671 = vrot.lane.b32.xlu0 %v1631_v43, %s3649_s21  ;;  %v1894_v40 = vpop.permute.xlu1 %1893  ;;  %v1633_v43 = vmul.f32 %v1617_v14, %v4234_v13  ;;  %v1758_v7 = vmul.f32 %v1614_v50, %v4238_v0  ;;  %v1621_v14 = vmul.f32 %v4314_v1, %v4484_v38 }
 0x400   :  { %v1204_v29 = vadd.f32 1.0, %v3540_v51  ;;  %1793 = vrot.lane.b32.xlu1 %v1756_v42, %s3649_s21  ;;  %3323 = vmatmul.mubr.msk.f32.gmra.mrb[26].mxu0 %vm1358_vm3, %v1249_v20  ;;  %v4581_v42 = vmul.f32 %v1894_v40, %v4344_v3  ;;  %v1291_v20 = vmul.f32 %v4234_v13, %v4459_v44  ;;  %v1619_v3 = vmul.f32 %v4297_v41, %v4448_v8 }
 0x401   :  { %3545 = vrcp.f32 %v1205_v37  ;;  %v1637_v50 = vmul.f32 %v1621_v14, %v4234_v13  ;;  %v1286_v40 = vmul.f32 %v4234_v13, %v4401_v4 }
 0x402   :  { %3547 = vrcp.f32 %v1204_v29  ;;  %v1950_v51 = vmul.f32 %v4581_v42, %v4234_v13  ;;  %v1284_v29 = vmul.f32 %v4234_v13, %v4365_v6  ;;  %v1763_v41 = vmul.f32 %v1619_v3, %v4238_v0 }
 0x403   :  { %v3542_v18 = vpop.eup %3541  ;;  %1799 = vrot.lane.b32.xlu0 %v1759_v49, %s3649_s21  ;;  %v1898_v16 = vpop.permute.xlu1 %1897  ;;  %v4599_v49 = vmul.f32 %v4517_v21, %v4350_v11  ;;  %v1424_v11 = vmul.f32 %v4238_v0, %v4394_v27  ;;  %v1616_v6 = vmul.f32 %v4242_v60, %v4376_v62 }
 0x404   :  { %v3544_v53 = vpop.eup %3543  ;;  %1985 = vrot.lane.b32.xlu1 %v1948_v46, %s3649_s21  ;;  %v1251_v15 = vmul.f32 %v3542_v18, %v4443_v48  ;;  %v1900_v46 = vpop.permute.xlu0 %1899  ;;  %v1635_v18 = vmul.f32 %v1619_v3, %v4234_v13 }
 0x405   :  { %v1250_v19 = vmul.f32 %v3544_v53, %v4448_v8 }
 0x407   :  { %3325 = vmatprep.mubr.msk.f32.mxu0 %vm1358_vm3, %v1250_v19  ;;  %1991 = vrot.lane.b32.xlu0 %v1951_v57, %s3649_s21  ;;  %v1902_v37 = vpop.permute.xlu1 %1901  ;;  %v1949_v19 = vmul.f32 %v4599_v49, %v4234_v13 }
 0x408   :  { %1318 = vrot.lane.b32.xlu1 %v1282_v32, %s3649_s21  ;;  %3326 = vmatmul.mubr.msk.f32.gmra.mrb[28].mxu0 %vm1358_vm3, %v1251_v15  ;;  %v4615_v21 = vpop.permute.xlu0 %1903  ;;  %v1293_v32 = vmul.f32 %v4234_v13, %v4492_v9  ;;  %v4673_v3 = vmul.f32 %v1902_v37, %v4410_v5 }
 0x40b   :  { %v3546_v30 = vpop.eup %3545  ;;  %1332 = vrot.lane.b32.xlu0 %v1289_v54, %s3649_s21  ;;  %v4604_v53 = vpop.permute.xlu1 %1905  ;;  %v1632_v54 = vmul.f32 %v1616_v6, %v4234_v13 }
 0x40c   :  { %v3548_v33 = vpop.eup %3547  ;;  %1983 = vrot.lane.b32.xlu1 %v1947_v28, %s3649_s21  ;;  %v1253_v34 = vmul.f32 %v3546_v30, %v4479_v58  ;;  %v4627_v60 = vpop.permute.xlu0 %1907  ;;  %v1760_v28 = vmul.f32 %v1616_v6, %v4238_v0  ;;  %v4633_v30 = vmul.f32 %v1898_v16, %v4376_v62  ;;  %v1618_v16 = vmul.f32 %v4246_v61, %v4410_v5 }
 0x40d   :  { %v1252_v47 = vmul.f32 %v3548_v33, %v4484_v38 }
 0x40f   :  { %3328 = vmatprep.mubr.msk.f32.mxu1 %vm1358_vm3, %v1252_v47  ;;  %1467 = vrot.lane.b32.xlu0 %v1425_v39, %s3649_s21  ;;  %v1910_v57 = vpop.permute.xlu1 %1909  ;;  %v1429_v39 = vmul.f32 %v4238_v0, %v4498_v23 }
 0x410   :  { %3329 = vmatmul.mubr.msk.f32.vlgmr.msra.gmra.mrb[32].mxu1 %vm1358_vm3, %v1253_v34  ;;  %1461 = vrot.lane.b32.xlu1 %v1422_v55, %s3649_s21  ;;  %v4622_v15 = vmul.f32 %v1910_v57, %v4479_v58  ;;  %v1952_v34 = vmul.f32 %v4633_v30, %v4234_v13 }
 0x412   :  { %v1958_v27 = vmul.f32 %v4622_v15, %v4234_v13 }
 0x413   :  { %1675 = vrot.lane.b32.xlu0 %v1633_v43, %s3649_s21 }
 0x414   :  { %1669 = vrot.lane.b32.xlu1 %v1630_v31, %s3649_s21  ;;  %v1765_v31 = vmul.f32 %v1621_v14, %v4238_v0 }
 0x417   :  { %1803 = vrot.lane.b32.xlu0 %v1761_v59, %s3649_s21  ;;  %v1426_v59 = vmul.f32 %v4238_v0, %v4425_v63  ;;  %v1762_v63 = vmul.f32 %v1618_v16, %v4238_v0 }
 0x418   :  { %1797 = vrot.lane.b32.xlu1 %v1758_v7, %s3649_s21 }
 0x41b   :  { %1336 = vrot.lane.b32.xlu0 %v1291_v20, %s3649_s21  ;;  %v1634_v20 = vmul.f32 %v1618_v16, %v4234_v13 }
 0x41c   :  { %1989 = vrot.lane.b32.xlu1 %v1950_v51, %s3649_s21 }
 0x41f   :  { %1471 = vrot.lane.b32.xlu0 %v1427_v10, %s3649_s21 }
 0x420   :  { %1322 = vrot.lane.b32.xlu1 %v1284_v29, %s3649_s21  ;;  %v1954_v29 = vmul.f32 %v4673_v3, %v4234_v13 }
 0x423   :  { %1679 = vrot.lane.b32.xlu0 %v1635_v18, %s3649_s21 }
 0x424   :  { %1987 = vrot.lane.b32.xlu1 %v1949_v19, %s3649_s21 }
 0x427   :  { %1807 = vrot.lane.b32.xlu0 %v1763_v41, %s3649_s21  ;;  %v1288_v41 = vmul.f32 %v4234_v13, %v4431_v26  ;;  %v1620_v26 = vmul.f32 %v4250_v22, %v4443_v48  ;;  %v4711_v22 = vmul.f32 %v4604_v53, %v4443_v48  ;;  %v1290_v48 = vmul.f32 %v4234_v13, %v4465_v45 }
 0x428   :  { %1465 = vrot.lane.b32.xlu1 %v1424_v11, %s3649_s21  ;;  %v4684_v11 = vmul.f32 %v1900_v46, %v4415_v24  ;;  %v4725_v53 = vmul.f32 %v4615_v21, %v4448_v8  ;;  %v1430_v8 = vmul.f32 %v4238_v0, %v4492_v9  ;;  %v1622_v21 = vmul.f32 %v4259_v52, %v4479_v58 }
 0x429   :  { %v1636_v46 = vmul.f32 %v1620_v26, %v4234_v13 }
 0x42a   :  { %v1953_v6 = vmul.f32 %v4684_v11, %v4234_v13  ;;  %v1766_v52 = vmul.f32 %v1622_v21, %v4238_v0 }
 0x42b   :  { %1340 = vrot.lane.b32.xlu0 %v1293_v32, %s3649_s21  ;;  %v1428_v32 = vmul.f32 %v4238_v0, %v4459_v44  ;;  %v1764_v44 = vmul.f32 %v1620_v26, %v4238_v0  ;;  %v4759_v26 = vmul.f32 %v4627_v60, %v4484_v38 }
 0x42c   :  { %1673 = vrot.lane.b32.xlu1 %v1632_v54, %s3649_s21 }
 0x42f   :  { %2005 = vrot.lane.b32.xlu0 %v1958_v27, %s3649_s21 }
 0x430   :  { %1801 = vrot.lane.b32.xlu1 %v1760_v28, %s3649_s21 }
 0x431   :  { %v4637_v33 = vpop.permute.xlu1 %1449  ;;  %v1313_v47 = vpop.permute.xlu0 %1312 }
 0x432   :  { %v1362_v28 = vsel %vm1358_vm3, %v1313_v47, 0.0 }
 0x433   :  { %1475 = vrot.lane.b32.xlu0 %v1429_v39, %s3649_s21 }
 0x434   :  { %1993 = vrot.lane.b32.xlu1 %v1952_v34, %s3649_s21 }
 0x435   :  { %v4647_v62 = vpop.permute.xlu1 %1657  ;;  %v4649_v55 = vpop.permute.xlu0 %1785 }
 0x437   :  { %1683 = vrot.lane.b32.xlu0 %v1637_v50, %s3649_s21  ;;  %v1956_v50 = vmul.f32 %v4711_v22, %v4234_v13 }
 0x438   :  { %1326 = vrot.lane.b32.xlu1 %v1286_v40, %s3649_s21 }
 0x439   :  { %v1978_v1 = vpop.permute.xlu1 %1977  ;;  %v1656_v43 = vpop.permute.xlu0 %1655 }
 0x43a   :  { %v2026_v14 = vsel %vm1358_vm3, %v1978_v1, 0.0 }
 0x43b   :  { %1811 = vrot.lane.b32.xlu0 %v1765_v31, %s3649_s21 }
 0x43c   :  { %1469 = vrot.lane.b32.xlu1 %v1426_v59, %s3649_s21  ;;  %v1703_v59 = vsel %vm1358_vm3, %v1656_v43, 0.0 }
 0x43d   :  { %v4663_v7 = vpop.permute.xlu0 %1316  ;;  %v4665_v4 = vpop.permute.xlu1 %1310 }
 0x440   :  { %1677 = vrot.lane.b32.xlu1 %v1634_v20, %s3649_s21  ;;  %v1955_v20 = vmul.f32 %v4725_v53, %v4234_v13 }
 0x441   :  { %v4669_v51 = vpop.permute.xlu0 %1451  ;;  %v1448_v10 = vpop.permute.xlu1 %1447 }
 0x442   :  { %v1495_v47 = vsel %vm1358_vm3, %v1448_v10, 0.0 }
 0x444   :  { %1805 = vrot.lane.b32.xlu1 %v1762_v63, %s3649_s21 }
 0x445   :  { %v1784_v61 = vpop.permute.xlu1 %1783  ;;  %v4678_v18 = vpop.permute.xlu0 %1659 }
 0x446   :  { %v1831_v10 = vsel %vm1358_vm3, %v1784_v61, 0.0  ;;  %v1709_v60 = vsel %vm1358_vm3, %v4678_v18, 0.0 }
 0x448   :  { %1997 = vrot.lane.b32.xlu1 %v1954_v29, %s3649_s21 }
 0x449   :  { %v1976_v19 = vpop.permute.xlu1 %1975  ;;  %v4687_v5 = vpop.permute.xlu0 %1320 }
 0x44a   :  { %v2023_v43 = vsel %vm1358_vm3, %v1976_v19, 0.0 }
 0x44c   :  { %1330 = vrot.lane.b32.xlu1 %v1288_v41, %s3649_s21  ;;  %v1638_v41 = vmul.f32 %v1622_v21, %v4234_v13 }
 0x44d   :  { %v1454_v37 = vpop.permute.xlu1 %1453  ;;  %v4696_v54 = vpop.permute.xlu0 %1455 }
 0x450   :  { %1995 = vrot.lane.b32.xlu1 %v1953_v6, %s3649_s21  ;;  %v1504_v6 = vsel %vm1358_vm3, %v1454_v37, 0.0 }
 0x451   :  { %v4703_v27 = vpop.permute.xlu0 %1663 }
 0x452   :  { %v1662_v57 = vpop.permute.xlu1 %1661 }
 0x453   :  { %v1712_v58 = vsel %vm1358_vm3, %v1662_v57, 0.0  ;;  %v1957_v57 = vmul.f32 %v4759_v26, %v4234_v13 }
 0x454   :  { %1473 = vrot.lane.b32.xlu1 %v1428_v32, %s3649_s21  ;;  %v1292_v32 = vmul.f32 %v4234_v13, %v4498_v23  ;;  %v1501_v23 = vsel %vm1358_vm3, %v4669_v51, 0.0 }
 0x455   :  { %v4717_v40 = vpop.permute.xlu0 %1791 }
 0x456   :  { %v4699_v24 = vpop.permute.xlu1 %1789 }
 0x458   :  { %1681 = vrot.lane.b32.xlu1 %v1636_v46, %s3649_s21 }
 0x459   :  { %v4728_v1 = vpop.permute.xlu0 %1324 }
 0x45a   :  { %v4706_v39 = vpop.permute.xlu1 %1981  ;;  %1363 = vadd.xlane.f32.xlu0 %v1362_v28 }
 0x45c   :  { %1809 = vrot.lane.b32.xlu1 %v1764_v44, %s3649_s21 }
 0x45d   :  { %v4739_v63 = vpop.permute.xlu0 %1459 }
 0x45e   :  { %v1315_v34 = vpop.permute.xlu1 %1314  ;;  %2027 = vadd.xlane.f32.xlu0 %v2026_v14 }
 0x45f   :  { %v1365_v46 = vsel %vm1358_vm3, %v1315_v34, 0.0 }
 0x460   :  { %2001 = vrot.lane.b32.xlu1 %v1956_v50, %s3649_s21 }
 0x461   :  { %v4745_v61 = vpop.permute.xlu0 %1667 }
 0x462   :  { %v1788_v31 = vpop.permute.xlu1 %1787  ;;  %1496 = vadd.xlane.f32.xlu0 %v1495_v47 }
 0x464   :  { %1334 = vrot.lane.b32.xlu1 %v1290_v48, %s3649_s21  ;;  %v1837_v48 = vsel %vm1358_vm3, %v1788_v31, 0.0 }
 0x465   :  { %v4761_v37 = vpop.permute.xlu0 %1795 }
 0x466   :  { %v1980_v16 = vpop.permute.xlu1 %1979  ;;  %1704 = vadd.xlane.f32.xlu0 %v1703_v59 }
 0x467   :  { %v2029_v50 = vsel %vm1358_vm3, %v1980_v16, 0.0 }
 0x468   :  { %1999 = vrot.lane.b32.xlu1 %v1955_v20, %s3649_s21 }
 0x469   :  { %v4768_v44 = vpop.permute.xlu0 %1328 }
 0x46a   :  { %v1458_v45 = vpop.permute.xlu1 %1457  ;;  %1832 = vadd.xlane.f32.xlu0 %v1831_v10 }
 0x46b   :  { %v1510_v51 = vsel %vm1358_vm3, %v1458_v45, 0.0 }
 0x46c   :  { %1477 = vrot.lane.b32.xlu1 %v1430_v8, %s3649_s21 }
 0x46d   :  { %v4774_v34 = vpop.permute.xlu0 %1463 }
 0x46e   :  { %v1666_v29 = vpop.permute.xlu1 %1665  ;;  %2024 = vadd.xlane.f32.xlu0 %v2023_v43 }
 0x46f   :  { %v1718_v10 = vsel %vm1358_vm3, %v1666_v29, 0.0  ;;  %v1498_v29 = vsel %vm1358_vm3, %v4637_v33, 0.0  ;;  %v1834_v33 = vsel %vm1358_vm3, %v4649_v55, 0.0  ;;  %v1368_v55 = vsel %vm1358_vm3, %v4663_v7, 0.0 }
 0x470   :  { %1685 = vrot.lane.b32.xlu1 %v1638_v41, %s3649_s21  ;;  %v1840_v7 = vsel %vm1358_vm3, %v4699_v24, 0.0 }
 0x471   :  { %v4777_v13 = vpop.permute.xlu0 %1671 }
 0x472   :  { %v4748_v9 = vpop.permute.xlu1 %1793  ;;  %1505 = vadd.xlane.f32.xlu0 %v1504_v6  ;;  %v1843_v6 = vsel %vm1358_vm3, %v4717_v40, 0.0 }
 0x474   :  { %1813 = vrot.lane.b32.xlu1 %v1766_v52, %s3649_s21 }
 0x475   :  { %v4785_v18 = vpop.permute.xlu0 %1799 }
 0x476   :  { %v4753_v19 = vpop.permute.xlu1 %1985  ;;  %1713 = vadd.xlane.f32.xlu0 %v1712_v58 }
 0x478   :  { %1338 = vrot.lane.b32.xlu1 %v1292_v32, %s3649_s21 }
 0x479   :  { %v4788_v16 = vpop.permute.xlu0 %1991 }
 0x47a   :  { %v1319_v28 = vpop.permute.xlu1 %1318  ;;  %1366 = vadd.xlane.f32.xlu0 %v1365_v46 }
 0x47b   :  { %v1371_v21 = vsel %vm1358_vm3, %v1319_v28, 0.0  ;;  %v1706_v28 = vsel %vm1358_vm3, %v4647_v62, 0.0 }
 0x47c   :  { %2003 = vrot.lane.b32.xlu1 %v1957_v57, %s3649_s21 }
 0x47d   :  { %v4792_v45 = vpop.permute.xlu0 %1332 }
 0x47e   :  { %v1984_v38 = vpop.permute.xlu1 %1983  ;;  %1502 = vadd.xlane.f32.xlu0 %v1501_v23 }
 0x47f   :  { %v2035_v31 = vsel %vm1358_vm3, %v1984_v38, 0.0 }
 0x481   :  { %v4798_v58 = vpop.permute.xlu0 %1467 }
 0x482   :  { %v1462_v14 = vpop.permute.xlu1 %1461  ;;  %1710 = vadd.xlane.f32.xlu0 %v1709_v60 }
 0x483   :  { %v1516_v32 = vsel %vm1358_vm3, %v1462_v14, 0.0  ;;  %v1359_v14 = vsel %vm1358_vm3, %v4665_v4, 0.0 }
 0x485   :  { %v4808_v23 = vpop.permute.xlu0 %1675 }
 0x486   :  { %v1670_v47 = vpop.permute.xlu1 %1669  ;;  %2030 = vadd.xlane.f32.xlu0 %v2029_v50 }
 0x487   :  { %v1724_v57 = vsel %vm1358_vm3, %v1670_v47, 0.0 }
 0x489   :  { %v4817_v50 = vpop.permute.xlu0 %1803 }
 0x48a   :  { %v4780_v59 = vpop.permute.xlu1 %1797  ;;  %1838 = vadd.xlane.f32.xlu0 %v1837_v48 }
 0x48d   :  { %v4826_v4 = vpop.permute.xlu0 %1336 }
 0x48e   :  { %v4783_v20 = vpop.permute.xlu1 %1989  ;;  %1511 = vadd.xlane.f32.xlu0 %v1510_v51 }
 0x492   :  { %v1323_v8 = vpop.permute.xlu1 %1322  ;;  %1719 = vadd.xlane.f32.xlu0 %v1718_v10  ;;  %v1849_v10 = vsel %vm1358_vm3, %v4761_v37, 0.0  ;;  %v4839_v37 = vpop.permute.xlu0 %1471 }
 0x493   :  { %v1377_v38 = vsel %vm1358_vm3, %v1323_v8, 0.0 }
 0x496   :  { %v1988_v43 = vpop.permute.xlu1 %1987  ;;  %1372 = vadd.xlane.f32.xlu0 %v1371_v21  ;;  %v4851_v24 = vpop.permute.xlu0 %1679 }
 0x497   :  { %v2041_v48 = vsel %vm1358_vm3, %v1988_v43, 0.0 }
 0x49a   :  { %v1466_v41 = vpop.permute.xlu1 %1465  ;;  %2036 = vadd.xlane.f32.xlu0 %v2035_v31  ;;  %v2032_v31 = vsel %vm1358_vm3, %v4706_v39, 0.0 }
 0x49e   :  { %v1674_v52 = vpop.permute.xlu1 %1673  ;;  %1844 = vadd.xlane.f32.xlu0 %v1843_v6  ;;  %v1522_v6 = vsel %vm1358_vm3, %v1466_v41, 0.0 }
 0x4a0   :  { %1499 = vadd.xlane.f32.xlu1 %v1498_v29 }
 0x4a2   :  { %v4801_v46 = vpop.permute.xlu1 %1801  ;;  %1517 = vadd.xlane.f32.xlu0 %v1516_v32  ;;  %v1730_v32 = vsel %vm1358_vm3, %v1674_v52, 0.0  ;;  %v2038_v52 = vsel %vm1358_vm3, %v4753_v19, 0.0 }
 0x4a4   :  { %1707 = vadd.xlane.f32.xlu1 %v1706_v28 }
 0x4a6   :  { %v4806_v40 = vpop.permute.xlu1 %1993  ;;  %1725 = vadd.xlane.f32.xlu0 %v1724_v57  ;;  %v1374_v57 = vsel %vm1358_vm3, %v4687_v5, 0.0  ;;  %v1846_v5 = vsel %vm1358_vm3, %v4748_v9, 0.0 }
 0x4a8   :  { %1835 = vadd.xlane.f32.xlu1 %v1834_v33 }
 0x4aa   :  { %v1327_v60 = vpop.permute.xlu1 %1326  ;;  %1378 = vadd.xlane.f32.xlu0 %v1377_v38 }
 0x4ab   :  { %v1383_v33 = vsel %vm1358_vm3, %v1327_v60, 0.0 }
 0x4ac   :  { %1360 = vadd.xlane.f32.xlu1 %v1359_v14  ;;  %v4815_v62 = vpop.f32.mrb[16].mxu0  ;;  %v2047_v14 = vsel %vm1358_vm3, %v4788_v16, 0.0  ;;  %v1507_v16 = vsel %vm1358_vm3, %v4696_v54, 0.0  ;;  %v1380_v54 = vsel %vm1358_vm3, %v4728_v1, 0.0 }
 0x4ad   :  { %v4819_v47 = vpop.f32.mrb[17].mxu0 }
 0x4ae   :  { %v1470_v51 = vpop.permute.xlu1 %1469  ;;  %2042 = vadd.xlane.f32.xlu0 %v2041_v48 }
 0x4b0   :  { %1369 = vadd.xlane.f32.xlu1 %v1368_v55 }
 0x4b2   :  { %v1678_v8 = vpop.permute.xlu1 %1677  ;;  %1850 = vadd.xlane.f32.xlu0 %v1849_v10  ;;  %v4863_v10 = vpop.permute.xlu0 %1807 }
 0x4b3   :  { %v4828_v21 = vpop.f32.mrb[18].mxu0 }
 0x4b4   :  { %2033 = vadd.xlane.f32.xlu1 %v2032_v31  ;;  %v4832_v43 = vpop.f32.mrb[19].mxu0  ;;  %v1855_v31 = vsel %vm1358_vm3, %v4785_v18, 0.0  ;;  %v1736_v18 = vsel %vm1358_vm3, %v1678_v8, 0.0 }
 0x4b6   :  { %v4835_v29 = vpop.permute.xlu1 %1805  ;;  %1523 = vadd.xlane.f32.xlu0 %v1522_v6  ;;  %v1528_v6 = vsel %vm1358_vm3, %v1470_v51, 0.0 }
 0x4b8   :  { %1841 = vadd.xlane.f32.xlu1 %v1840_v7 }
 0x4ba   :  { %v4842_v28 = vpop.permute.xlu1 %1997  ;;  %1731 = vadd.xlane.f32.xlu0 %v1730_v32  ;;  %v4870_v32 = vpop.permute.xlu0 %1340 }
 0x4bb   :  { %v4844_v39 = vpop.f32.mrb[20].mxu0 }
 0x4bc   :  { %1375 = vadd.xlane.f32.xlu1 %v1374_v57  ;;  %v4848_v41 = vpop.f32.mrb[21].mxu0  ;;  %v1715_v57 = vsel %vm1358_vm3, %v4703_v27, 0.0 }
 0x4be   :  { %v1331_v38 = vpop.permute.xlu1 %1330  ;;  %1384 = vadd.xlane.f32.xlu0 %v1383_v33  ;;  %v4883_v51 = vpop.permute.xlu0 %2005 }
 0x4c0   :  { %2039 = vadd.xlane.f32.xlu1 %v2038_v52 }
 0x4c2   :  { %v1996_v48 = vpop.permute.xlu1 %1995  ;;  %2048 = vadd.xlane.f32.xlu0 %v2047_v14  ;;  %v1389_v14 = vsel %vm1358_vm3, %v1331_v38, 0.0  ;;  %v4895_v1 = vpop.permute.xlu0 %1475  ;;  %v1852_v38 = vsel %vm1358_vm3, %v4780_v59, 0.0  ;;  %v1721_v59 = vsel %vm1358_vm3, %v4745_v61, 0.0 }
 0x4c3   :  { %v4857_v55 = vpop.f32.mrb[22].mxu0 }
 0x4c4   :  { %1847 = vadd.xlane.f32.xlu1 %v1846_v5  ;;  %v4861_v60 = vpop.f32.mrb[23].mxu0 }
 0x4c6   :  { %v1474_v19 = vpop.permute.xlu1 %1473  ;;  %1856 = vadd.xlane.f32.xlu0 %v1855_v31  ;;  %v2044_v31 = vsel %vm1358_vm3, %v4783_v20, 0.0  ;;  %v1513_v20 = vsel %vm1358_vm3, %v4739_v63, 0.0 }
 0x4c8   :  { %1508 = vadd.xlane.f32.xlu1 %v1507_v16  ;;  %v2053_v16 = vsel %vm1358_vm3, %v1996_v48, 0.0  ;;  %v4906_v48 = vpop.permute.xlu0 %1683 }
 0x4ca   :  { %v1682_v7 = vpop.permute.xlu1 %1681  ;;  %1529 = vadd.xlane.f32.xlu0 %v1528_v6 }
 0x4cb   :  { %v4872_v9 = vpop.f32.mrb[24].mxu0 }
 0x4cc   :  { %1716 = vadd.xlane.f32.xlu1 %v1715_v57  ;;  %v4876_v33 = vpop.f32.mrb[25].mxu0  ;;  %v1534_v57 = vsel %vm1358_vm3, %v1474_v19, 0.0 }
 0x4ce   :  { %v4879_v52 = vpop.permute.xlu1 %1809  ;;  %1737 = vadd.xlane.f32.xlu0 %v1736_v18 }
 0x4d0   :  { %1381 = vadd.xlane.f32.xlu1 %v1380_v54 }
 0x4d2   :  { %v4886_v5 = vpop.permute.xlu1 %2001  ;;  %1390 = vadd.xlane.f32.xlu0 %v1389_v14 }
 0x4d3   :  { %v4888_v27 = vpop.f32.mrb[26].mxu0 }
 0x4d4   :  { %2045 = vadd.xlane.f32.xlu1 %v2044_v31  ;;  %v4892_v8 = vpop.f32.mrb[27].mxu0  ;;  %v1742_v31 = vsel %vm1358_vm3, %v1682_v7, 0.0 }
 0x4d6   :  { %v1335_v6 = vpop.permute.xlu1 %1334  ;;  %2054 = vadd.xlane.f32.xlu0 %v2053_v16 }
 0x4d7   :  { %v1395_v19 = vsel %vm1358_vm3, %v1335_v6, 0.0  ;;  %v2050_v6 = vsel %vm1358_vm3, %v4806_v40, 0.0 }
 0x4d8   :  { %1853 = vadd.xlane.f32.xlu1 %v1852_v38 }
 0x4da   :  { %v2000_v18 = vpop.permute.xlu1 %1999  ;;  %1535 = vadd.xlane.f32.xlu0 %v1534_v57  ;;  %v4912_v57 = vpop.permute.xlu0 %1811 }
 0x4db   :  { %v4900_v54 = vpop.f32.mrb[28].mxu0  ;;  %5578 = vst [vmem:[#allocation3_spill] sm:$0xff] %v4912_v57  ;;  %v2059_v7 = vsel %vm1358_vm3, %v2000_v18, 0.0  ;;  %v1519_v57 = vsel %vm1358_vm3, %v4774_v34, 0.0  ;;  %v1861_v34 = vsel %vm1358_vm3, %v4817_v50, 0.0  ;;  %v1733_v50 = vsel %vm1358_vm3, %v4808_v23, 0.0 }
 0x4dc   :  { %1514 = vadd.xlane.f32.xlu1 %v1513_v20  ;;  %v4904_v14 = vpop.f32.mrb[29].mxu0  ;;  %v1386_v20 = vsel %vm1358_vm3, %v4768_v44, 0.0  ;;  %v1858_v44 = vsel %vm1358_vm3, %v4801_v46, 0.0  ;;  %v1727_v46 = vsel %vm1358_vm3, %v4777_v13, 0.0  ;;  %v1867_v13 = vsel %vm1358_vm3, %v4863_v10, 0.0 }
 0x4dd   :  { %5577 = vst [vmem:[#allocation2_spill] sm:$0xff] %v4904_v14  ;;  %v2062_v10 = vsel %vm1358_vm3, %v4886_v5, 0.0  ;;  %v2071_v23 = vmul.f32 %v4347_v17, %v4238_v0  ;;  %v2077_v17 = vmul.f32 %v4599_v49, %v4238_v0 }
 0x4de   :  { %v1478_v16 = vpop.permute.xlu1 %1477  ;;  %1743 = vadd.xlane.f32.xlu0 %v1742_v31 }
 0x4e0   :  { %1722 = vadd.xlane.f32.xlu1 %v1721_v59  ;;  %v1540_v59 = vsel %vm1358_vm3, %v1478_v16, 0.0 }
 0x4e2   :  { %v1686_v38 = vpop.permute.xlu1 %1685  ;;  %1396 = vadd.xlane.f32.xlu0 %v1395_v19 }
 0x4e3   :  { %v4914_v63 = vpop.f32.mrb[32].mxu1  ;;  %v1748_v18 = vsel %vm1358_vm3, %v1686_v38, 0.0 }
 0x4e4   :  { %v4918_v14 = vpop.f32.mrb[33].mxu1  ;;  %1387 = vadd.xlane.f32.xlu1 %v1386_v20 }
 0x4e6   :  { %v4921_v31 = vpop.permute.xlu1 %1813  ;;  %2060 = vadd.xlane.f32.xlu0 %v2059_v7 }
 0x4e7   :  { %v4923_v61 = vpop.xlane.xlu0 %1363 }
 0x4e8   :  { %2051 = vadd.xlane.f32.xlu1 %v2050_v6 }
 0x4ea   :  { %1541 = vadd.xlane.f32.xlu0 %v1540_v59  ;;  %v1339_v20 = vpop.permute.xlu1 %1338 }
 0x4eb   :  { %v4928_v19 = vpop.xlane.xlu0 %2027  ;;  %v1401_v40 = vsel %vm1358_vm3, %v1339_v20, 0.0  ;;  %v2056_v20 = vsel %vm1358_vm3, %v4842_v28, 0.0  ;;  %v1398_v28 = vsel %vm1358_vm3, %v4826_v4, 0.0  ;;  %v1739_v4 = vsel %vm1358_vm3, %v4851_v24, 0.0 }
 0x4ec   :  { %1859 = vadd.xlane.f32.xlu1 %v1858_v44  ;;  %v1392_v44 = vsel %vm1358_vm3, %v4792_v45, 0.0  ;;  %v1525_v45 = vsel %vm1358_vm3, %v4798_v58, 0.0  ;;  %v1531_v58 = vsel %vm1358_vm3, %v4839_v37, 0.0 }
 0x4ee   :  { %1749 = vadd.xlane.f32.xlu0 %v1748_v18  ;;  %v2004_v16 = vpop.permute.xlu1 %2003 }
 0x4ef   :  { %v4933_v7 = vpop.xlane.xlu0 %1496  ;;  %v2065_v59 = vsel %vm1358_vm3, %v2004_v16, 0.0 }
 0x4f0   :  { %1520 = vadd.xlane.f32.xlu1 %v1519_v57 }
 0x4f2   :  { %1402 = vadd.xlane.f32.xlu0 %v1401_v40 }
 0x4f3   :  { %v4938_v6 = vpop.xlane.xlu0 %1704 }
 0x4f4   :  { %1728 = vadd.xlane.f32.xlu1 %v1727_v46 }
 0x4f6   :  { %2066 = vadd.xlane.f32.xlu0 %v2065_v59 }
 0x4f7   :  { %v4943_v38 = vpop.xlane.xlu0 %1832 }
 0x4f8   :  { %1393 = vadd.xlane.f32.xlu1 %v1392_v44 }
 0x4fa   :  { %1862 = vadd.xlane.f32.xlu0 %v1861_v34 }
 0x4fb   :  { %v4949_v57 = vpop.xlane.xlu0 %2024 }
 0x4fc   :  { %2057 = vadd.xlane.f32.xlu1 %v2056_v20 }
 0x4fe   :  { %1868 = vadd.xlane.f32.xlu0 %v1867_v13 }
 0x4ff   :  { %v4955_v18 = vpop.xlane.xlu0 %1505 }
 0x500   :  { %1526 = vadd.xlane.f32.xlu1 %v1525_v45 }
 0x503   :  { %v4959_v40 = vpop.xlane.xlu0 %1713 }
 0x504   :  { %1734 = vadd.xlane.f32.xlu1 %v1733_v50  ;;  %v2075_v50 = vmul.f32 %v4548_v2, %v4238_v0  ;;  %v2079_v2 = vmul.f32 %v4535_v56, %v4238_v0  ;;  %v5006_v56 = vld [vmem:[%s5572_s6 + $0x4] ss:$0 sm:$0xff] }
 0x507   :  { %v1367_v16 = vpop.xlane.xlu0 %1366 }
 0x508   :  { %1399 = vadd.xlane.f32.xlu1 %v1398_v28  ;;  %v2201_v34 = vmul.f32 %v1367_v16, %v1367_v16  ;;  %v1404_v16 = vsel %vm1358_vm3, %v4870_v32, 0.0  ;;  %v2068_v28 = vsel %vm1358_vm3, %v4883_v51, 0.0  ;;  %v1537_v32 = vsel %vm1358_vm3, %v4895_v1, 0.0 }
 0x509   :  { %v1745_v51 = vsel %vm1358_vm3, %v4906_v48, 0.0  ;;  %v1864_v48 = vsel %vm1358_vm3, %v4835_v29, 0.0  ;;  %v1870_v29 = vsel %vm1358_vm3, %v4879_v52, 0.0 }
 0x50b   :  { %v4965_v46 = vpop.xlane.xlu0 %1502 }
 0x50c   :  { %2063 = vadd.xlane.f32.xlu1 %v2062_v10 }
 0x50f   :  { %v1711_v59 = vpop.xlane.xlu0 %1710 }
 0x510   :  { %v2217_v44 = vmul.f32 %v1711_v59, %v1711_v59  ;;  %1532 = vadd.xlane.f32.xlu1 %v1531_v58  ;;  %v2081_v59 = vmul.f32 %v4684_v11, %v4238_v0  ;;  %v2083_v11 = vmul.f32 %v4725_v53, %v4238_v0  ;;  %v2085_v53 = vmul.f32 %v4759_v26, %v4238_v0 }
 0x512   :  { %v2233_v13 = vadd.f32 %v2217_v44, %v2201_v34 }
 0x513   :  { %v2031_v20 = vpop.xlane.xlu0 %2030 }
 0x514   :  { %v2249_v45 = vmul.f32 %v2031_v20, %v2031_v20  ;;  %1740 = vadd.xlane.f32.xlu1 %v1739_v4  ;;  %2103 = vrot.lane.b32.xlu0 %v2071_v23, %s3649_s21 }
 0x516   :  { %v2265_v5 = vadd.f32 %v2249_v45, %v2233_v13  ;;  %v5019_v13 = vld [vmem:[%s5572_s6 + $0x5] ss:$0 sm:$0xff] }
 0x517   :  { %v4978_v37 = vpop.xlane.xlu0 %1838 }
 0x518   :  { %3549 = vrsqrt.f32 %v2265_v5  ;;  %1405 = vadd.xlane.f32.xlu1 %v1404_v16  ;;  %2111 = vrot.lane.b32.xlu0 %v2075_v50, %s3649_s21  ;;  %vm2295_vm4 = vcmp.eq.f32.partialorder %v2265_v5, inf  ;;  %v2298_v1 = vand.u32 2147483648, %v2265_v5  ;;  %vm2297_vm5 = vcmp.eq.f32.partialorder %v2265_v5, 0.0 }
 0x51b   :  { %v4985_v24 = vpop.xlane.xlu0 %1511 }
 0x51c   :  { %2069 = vadd.xlane.f32.xlu1 %v2068_v28  ;;  %2115 = vrot.lane.b32.xlu0 %v2077_v17, %s3649_s21 }
 0x51f   :  { %v4992_v10 = vpop.xlane.xlu0 %1719 }
 0x520   :  { %1538 = vadd.xlane.f32.xlu1 %v1537_v32  ;;  %2119 = vrot.lane.b32.xlu0 %v2079_v2, %s3649_s21  ;;  %v2200_v2 = vmul.f32 %v4923_v61, %v4923_v61 }
 0x522   :  { %v3550_v49 = vpop.eup %3549 }
 0x523   :  { %v4999_v58 = vpop.xlane.xlu0 %1372  ;;  %v2294_v44 = vmul.f32 %v3550_v49, %v2265_v5  ;;  %v2248_v49 = vmul.f32 %v4928_v19, %v4928_v19 }
 0x524   :  { %1746 = vadd.xlane.f32.xlu1 %v1745_v51  ;;  %2123 = vrot.lane.b32.xlu0 %v2081_v59, %s3649_s21 }
 0x525   :  { %v2296_v34 = vsel %vm2295_vm4, %v2265_v5, %v2294_v44 }
 0x526   :  { %v2299_v23 = vsel %vm2297_vm5, %v2298_v1, %v2296_v34 }
 0x527   :  { %v5011_v20 = vpop.xlane.xlu0 %2036  ;;  %v2399_v4 = vmul.f32 %v5006_v56, %v2299_v23 }
 0x528   :  { %1865 = vadd.xlane.f32.xlu1 %v1864_v48  ;;  %2127 = vrot.lane.b32.xlu0 %v2083_v11, %s3649_s21  ;;  %v2215_v11 = vmul.f32 %v4938_v6, %v4938_v6  ;;  %v2218_v6 = vmul.f32 %v4959_v40, %v4959_v40 }
 0x529   :  { %v2538_v45 = vadd.f32 %v4832_v43, %v2399_v4  ;;  %v1876_v43 = vsel %vm1358_vm3, %v4921_v31, 0.0  ;;  %v2247_v4 = vmul.f32 %v4949_v57, %v4949_v57 }
 0x52b   :  { %v5025_v5 = vpop.xlane.xlu0 %1844  ;;  %v2612_v50 = vadd.f32 %v5019_v13, %v2538_v45 }
 0x52c   :  { %1871 = vadd.xlane.f32.xlu1 %v1870_v29  ;;  %2131 = vrot.lane.b32.xlu0 %v2085_v53, %s3649_s21 }
 0x52d   :  { %v5031_v16 = vpop.xlane.xlu1 %1499  ;;  %v3083_v17 = vmul.f32 -1.442695, %v2612_v50 }
 0x52f   :  { %v5033_v28 = vpop.xlane.xlu0 %1517  ;;  %3551 = vpow2.f32 %v3083_v17 }
 0x530   :  { %1877 = vadd.xlane.f32.xlu1 %v1876_v43  ;;  %v2072_v43 = vmul.f32 %v4284_v36, %v4238_v0 }
 0x531   :  { %v1708_v26 = vpop.xlane.xlu1 %1707 }
 0x532   :  { %v2216_v52 = vmul.f32 %v1708_v26, %v1708_v26 }
 0x533   :  { %v5039_v32 = vpop.xlane.xlu0 %1725 }
 0x534   :  { %v2232_v59 = vadd.f32 %v2216_v52, %v2200_v2 }
 0x535   :  { %v5043_v51 = vpop.xlane.xlu1 %1835 }
 0x536   :  { %v2264_v44 = vadd.f32 %v2248_v49, %v2232_v59  ;;  %v2073_v59 = vmul.f32 %v4474_v35, %v4238_v0  ;;  %v2074_v35 = vmul.f32 %v4419_v25, %v4238_v0 }
 0x537   :  { %v5045_v1 = vpop.xlane.xlu0 %1378 }
 0x538   :  { %3553 = vrsqrt.f32 %v2264_v44  ;;  %vm2288_vm6 = vcmp.eq.f32.partialorder %v2264_v44, inf  ;;  %vm2290_vm7 = vcmp.eq.f32.partialorder %v2264_v44, 0.0 }
 0x539   :  { %v3552_v31 = vpop.eup %3551  ;;  %v1361_v34 = vpop.xlane.xlu1 %1360 }
 0x53a   :  { %v2199_v23 = vmul.f32 %v1361_v34, %v1361_v34  ;;  %v2676_v61 = vadd.f32 1.0, %v3552_v31 }
 0x53b   :  { %v5049_v48 = vpop.xlane.xlu0 %2042 }
 0x53c   :  { %v2231_v19 = vadd.f32 %v2215_v11, %v2199_v23  ;;  %3555 = vrcp.f32 %v2676_v61  ;;  %v2291_v11 = vand.u32 2147483648, %v2264_v44  ;;  %v5070_v61 = vld [vmem:[%s5572_s6 + $0x6] ss:$0 sm:$0xff] }
 0x53d   :  { %v1370_v45 = vpop.xlane.xlu1 %1369 }
 0x53e   :  { %v2263_v53 = vadd.f32 %v2247_v4, %v2231_v19  ;;  %v2202_v29 = vmul.f32 %v1370_v45, %v1370_v45 }
 0x53f   :  { %v5053_v17 = vpop.xlane.xlu0 %1850 }
 0x540   :  { %3557 = vrsqrt.f32 %v2263_v53  ;;  %v2234_v52 = vadd.f32 %v2218_v6, %v2202_v29  ;;  %vm2281_vm8 = vcmp.eq.f32.partialorder %v2263_v53, inf  ;;  %vm2283_vm9 = vcmp.eq.f32.partialorder %v2263_v53, 0.0 }
 0x541   :  { %2105 = vrot.lane.b32.xlu1 %v2072_v43, %s3649_s21  ;;  %v2034_v26 = vpop.xlane.xlu1 %2033 }
 0x542   :  { %v3554_v2 = vpop.eup %3553  ;;  %v2250_v57 = vmul.f32 %v2034_v26, %v2034_v26 }
 0x543   :  { %v5060_v49 = vpop.xlane.xlu0 %1523  ;;  %v2287_v31 = vmul.f32 %v3554_v2, %v2264_v44 }
 0x544   :  { %v2266_v34 = vadd.f32 %v2250_v57, %v2234_v52  ;;  %v2076_v57 = vmul.f32 %v4527_v12, %v4238_v0 }
 0x545   :  { %2107 = vrot.lane.b32.xlu1 %v2073_v59, %s3649_s21  ;;  %v5065_v36 = vpop.xlane.xlu1 %1841  ;;  %v2289_v40 = vsel %vm2288_vm6, %v2264_v44, %v2287_v31  ;;  %v2220_v59 = vmul.f32 %v4992_v10, %v4992_v10  ;;  %v2284_v31 = vand.u32 2147483648, %v2263_v53 }
 0x546   :  { %v3556_v23 = vpop.eup %3555  ;;  %3559 = vrsqrt.f32 %v2266_v34  ;;  %v2292_v4 = vsel %vm2290_vm7, %v2291_v11, %v2289_v40  ;;  %vm2302_vm10 = vcmp.eq.f32.partialorder %v2266_v34, inf  ;;  %vm2304_vm11 = vcmp.eq.f32.partialorder %v2266_v34, 0.0 }
 0x547   :  { %v5072_v19 = vpop.xlane.xlu0 %1731  ;;  %v2724_v45 = vmul.f32 %v3556_v23, %v2612_v50  ;;  %v2398_v29 = vmul.f32 %v5006_v56, %v2292_v4 }
 0x549   :  { %2109 = vrot.lane.b32.xlu1 %v2074_v35, %s3649_s21  ;;  %v1376_v43 = vpop.xlane.xlu1 %1375  ;;  %v5079_v44 = vmul.f32 %v5070_v61, %v2724_v45  ;;  %v2533_v6 = vadd.f32 %v4815_v62, %v2398_v29  ;;  %v2078_v45 = vmul.f32 %v4581_v42, %v4238_v0  ;;  %v2080_v42 = vmul.f32 %v4633_v30, %v4238_v0 }
 0x54a   :  { %v3558_v26 = vpop.eup %3557  ;;  %v2204_v2 = vmul.f32 %v1376_v43, %v1376_v43 }
 0x54b   :  { %v5082_v52 = vpop.xlane.xlu0 %1384  ;;  %v5087_v25 = vadd.f32 %v5019_v13, %v2533_v6  ;;  %v2280_v50 = vmul.f32 %v3558_v26, %v2263_v53 }
 0x54c   :  { %v2236_v23 = vadd.f32 %v2220_v59, %v2204_v2  ;;  %v2305_v2 = vand.u32 2147483648, %v2266_v34 }
 0x54d   :  { %2113 = vrot.lane.b32.xlu1 %v2076_v57, %s3649_s21  ;;  %v2040_v11 = vpop.xlane.xlu1 %2039  ;;  %v3082_v62 = vmul.f32 -1.442695, %v5087_v25  ;;  %v2282_v40 = vsel %vm2281_vm8, %v2263_v53, %v2280_v50 }
 0x54e   :  { %v2252_v4 = vmul.f32 %v2040_v11, %v2040_v11  ;;  %v2285_v35 = vsel %vm2283_vm9, %v2284_v31, %v2282_v40 }
 0x54f   :  { %v5093_v12 = vpop.xlane.xlu0 %2048  ;;  %3561 = vpow2.f32 %v3082_v62  ;;  %v2397_v10 = vmul.f32 %v5006_v56, %v2285_v35 }
 0x550   :  { %v3560_v29 = vpop.eup %3559  ;;  %v2268_v43 = vadd.f32 %v2252_v4, %v2236_v23  ;;  %v2082_v23 = vmul.f32 %v4673_v3, %v4238_v0  ;;  %v2084_v3 = vmul.f32 %v4711_v22, %v4238_v0  ;;  %v2086_v22 = vmul.f32 %v4622_v15, %v4238_v0 }
 0x551   :  { %2117 = vrot.lane.b32.xlu1 %v2078_v45, %s3649_s21  ;;  %v5099_v6 = vpop.xlane.xlu1 %1847  ;;  %v2528_v26 = vadd.f32 %v4819_v47, %v2397_v10  ;;  %v2301_v53 = vmul.f32 %v3560_v29, %v2266_v34  ;;  %v2203_v45 = vmul.f32 %v4999_v58, %v4999_v58 }
 0x552   :  { %3563 = vrsqrt.f32 %v2268_v43  ;;  %vm2316_vm12 = vcmp.eq.f32.partialorder %v2268_v43, inf  ;;  %vm2318_vm13 = vcmp.eq.f32.partialorder %v2268_v43, 0.0 }
 0x553   :  { %v5102_v57 = vpop.xlane.xlu0 %1856  ;;  %v5107_v50 = vadd.f32 %v5019_v13, %v2528_v26  ;;  %v2303_v59 = vsel %vm2302_vm10, %v2266_v34, %v2301_v53 }
 0x554   :  { %5579 = vst [vmem:[#allocation4_spill] sm:$0xff] %v5102_v57  ;;  %v2306_v31 = vsel %vm2304_vm11, %v2305_v2, %v2303_v59  ;;  %v2251_v2 = vmul.f32 %v5011_v20, %v5011_v20  ;;  %v2222_v20 = vmul.f32 %v5039_v32, %v5039_v32 }
 0x555   :  { %2121 = vrot.lane.b32.xlu1 %v2080_v42, %s3649_s21  ;;  %v5110_v11 = vpop.xlane.xlu1 %1508  ;;  %v3081_v47 = vmul.f32 -1.442695, %v5107_v50  ;;  %v2400_v62 = vmul.f32 %v5006_v56, %v2306_v31 }
 0x557   :  { %v5114_v40 = vpop.xlane.xlu0 %1529  ;;  %3565 = vpow2.f32 %v3081_v47  ;;  %v2543_v30 = vadd.f32 %v4828_v21, %v2400_v62 }
 0x559   :  { %v3562_v4 = vpop.eup %3561  ;;  %2125 = vrot.lane.b32.xlu1 %v2082_v23, %s3649_s21  ;;  %v1717_v34 = vpop.xlane.xlu1 %1716  ;;  %v5121_v35 = vadd.f32 %v5019_v13, %v2543_v30  ;;  %v2319_v30 = vand.u32 2147483648, %v2268_v43 }
 0x55a   :  { %v2219_v10 = vmul.f32 %v1717_v34, %v1717_v34  ;;  %v2675_v29 = vadd.f32 1.0, %v3562_v4 }
 0x55b   :  { %v5125_v26 = vpop.xlane.xlu0 %1737  ;;  %v3084_v53 = vmul.f32 -1.442695, %v5121_v35 }
 0x55c   :  { %v3564_v21 = vpop.eup %3563  ;;  %v2235_v42 = vadd.f32 %v2219_v10, %v2203_v45  ;;  %3567 = vrcp.f32 %v2675_v29 }
 0x55d   :  { %2129 = vrot.lane.b32.xlu1 %v2084_v3, %s3649_s21  ;;  %v1382_v59 = vpop.xlane.xlu1 %1381  ;;  %3569 = vpow2.f32 %v3084_v53  ;;  %v2315_v58 = vmul.f32 %v3564_v21, %v2268_v43 }
 0x55e   :  { %v2267_v31 = vadd.f32 %v2251_v2, %v2235_v42  ;;  %v2206_v47 = vmul.f32 %v1382_v59, %v1382_v59 }
 0x55f   :  { %v5133_v62 = vpop.xlane.xlu0 %1390  ;;  %v2317_v23 = vsel %vm2316_vm12, %v2268_v43, %v2315_v58 }
 0x560   :  { %3571 = vrsqrt.f32 %v2267_v31  ;;  %v2320_v45 = vsel %vm2318_vm13, %v2319_v30, %v2317_v23  ;;  %v2238_v10 = vadd.f32 %v2222_v20, %v2206_v47  ;;  %vm2309_vm14 = vcmp.eq.f32.partialorder %v2267_v31, inf }
 0x561   :  { %v3566_v4 = vpop.eup %3565  ;;  %2133 = vrot.lane.b32.xlu1 %v2086_v22, %s3649_s21  ;;  %v2046_v34 = vpop.xlane.xlu1 %2045  ;;  %v2402_v53 = vmul.f32 %v5006_v56, %v2320_v45  ;;  %vm2311_vm15 = vcmp.eq.f32.partialorder %v2267_v31, 0.0 }
 0x562   :  { %v2254_v29 = vmul.f32 %v2046_v34, %v2046_v34  ;;  %v2674_v3 = vadd.f32 1.0, %v3566_v4  ;;  %v2312_v34 = vand.u32 2147483648, %v2267_v31 }
 0x563   :  { %v5141_v21 = vpop.xlane.xlu0 %2054  ;;  %v2553_v15 = vadd.f32 %v4844_v39, %v2402_v53 }
 0x564   :  { %v2270_v0 = vadd.f32 %v2254_v29, %v2238_v10  ;;  %3573 = vrcp.f32 %v2674_v3  ;;  %v2205_v29 = vmul.f32 %v5045_v1, %v5045_v1 }
 0x565   :  { %v5144_v2 = vpop.xlane.xlu1 %1853  ;;  %v5147_v43 = vadd.f32 %v5019_v13, %v2553_v15 }
 0x566   :  { %v3568_v32 = vpop.eup %3567  ;;  %3575 = vrsqrt.f32 %v2270_v0  ;;  %vm2330_vm0 = vcmp.eq.f32.partialorder %v2270_v0, inf  ;;  %vm2332_vm1 = vcmp.eq.f32.partialorder %v2270_v0, 0.0 }
 0x567   :  { %v3570_v42 = vpop.eup %3569  ;;  %v5149_v59 = vpop.xlane.xlu0 %1535  ;;  %v2723_v58 = vmul.f32 %v3568_v32, %v5087_v25  ;;  %v3086_v22 = vmul.f32 -1.442695, %v5147_v43 }
 0x568   :  { %5580 = vst [vmem:[#allocation5_spill] sm:$0xff] %v5149_v59  ;;  %v2677_v47 = vadd.f32 1.0, %v3570_v42 }
 0x569   :  { %v5153_v23 = vpop.xlane.xlu1 %1514  ;;  %v5156_v30 = vmul.f32 %v5070_v61, %v2723_v58 }
 0x56a   :  { %5581 = vst [vmem:[#allocation6_spill] sm:$0xff] %v5153_v23  ;;  %v3572_v39 = vpop.eup %3571  ;;  %3577 = vrcp.f32 %v2677_v47  ;;  %v2253_v47 = vmul.f32 %v5049_v48, %v5049_v48  ;;  %v2224_v48 = vmul.f32 %v5072_v19, %v5072_v19 }
 0x56b   :  { %v5158_v20 = vpop.xlane.xlu0 %1743  ;;  %v2308_v4 = vmul.f32 %v3572_v39, %v2267_v31  ;;  %3579 = vpow2.f32 %v3086_v22 }
 0x56d   :  { %v1723_v45 = vpop.xlane.xlu1 %1722  ;;  %v2310_v10 = vsel %vm2309_vm14, %v2267_v31, %v2308_v4 }
 0x56e   :  { %v3574_v25 = vpop.eup %3573  ;;  %v2221_v3 = vmul.f32 %v1723_v45, %v1723_v45  ;;  %v2313_v53 = vsel %vm2311_vm15, %v2312_v34, %v2310_v10 }
 0x56f   :  { %v5162_v15 = vpop.xlane.xlu0 %1396  ;;  %v2401_v32 = vmul.f32 %v5006_v56, %v2313_v53  ;;  %v2722_v42 = vmul.f32 %v3574_v25, %v5107_v50 }
 0x570   :  { %v3576_v58 = vpop.eup %3575  ;;  %v2237_v22 = vadd.f32 %v2221_v3, %v2205_v29  ;;  %v2333_v29 = vand.u32 2147483648, %v2270_v0 }
 0x571   :  { %v1388_v39 = vpop.xlane.xlu1 %1387  ;;  %v2548_v31 = vadd.f32 %v4848_v41, %v2401_v32  ;;  %v5170_v4 = vmul.f32 %v5070_v61, %v2722_v42  ;;  %v2329_v1 = vmul.f32 %v3576_v58, %v2270_v0 }
 0x572   :  { %v2269_v45 = vadd.f32 %v2253_v47, %v2237_v22  ;;  %v2208_v34 = vmul.f32 %v1388_v39, %v1388_v39 }
 0x573   :  { %v5172_v10 = vpop.xlane.xlu0 %2060  ;;  %v5175_v53 = vadd.f32 %v5019_v13, %v2548_v31  ;;  %v2331_v50 = vsel %vm2330_vm0, %v2270_v0, %v2329_v1 }
 0x574   :  { %v3578_v25 = vpop.eup %3577  ;;  %3581 = vrsqrt.f32 %v2269_v45  ;;  %v2240_v58 = vadd.f32 %v2224_v48, %v2208_v34  ;;  %v2334_v39 = vsel %vm2332_vm1, %v2333_v29, %v2331_v50  ;;  %vm2323_vm2 = vcmp.eq.f32.partialorder %v2269_v45, inf }
 0x575   :  { %v3580_v41 = vpop.eup %3579  ;;  %v2052_v3 = vpop.xlane.xlu1 %2051  ;;  %v3085_v32 = vmul.f32 -1.442695, %v5175_v53  ;;  %v2725_v42 = vmul.f32 %v3578_v25, %v5121_v35  ;;  %v2404_v19 = vmul.f32 %v5006_v56, %v2334_v39  ;;  %vm2325_vm4 = vcmp.eq.f32.partialorder %v2269_v45, 0.0 }
 0x576   :  { %v2256_v47 = vmul.f32 %v2052_v3, %v2052_v3  ;;  %v2679_v22 = vadd.f32 1.0, %v3580_v41  ;;  %v2326_v41 = vand.u32 2147483648, %v2269_v45 }
 0x577   :  { %v5181_v31 = vpop.xlane.xlu0 %1541  ;;  %3583 = vpow2.f32 %v3085_v32  ;;  %v5184_v1 = vmul.f32 %v5070_v61, %v2725_v42  ;;  %v2563_v23 = vadd.f32 %v4857_v55, %v2404_v19 }
 0x578   :  { %5582 = vst [vmem:[#allocation7_spill] sm:$0xff] %v5181_v31  ;;  %v2272_v57 = vadd.f32 %v2256_v47, %v2240_v58  ;;  %3585 = vrcp.f32 %v2679_v22  ;;  %v2255_v31 = vmul.f32 %v5093_v12, %v5093_v12  ;;  %v2226_v12 = vmul.f32 %v5125_v26, %v5125_v26 }
 0x579   :  { %v5187_v59 = vpop.xlane.xlu1 %1859  ;;  %v5193_v0 = vadd.f32 %v5019_v13, %v2563_v23  ;;  %v2207_v23 = vmul.f32 %v5082_v52, %v5082_v52 }
 0x57a   :  { %3587 = vrsqrt.f32 %v2272_v57  ;;  %vm2344_vm5 = vcmp.eq.f32.partialorder %v2272_v57, inf  ;;  %vm2346_vm6 = vcmp.eq.f32.partialorder %v2272_v57, 0.0 }
 0x57b   :  { %v5190_v35 = vpop.xlane.xlu0 %1749  ;;  %v3088_v50 = vmul.f32 -1.442695, %v5193_v0 }
 0x57d   :  { %v5195_v34 = vpop.xlane.xlu1 %1520  ;;  %3589 = vpow2.f32 %v3088_v50 }
 0x57e   :  { %5583 = vst [vmem:[#allocation8_spill] sm:$0xff] %v5195_v34  ;;  %v3582_v25 = vpop.eup %3581 }
 0x57f   :  { %v5198_v48 = vpop.xlane.xlu0 %1402  ;;  %v2322_v29 = vmul.f32 %v3582_v25, %v2269_v45 }
 0x581   :  { %v3584_v3 = vpop.eup %3583  ;;  %v1729_v32 = vpop.xlane.xlu1 %1728  ;;  %v2324_v55 = vsel %vm2323_vm2, %v2269_v45, %v2322_v29 }
 0x582   :  { %v3586_v42 = vpop.eup %3585  ;;  %v2223_v58 = vmul.f32 %v1729_v32, %v1729_v32  ;;  %v2678_v47 = vadd.f32 1.0, %v3584_v3  ;;  %v2327_v22 = vsel %vm2325_vm4, %v2326_v41, %v2324_v55 }
 0x583   :  { %v5202_v39 = vpop.xlane.xlu0 %2066  ;;  %v2403_v19 = vmul.f32 %v5006_v56, %v2327_v22  ;;  %v2727_v25 = vmul.f32 %v3586_v42, %v5147_v43  ;;  %v2347_v22 = vand.u32 2147483648, %v2272_v57 }
 0x584   :  { %v3588_v50 = vpop.eup %3587  ;;  %v2239_v34 = vadd.f32 %v2223_v58, %v2207_v23  ;;  %3591 = vrcp.f32 %v2678_v47 }
 0x585   :  { %v1394_v45 = vpop.xlane.xlu1 %1393  ;;  %v2558_v29 = vadd.f32 %v4861_v60, %v2403_v19  ;;  %v5210_v52 = vmul.f32 %v5070_v61, %v2727_v25  ;;  %v2343_v3 = vmul.f32 %v3588_v50, %v2272_v57 }
 0x586   :  { %v2271_v41 = vadd.f32 %v2255_v31, %v2239_v34  ;;  %v2210_v32 = vmul.f32 %v1394_v45, %v1394_v45 }
 0x587   :  { %v5212_v55 = vpop.xlane.xlu0 %1862  ;;  %v5215_v43 = vadd.f32 %v5019_v13, %v2558_v29  ;;  %v2345_v42 = vsel %vm2344_vm5, %v2272_v57, %v2343_v3  ;;  %v3590_v60 = vpop.eup %3589 }
 0x588   :  { %3593 = vrsqrt.f32 %v2271_v41  ;;  %v2348_v47 = vsel %vm2346_vm6, %v2347_v22, %v2345_v42  ;;  %v2242_v31 = vadd.f32 %v2226_v12, %v2210_v32  ;;  %v2681_v19 = vadd.f32 1.0, %v3590_v60 }
 0x589   :  { %v2058_v23 = vpop.xlane.xlu1 %2057  ;;  %v3087_v58 = vmul.f32 -1.442695, %v5215_v43  ;;  %v2406_v25 = vmul.f32 %v5006_v56, %v2348_v47  ;;  %vm2337_vm7 = vcmp.eq.f32.partialorder %v2271_v41, inf  ;;  %vm2339_vm8 = vcmp.eq.f32.partialorder %v2271_v41, 0.0 }
 0x58a   :  { %v2258_v34 = vmul.f32 %v2058_v23, %v2058_v23 }
 0x58b   :  { %v5221_v50 = vpop.xlane.xlu0 %1868  ;;  %3595 = vpow2.f32 %v3087_v58  ;;  %v2573_v29 = vadd.f32 %v4872_v9, %v2406_v25  ;;  %v2209_v58 = vmul.f32 %v5133_v62, %v5133_v62 }
 0x58c   :  { %5584 = vst [vmem:[#allocation9_spill] sm:$0xff] %v5221_v50  ;;  %v2274_v45 = vadd.f32 %v2258_v34, %v2242_v31  ;;  %3597 = vrcp.f32 %v2681_v19  ;;  %v2257_v34 = vmul.f32 %v5141_v21, %v5141_v21  ;;  %v2340_v19 = vand.u32 2147483648, %v2271_v41 }
 0x58d   :  { %v5224_v26 = vpop.xlane.xlu1 %1526  ;;  %v5227_v3 = vadd.f32 %v5019_v13, %v2573_v29  ;;  %v2228_v21 = vmul.f32 %v5158_v20, %v5158_v20 }
 0x58e   :  { %5585 = vst [vmem:[#allocation10_spill] sm:$0xff] %v5224_v26  ;;  %v3592_v57 = vpop.eup %3591  ;;  %3599 = vrsqrt.f32 %v2274_v45  ;;  %vm2358_vm9 = vcmp.eq.f32.partialorder %v2274_v45, inf  ;;  %vm2360_vm10 = vcmp.eq.f32.partialorder %v2274_v45, 0.0 }
 0x58f   :  { %v2104_v42 = vpop.permute.xlu0 %2103  ;;  %v2726_v32 = vmul.f32 %v3592_v57, %v5175_v53  ;;  %v3090_v12 = vmul.f32 -1.442695, %v5227_v3 }
 0x590   :  { %v2151_v22 = vsel %vm1358_vm3, %v2104_v42, 0.0 }
 0x591   :  { %v1735_v60 = vpop.xlane.xlu1 %1734  ;;  %2152 = vadd.xlane.f32.xlu0 %v2151_v22  ;;  %v5233_v23 = vmul.f32 %v5070_v61, %v2726_v32  ;;  %3601 = vpow2.f32 %v3090_v12 }
 0x592   :  { %v3594_v9 = vpop.eup %3593  ;;  %v2225_v47 = vmul.f32 %v1735_v60, %v1735_v60 }
 0x593   :  { %v2336_v31 = vmul.f32 %v3594_v9, %v2271_v41 }
 0x594   :  { %v2241_v53 = vadd.f32 %v2225_v47, %v2209_v58 }
 0x595   :  { %v3596_v25 = vpop.eup %3595  ;;  %v1400_v29 = vpop.xlane.xlu1 %1399  ;;  %v2338_v57 = vsel %vm2337_vm7, %v2271_v41, %v2336_v31  ;;  %vm2958_vm7 = vcmask 23552  }
 0x596   :  { %v3598_v42 = vpop.eup %3597  ;;  %v2273_v32 = vadd.f32 %v2257_v34, %v2241_v53  ;;  %v2212_v22 = vmul.f32 %v1400_v29, %v1400_v29  ;;  %v2680_v50 = vadd.f32 1.0, %v3596_v25  ;;  %v2341_v26 = vsel %vm2339_vm8, %v2340_v19, %v2338_v57 }
 0x597   :  { %v2405_v62 = vmul.f32 %v5006_v56, %v2341_v26  ;;  %v2729_v12 = vmul.f32 %v3598_v42, %v5193_v0  ;;  %v2361_v0 = vand.u32 2147483648, %v2274_v45 }
 0x598   :  { %v3600_v60 = vpop.eup %3599  ;;  %3603 = vrsqrt.f32 %v2273_v32  ;;  %v2244_v47 = vadd.f32 %v2228_v21, %v2212_v22  ;;  %vm2351_vm11 = vcmp.eq.f32.partialorder %v2273_v32, inf  ;;  %vm2353_vm12 = vcmp.eq.f32.partialorder %v2273_v32, 0.0 }
 0x599   :  { %v2064_v9 = vpop.xlane.xlu1 %2063  ;;  %3605 = vrcp.f32 %v2680_v50  ;;  %v2568_v58 = vadd.f32 %v4876_v33, %v2405_v62  ;;  %v5245_v31 = vmul.f32 %v5070_v61, %v2729_v12  ;;  %v2357_v34 = vmul.f32 %v3600_v60, %v2274_v45 }
 0x59a   :  { %v2260_v41 = vmul.f32 %v2064_v9, %v2064_v9  ;;  %v2211_v12 = vmul.f32 %v5162_v15, %v5162_v15  ;;  %v2259_v9 = vmul.f32 %v5172_v10, %v5172_v10 }
 0x59b   :  { %v5248_v53 = vadd.f32 %v5019_v13, %v2568_v58  ;;  %v3602_v26 = vpop.eup %3601  ;;  %v2359_v25 = vsel %vm2358_vm9, %v2274_v45, %v2357_v34  ;;  %v2354_v34 = vand.u32 2147483648, %v2273_v32 }
 0x59c   :  { %v2276_v19 = vadd.f32 %v2260_v41, %v2244_v47  ;;  %v2683_v33 = vadd.f32 1.0, %v3602_v26  ;;  %v2362_v29 = vsel %vm2360_vm10, %v2361_v0, %v2359_v25 }
 0x59d   :  { %v5250_v20 = vpop.xlane.xlu1 %1532  ;;  %v3089_v50 = vmul.f32 -1.442695, %v5248_v53  ;;  %v2408_v57 = vmul.f32 %v5006_v56, %v2362_v29 }
 0x59e   :  { %3607 = vrsqrt.f32 %v2276_v19  ;;  %vm2372_vm13 = vcmp.eq.f32.partialorder %v2276_v19, inf  ;;  %vm2374_vm14 = vcmp.eq.f32.partialorder %v2276_v19, 0.0 }
 0x59f   :  { %3609 = vpow2.f32 %v3089_v50  ;;  %v2583_v42 = vadd.f32 %v4888_v27, %v2408_v57  ;;  %v2230_v57 = vmul.f32 %v5190_v35, %v5190_v35 }
 0x5a0   :  { %3611 = vrcp.f32 %v2683_v33 }
 0x5a1   :  { %v1741_v22 = vpop.xlane.xlu1 %1740  ;;  %v5258_v45 = vadd.f32 %v5019_v13, %v2583_v42 }
 0x5a2   :  { %v3604_v62 = vpop.eup %3603  ;;  %v2227_v60 = vmul.f32 %v1741_v22, %v1741_v22 }
 0x5a3   :  { %v3606_v21 = vpop.eup %3605  ;;  %v2350_v58 = vmul.f32 %v3604_v62, %v2273_v32  ;;  %v3092_v27 = vmul.f32 -1.442695, %v5258_v45 }
 0x5a4   :  { %v2243_v47 = vadd.f32 %v2227_v60, %v2211_v12  ;;  %v2728_v41 = vmul.f32 %v3606_v21, %v5215_v43 }
 0x5a5   :  { %v1406_v0 = vpop.xlane.xlu1 %1405  ;;  %v2352_v26 = vsel %vm2351_vm11, %v2273_v32, %v2350_v58  ;;  %3613 = vpow2.f32 %v3092_v27 }
 0x5a6   :  { %v2275_v15 = vadd.f32 %v2259_v9, %v2243_v47  ;;  %v2214_v25 = vmul.f32 %v1406_v0, %v1406_v0  ;;  %v5265_v50 = vmul.f32 %v5070_v61, %v2728_v41  ;;  %v2355_v33 = vsel %vm2353_vm12, %v2354_v34, %v2352_v26 }
 0x5a7   :  { %v2407_v29 = vmul.f32 %v5006_v56, %v2355_v33  ;;  %v2375_v47 = vand.u32 2147483648, %v2276_v19 }
 0x5a8   :  { %v3608_v10 = vpop.eup %3607  ;;  %3615 = vrsqrt.f32 %v2275_v15  ;;  %v2246_v32 = vadd.f32 %v2230_v57, %v2214_v25  ;;  %vm2365_vm15 = vcmp.eq.f32.partialorder %v2275_v15, inf  ;;  %vm2367_vm0 = vcmp.eq.f32.partialorder %v2275_v15, 0.0 }
 0x5a9   :  { %v3610_v43 = vpop.eup %3609  ;;  %v2070_v42 = vpop.xlane.xlu1 %2069  ;;  %v2578_v22 = vadd.f32 %v4892_v8, %v2407_v29  ;;  %v2371_v21 = vmul.f32 %v3608_v10, %v2276_v19 }
 0x5aa   :  { %v3612_v62 = vpop.eup %3611  ;;  %v2262_v12 = vmul.f32 %v2070_v42, %v2070_v42  ;;  %v2682_v60 = vadd.f32 1.0, %v3610_v43  ;;  %v2261_v42 = vmul.f32 %v5202_v39, %v5202_v39 }
 0x5ab   :  { %v5272_v9 = vadd.f32 %v5019_v13, %v2578_v22  ;;  %v2731_v58 = vmul.f32 %v3612_v62, %v5227_v3  ;;  %v2373_v35 = vsel %vm2372_vm13, %v2276_v19, %v2371_v21  ;;  %v2213_v19 = vmul.f32 %v5198_v48, %v5198_v48 }
 0x5ac   :  { %v2278_v41 = vadd.f32 %v2262_v12, %v2246_v32  ;;  %3617 = vrcp.f32 %v2682_v60  ;;  %v2376_v0 = vsel %vm2374_vm14, %v2375_v47, %v2373_v35  ;;  %v2368_v32 = vand.u32 2147483648, %v2275_v15 }
 0x5ad   :  { %v5275_v34 = vpop.xlane.xlu1 %1538  ;;  %v3091_v8 = vmul.f32 -1.442695, %v5272_v9  ;;  %v5279_v27 = vmul.f32 %v5070_v61, %v2731_v58  ;;  %v2410_v26 = vmul.f32 %v5006_v56, %v2376_v0 }
 0x5ae   :  { %3619 = vrsqrt.f32 %v2278_v41  ;;  %vm2386_vm1 = vcmp.eq.f32.partialorder %v2278_v41, inf  ;;  %vm2388_vm2 = vcmp.eq.f32.partialorder %v2278_v41, 0.0 }
 0x5af   :  { %3621 = vpow2.f32 %v3091_v8  ;;  %v2593_v3 = vadd.f32 %v4900_v54, %v2410_v26  ;;  %v3614_v25 = vpop.eup %3613 }
 0x5b0   :  { %v2685_v57 = vadd.f32 1.0, %v3614_v25 }
 0x5b1   :  { %v1747_v33 = vpop.xlane.xlu1 %1746  ;;  %v5286_v43 = vadd.f32 %v5019_v13, %v2593_v3  ;;  %v5586_v3 = vld [vmem:[#allocation2_spill] sm:$0xff] }
 0x5b2   :  { %v3616_v29 = vpop.eup %3615  ;;  %v2229_v10 = vmul.f32 %v1747_v33, %v1747_v33  ;;  %3623 = vrcp.f32 %v2685_v57 }
 0x5b3   :  { %v2364_v22 = vmul.f32 %v3616_v29, %v2275_v15  ;;  %v3094_v54 = vmul.f32 -1.442695, %v5286_v43  ;;  %v2389_v29 = vand.u32 2147483648, %v2278_v41 }
 0x5b4   :  { %v2245_v62 = vadd.f32 %v2229_v10, %v2213_v19 }
 0x5b5   :  { %v5291_v12 = vpop.xlane.xlu1 %1865  ;;  %v2366_v60 = vsel %vm2365_vm15, %v2275_v15, %v2364_v22  ;;  %3625 = vpow2.f32 %v3094_v54 }
 0x5b6   :  { %v3618_v48 = vpop.eup %3617  ;;  %v2277_v21 = vadd.f32 %v2261_v42, %v2245_v62  ;;  %v2369_v58 = vsel %vm2367_vm0, %v2368_v32, %v2366_v60 }
 0x5b7   :  { %v2730_v47 = vmul.f32 %v3618_v48, %v5248_v53  ;;  %v2409_v35 = vmul.f32 %v5006_v56, %v2369_v58 }
 0x5b8   :  { %v3620_v39 = vpop.eup %3619  ;;  %3627 = vrsqrt.f32 %v2277_v21  ;;  %vm2379_vm4 = vcmp.eq.f32.partialorder %v2277_v21, inf  ;;  %vm2381_vm5 = vcmp.eq.f32.partialorder %v2277_v21, 0.0 }
 0x5b9   :  { %v3622_v8 = vpop.eup %3621  ;;  %v5295_v0 = vpop.xlane.xlu1 %1871  ;;  %v5298_v26 = vmul.f32 %v5070_v61, %v2730_v47  ;;  %v2588_v25 = vadd.f32 %v5586_v3, %v2409_v35  ;;  %v2385_v33 = vmul.f32 %v3620_v39, %v2278_v41 }
 0x5ba   :  { %v2684_v15 = vadd.f32 1.0, %v3622_v8 }
 0x5bb   :  { %v5302_v19 = vadd.f32 %v5019_v13, %v2588_v25  ;;  %v2387_v53 = vsel %vm2386_vm1, %v2278_v41, %v2385_v33 }
 0x5bc   :  { %3629 = vrcp.f32 %v2684_v15  ;;  %v2390_v10 = vsel %vm2388_vm2, %v2389_v29, %v2387_v53  ;;  %v3624_v62 = vpop.eup %3623  ;;  %v2764_v29 = vsel %vm1358_vm3, %v5079_v44, 0.0 }
 0x5bd   :  { %v5304_v57 = vpop.xlane.xlu1 %1877  ;;  %v3093_v42 = vmul.f32 -1.442695, %v5302_v19  ;;  %v2412_v22 = vmul.f32 %v5006_v56, %v2390_v10  ;;  %v2733_v32 = vmul.f32 %v3624_v62, %v5258_v45  ;;  %v2382_v45 = vand.u32 2147483648, %v2277_v21 }
 0x5bf   :  { %3631 = vpow2.f32 %v3093_v42  ;;  %v2603_v54 = vadd.f32 %v4914_v63, %v2412_v22  ;;  %v3626_v60 = vpop.eup %3625  ;;  %v5311_v58 = vmul.f32 %v5070_v61, %v2733_v32 }
 0x5c0   :  { %v2687_v41 = vadd.f32 1.0, %v3626_v60  ;;  %v2770_v60 = vsel %vm1358_vm3, %v5233_v23, 0.0 }
 0x5c1   :  { %v2106_v48 = vpop.permute.xlu1 %2105  ;;  %v5314_v47 = vadd.f32 %v5019_v13, %v2603_v54  ;;  %v5587_v54 = vld [vmem:[#allocation3_spill] sm:$0xff] }
 0x5c2   :  { %v3628_v35 = vpop.eup %3627  ;;  %v2154_v39 = vsel %vm1358_vm3, %v2106_v48, 0.0  ;;  %3633 = vrcp.f32 %v2687_v41 }
 0x5c3   :  { %2155 = vadd.xlane.f32.xlu1 %v2154_v39  ;;  %v3096_v8 = vmul.f32 -1.442695, %v5314_v47  ;;  %v2378_v3 = vmul.f32 %v3628_v35, %v2277_v21 }
 0x5c5   :  { %v2108_v63 = vpop.permute.xlu1 %2107  ;;  %3635 = vpow2.f32 %v3096_v8  ;;  %v2380_v25 = vsel %vm2379_vm4, %v2277_v21, %v2378_v3  ;;  %v1873_v21 = vsel %vm1358_vm3, %v5587_v54, 0.0 }
 0x5c6   :  { %v3630_v33 = vpop.eup %3629  ;;  %v2157_v15 = vsel %vm1358_vm3, %v2108_v63, 0.0  ;;  %v2383_v53 = vsel %vm2381_vm5, %v2382_v45, %v2380_v25  ;;  %v2758_v45 = vsel %vm1358_vm3, %v5170_v4, 0.0  ;;  %v2767_v63 = vsel %vm1358_vm3, %v5184_v1, 0.0 }
 0x5c7   :  { %2158 = vadd.xlane.f32.xlu0 %v2157_v15  ;;  %2765 = vadd.xlane.f32.xlu1 %v2764_v29  ;;  %v2732_v10 = vmul.f32 %v3630_v33, %v5272_v9  ;;  %v2411_v42 = vmul.f32 %v5006_v56, %v2383_v53  ;;  %v2761_v56 = vsel %vm1358_vm3, %v5156_v30, 0.0  ;;  %v2773_v4 = vsel %vm1358_vm3, %v5210_v52, 0.0 }
 0x5c9   :  { %v3632_v22 = vpop.eup %3631  ;;  %v2752_v62 = vmul.f32 %v5070_v61, %v2732_v10  ;;  %v2598_v32 = vadd.f32 %v4918_v14, %v2411_v42  ;;  %v2776_v14 = vsel %vm1358_vm3, %v5265_v50, 0.0  ;;  %v2110_v23 = vpop.permute.xlu1 %2109  ;;  %v2779_v42 = vsel %vm1358_vm3, %v5245_v31, 0.0 }
 0x5ca   :  { %v2686_v48 = vadd.f32 1.0, %v3632_v22  ;;  %v2160_v22 = vsel %vm1358_vm3, %v2110_v23, 0.0  ;;  %v2791_v31 = vsel %vm1358_vm3, %v5311_v58, 0.0 }
 0x5cb   :  { %1874 = vadd.xlane.f32.xlu0 %v1873_v21  ;;  %2771 = vadd.xlane.f32.xlu1 %v2770_v60  ;;  %v2624_v44 = vadd.f32 %v5019_v13, %v2598_v32  ;;  %v2782_v13 = vsel %vm1358_vm3, %v5298_v26, 0.0  ;;  %v2785_v32 = vsel %vm1358_vm3, %v5279_v27, 0.0 }
 0x5cc   :  { %3637 = vrcp.f32 %v2686_v48  ;;  %v3634_v9 = vpop.eup %3633 }
 0x5cd   :  { %v3095_v41 = vmul.f32 -1.442695, %v2624_v44  ;;  %v2735_v35 = vmul.f32 %v3634_v9, %v5286_v43  ;;  %v2114_v50 = vpop.permute.xlu1 %2113  ;;  %v2788_v43 = vsel %vm1358_vm3, %v2752_v62, 0.0 }
 0x5ce   :  { %v2166_v54 = vsel %vm1358_vm3, %v2114_v50, 0.0 }
 0x5cf   :  { %v3636_v39 = vpop.eup %3635  ;;  %2762 = vadd.xlane.f32.xlu0 %v2761_v56  ;;  %2777 = vadd.xlane.f32.xlu1 %v2776_v14  ;;  %3639 = vpow2.f32 %v3095_v41  ;;  %v2755_v8 = vmul.f32 %v5070_v61, %v2735_v35 }
 0x5d0   :  { %v2689_v3 = vadd.f32 1.0, %v3636_v39 }
 0x5d1   :  { %v2118_v10 = vpop.permute.xlu1 %2117  ;;  %v2797_v56 = vsel %vm1358_vm3, %v2755_v8, 0.0 }
 0x5d2   :  { %3641 = vrcp.f32 %v2689_v3  ;;  %v2172_v60 = vsel %vm1358_vm3, %v2118_v10, 0.0 }
 0x5d3   :  { %2783 = vadd.xlane.f32.xlu1 %v2782_v13  ;;  %2759 = vadd.xlane.f32.xlu0 %v2758_v45 }
 0x5d5   :  { %v2122_v62 = vpop.permute.xlu1 %2121 }
 0x5d6   :  { %v3638_v30 = vpop.eup %3637  ;;  %v2178_v14 = vsel %vm1358_vm3, %v2122_v62, 0.0 }
 0x5d7   :  { %2789 = vadd.xlane.f32.xlu1 %v2788_v43  ;;  %2768 = vadd.xlane.f32.xlu0 %v2767_v63  ;;  %v2734_v25 = vmul.f32 %v3638_v30, %v5302_v19  ;;  %v3650_v19 = vmov 0  }
 0x5d8   :  { %3387 = vset.pattern.permute.xlu1 %v3650_v19  ;;  %3388 = vset.pattern.permute.xlu0 %v3650_v19 }
 0x5d9   :  { %v3640_v33 = vpop.eup %3639  ;;  %v2754_v26 = vmul.f32 %v5070_v61, %v2734_v25  ;;  %v2126_v9 = vpop.permute.xlu1 %2125 }
 0x5da   :  { %v2688_v15 = vadd.f32 1.0, %v3640_v33  ;;  %v2184_v58 = vsel %vm1358_vm3, %v2126_v9, 0.0 }
 0x5db   :  { %2774 = vadd.xlane.f32.xlu0 %v2773_v4  ;;  %v2794_v29 = vsel %vm1358_vm3, %v2754_v26, 0.0 }
 0x5dc   :  { %v3642_v53 = vpop.eup %3641  ;;  %2795 = vadd.xlane.f32.xlu1 %v2794_v29  ;;  %3643 = vrcp.f32 %v2688_v15 }
 0x5dd   :  { %v2737_v1 = vmul.f32 %v3642_v53, %v5314_v47  ;;  %v2112_v47 = vpop.permute.xlu0 %2111  ;;  %v2130_v35 = vpop.permute.xlu1 %2129 }
 0x5de   :  { %v2190_v3 = vsel %vm1358_vm3, %v2130_v35, 0.0 }
 0x5df   :  { %2780 = vadd.xlane.f32.xlu0 %v2779_v42  ;;  %v2757_v52 = vmul.f32 %v5070_v61, %v2737_v1  ;;  %v3098_v42 = vld [vmem:[%s5572_s6 + $0x7] ss:$0 sm:$0xff] }
 0x5e0   :  { %2161 = vadd.xlane.f32.xlu1 %v2160_v22 }
 0x5e1   :  { %v2116_v27 = vpop.permute.xlu0 %2115  ;;  %v2803_v39 = vsel %vm1358_vm3, %v2757_v52, 0.0 }
 0x5e2   :  { %v2169_v8 = vsel %vm1358_vm3, %v2116_v27, 0.0 }
 0x5e3   :  { %2786 = vadd.xlane.f32.xlu0 %v2785_v32 }
 0x5e4   :  { %2167 = vadd.xlane.f32.xlu1 %v2166_v54 }
 0x5e5   :  { %v2120_v23 = vpop.permute.xlu0 %2119 }
 0x5e6   :  { %v3644_v21 = vpop.eup %3643  ;;  %v2175_v30 = vsel %vm1358_vm3, %v2120_v23, 0.0 }
 0x5e7   :  { %2792 = vadd.xlane.f32.xlu0 %v2791_v31  ;;  %v2736_v48 = vmul.f32 %v3644_v21, %v2624_v44  ;;  %v2163_v44 = vsel %vm1358_vm3, %v2112_v47, 0.0 }
 0x5e8   :  { %2173 = vadd.xlane.f32.xlu1 %v2172_v60 }
 0x5e9   :  { %v2756_v41 = vmul.f32 %v5070_v61, %v2736_v48  ;;  %v2134_v61 = vpop.permute.xlu1 %2133  ;;  %v2124_v13 = vpop.permute.xlu0 %2123 }
 0x5ea   :  { %v2196_v45 = vsel %vm1358_vm3, %v2134_v61, 0.0  ;;  %v2181_v63 = vsel %vm1358_vm3, %v2124_v13, 0.0 }
 0x5eb   :  { %2798 = vadd.xlane.f32.xlu0 %v2797_v56  ;;  %v2800_v50 = vsel %vm1358_vm3, %v2756_v41, 0.0 }
 0x5ec   :  { %2179 = vadd.xlane.f32.xlu1 %v2178_v14 }
 0x5ed   :  { %v2128_v43 = vpop.permute.xlu0 %2127 }
 0x5ee   :  { %v2187_v25 = vsel %vm1358_vm3, %v2128_v43, 0.0 }
 0x5ef   :  { %2804 = vadd.xlane.f32.xlu0 %v2803_v39 }
 0x5f0   :  { %2185 = vadd.xlane.f32.xlu1 %v2184_v58 }
 0x5f1   :  { %v2132_v33 = vpop.permute.xlu0 %2131 }
 0x5f2   :  { %v2193_v26 = vsel %vm1358_vm3, %v2132_v33, 0.0 }
 0x5f3   :  { %2164 = vadd.xlane.f32.xlu0 %v2163_v44 }
 0x5f4   :  { %2191 = vadd.xlane.f32.xlu1 %v2190_v3 }
 0x5f7   :  { %2170 = vadd.xlane.f32.xlu0 %v2169_v8 }
 0x5f8   :  { %2197 = vadd.xlane.f32.xlu1 %v2196_v45 }
 0x5fb   :  { %2176 = vadd.xlane.f32.xlu0 %v2175_v30 }
 0x5fc   :  { %2801 = vadd.xlane.f32.xlu1 %v2800_v50 }
 0x5ff   :  { %2182 = vadd.xlane.f32.xlu0 %v2181_v63 }
 0x603   :  { %2188 = vadd.xlane.f32.xlu0 %v2187_v25 }
 0x607   :  { %2194 = vadd.xlane.f32.xlu0 %v2193_v26 }
 0x61e   :  { %v5373_v4 = vpop.xlane.xlu0 %2152 }
 0x650   :  { %v5375_v15 = vpop.xlane.xlu1 %2155 }
 0x654   :  { %v5377_v29 = vpop.xlane.xlu0 %2158  ;;  %v2766_v53 = vpop.xlane.xlu1 %2765 }
 0x655   :  { %v2812_v48 = vadd.f32 %v3098_v42, %v2766_v53 }
 0x658   :  { %v5379_v10 = vpop.xlane.xlu0 %1874  ;;  %v2772_v1 = vpop.xlane.xlu1 %2771 }
 0x659   :  { %v2814_v35 = vadd.f32 %v3098_v42, %v2772_v1 }
 0x65c   :  { %v2763_v19 = vpop.xlane.xlu0 %2762  ;;  %v2778_v22 = vpop.xlane.xlu1 %2777 }
 0x65d   :  { %v2811_v52 = vadd.f32 %v3098_v42, %v2763_v19  ;;  %v2816_v13 = vadd.f32 %v3098_v42, %v2778_v22 }
 0x65f   :  { %2869 = vperm.xlu1 %3387, %v2811_v52  }
 0x660   :  { %v2784_v62 = vpop.xlane.xlu1 %2783  ;;  %v2760_v32 = vpop.xlane.xlu0 %2759 }
 0x661   :  { %v2810_v54 = vadd.f32 %v3098_v42, %v2760_v32  ;;  %v2818_v43 = vadd.f32 %v3098_v42, %v2784_v62 }
 0x663   :  { %2864 = vperm.xlu0 %3388, %v2810_v54  }
 0x664   :  { %v2790_v47 = vpop.xlane.xlu1 %2789  ;;  %v2769_v21 = vpop.xlane.xlu0 %2768 }
 0x665   :  { %v2813_v31 = vadd.f32 %v3098_v42, %v2769_v21  ;;  %v2820_v33 = vadd.f32 %v3098_v42, %v2790_v47  ;;  %v2826_v21 = vlaneseq }
 0x667   :  { %2879 = vperm.xlu1 %3387, %v2813_v31   ;;  %v5392_v31 = vand.u32 127, %v2826_v21 }
 0x668   :  { %v2775_v60 = vpop.xlane.xlu0 %2774 }
 0x669   :  { %v2796_v9 = vpop.xlane.xlu1 %2795  ;;  %v2815_v56 = vadd.f32 %v3098_v42, %v2775_v60  ;;  %vm2829_vm3 = vcmp.eq.s32.totalorder %v5392_v31, 1  ;;  %vm2828_vm6 = vcmp.eq.s32.totalorder %v5392_v31, 0 }
 0x66a   :  { %v2822_v53 = vadd.f32 %v3098_v42, %v2796_v9  ;;  %v2831_v47 = vsel %vm2829_vm3, %v5043_v51, %v5375_v15 }
 0x66b   :  { %2874 = vperm.xlu1 %3387, %v2812_v48   ;;  %v2847_v48 = vsel %vm2828_vm6, %v5031_v16, %v2831_v47 }
 0x66c   :  { %v2781_v41 = vpop.xlane.xlu0 %2780 }
 0x66d   :  { %v2162_v27 = vpop.xlane.xlu1 %2161  ;;  %v2817_v44 = vadd.f32 %v3098_v42, %v2781_v41  ;;  %v2830_v41 = vsel %vm2829_vm3, %v4943_v38, %v5373_v4 }
 0x66e   :  { %v2846_v51 = vsel %vm2828_vm6, %v4933_v7, %v2830_v41  ;;  %v2833_v16 = vsel %vm2829_vm3, %v5065_v36, %v2162_v27  ;;  %v2832_v7 = vsel %vm2829_vm3, %v4978_v37, %v5377_v29  ;;  %v5593_v41 = vld [vmem:[#allocation10_spill] sm:$0xff] }
 0x66f   :  { %2889 = vperm.xlu1 %3387, %v2815_v56   ;;  %v2849_v38 = vsel %vm2828_vm6, %v4955_v18, %v2833_v16  ;;  %v2848_v36 = vsel %vm2828_vm6, %v4965_v46, %v2832_v7 }
 0x670   :  { %v2787_v14 = vpop.xlane.xlu0 %2786 }
 0x671   :  { %v2819_v39 = vadd.f32 %v3098_v42, %v2787_v14  ;;  %v2168_v58 = vpop.xlane.xlu1 %2167 }
 0x672   :  { %v2835_v18 = vsel %vm2829_vm3, %v5099_v6, %v2168_v58 }
 0x673   :  { %2884 = vperm.xlu1 %3387, %v2814_v35   ;;  %2909 = vperm.xlu0 %3388, %v2819_v39   ;;  %v2851_v37 = vsel %vm2828_vm6, %v4985_v24, %v2835_v18 }
 0x674   :  { %v2793_v23 = vpop.xlane.xlu0 %2792 }
 0x675   :  { %v2821_v3 = vadd.f32 %v3098_v42, %v2793_v23  ;;  %v5384_v61 = vpop.xlane.xlu1 %2173 }
 0x677   :  { %2899 = vperm.xlu1 %3387, %v2817_v44   ;;  %2919 = vperm.xlu0 %3388, %v2821_v3  }
 0x678   :  { %v2799_v8 = vpop.xlane.xlu0 %2798 }
 0x679   :  { %v2823_v45 = vadd.f32 %v3098_v42, %v2799_v8  ;;  %v2180_v30 = vpop.xlane.xlu1 %2179 }
 0x67a   :  { %v2839_v46 = vsel %vm2829_vm3, %v5187_v59, %v2180_v30 }
 0x67b   :  { %2894 = vperm.xlu1 %3387, %v2816_v13   ;;  %2929 = vperm.xlu0 %3388, %v2823_v45   ;;  %v2855_v44 = vsel %vm2828_vm6, %v5060_v49, %v2839_v46 }
 0x67c   :  { %v2805_v50 = vpop.xlane.xlu0 %2804 }
 0x67d   :  { %v2825_v63 = vadd.f32 %v3098_v42, %v2805_v50  ;;  %v2186_v25 = vpop.xlane.xlu1 %2185 }
 0x67e   :  { %v2841_v3 = vsel %vm2829_vm3, %v5291_v12, %v2186_v25 }
 0x67f   :  { %2904 = vperm.xlu1 %3387, %v2818_v43   ;;  %2939 = vperm.xlu0 %3388, %v2825_v63   ;;  %v5589_v43 = vld [vmem:[#allocation5_spill] sm:$0xff] }
 0x680   :  { %v2165_v22 = vpop.xlane.xlu0 %2164 }
 0x681   :  { %v2192_v26 = vpop.xlane.xlu1 %2191  ;;  %v2834_v23 = vsel %vm2829_vm3, %v5025_v5, %v2165_v22  ;;  %v2837_v5 = vsel %vm2829_vm3, %v5144_v2, %v5384_v61  ;;  %v2857_v2 = vsel %vm2828_vm6, %v5114_v40, %v2841_v3  ;;  %v5588_v40 = vld [vmem:[#allocation6_spill] sm:$0xff]  ;;  %v5591_v22 = vld [vmem:[#allocation8_spill] sm:$0xff] }
 0x682   :  { %v2850_v24 = vsel %vm2828_vm6, %v5110_v11, %v2834_v23  ;;  %v2853_v49 = vsel %vm2828_vm6, %v5033_v28, %v2837_v5  ;;  %v2843_v61 = vsel %vm2829_vm3, %v5295_v0, %v2192_v26 }
 0x683   :  { %2914 = vperm.xlu1 %3387, %v2820_v33   ;;  %v5590_v33 = vld [vmem:[#allocation4_spill] sm:$0xff] }
 0x684   :  { %v2171_v32 = vpop.xlane.xlu0 %2170 }
 0x685   :  { %v5386_v1 = vpop.xlane.xlu1 %2197  ;;  %v2836_v45 = vsel %vm2829_vm3, %v5053_v17, %v2171_v32  ;;  %v2859_v17 = vsel %vm2828_vm6, %v5589_v43, %v2843_v61 }
 0x686   :  { %v2852_v0 = vsel %vm2828_vm6, %v5588_v40, %v2836_v45  ;;  %v2845_v25 = vsel %vm2829_vm3, %v5304_v57, %v5386_v1  ;;  %v5592_v1 = vld [vmem:[#allocation7_spill] sm:$0xff] }
 0x687   :  { %2924 = vperm.xlu1 %3387, %v2822_v53   ;;  %v2861_v32 = vsel %vm2828_vm6, %v5592_v1, %v2845_v25 }
 0x688   :  { %v5388_v54 = vpop.xlane.xlu0 %2176 }
 0x689   :  { %v2802_v19 = vpop.xlane.xlu1 %2801  ;;  %v2838_v26 = vsel %vm2829_vm3, %v5590_v33, %v5388_v54 }
 0x68a   :  { %v2824_v52 = vadd.f32 %v3098_v42, %v2802_v19  ;;  %v2854_v57 = vsel %vm2828_vm6, %v5591_v22, %v2838_v26 }
 0x68c   :  { %2934 = vperm.xlu1 %3387, %v2824_v52   ;;  %v5390_v62 = vpop.xlane.xlu0 %2182 }
 0x68d   :  { %v2840_v21 = vsel %vm2829_vm3, %v5212_v55, %v5390_v62 }
 0x690   :  { %v5394_v60 = vpop.xlane.xlu0 %2188 }
 0x694   :  { %v5402_v42 = vpop.xlane.xlu0 %2194 }
 0x6de   :  { %v2870_v9 = vpop.permute.xlu1 %2869 }
 0x6df   :  { %v2943_v56 = vmul.f32 %v2870_v9, %v2847_v48 }
 0x6e1   :  { %2960 = vst.msk [vmem:[%s5576_s7 + $0x8] sm:$0xff] %vm2958_vm7, %v2943_v56  ;;  %v2856_v56 = vsel %vm2828_vm6, %v5593_v41, %v2840_v21 }
 0x6e2   :  { %v2865_v15 = vpop.permute.xlu0 %2864 }
 0x6e3   :  { %v2942_v14 = vmul.f32 %v2865_v15, %v2846_v51  ;;  %v5594_v51 = vld [vmem:[#allocation9_spill] sm:$0xff] }
 0x6e4   :  { %v2842_v55 = vsel %vm2829_vm3, %v5594_v51, %v5394_v60 }
 0x6e5   :  { %2959 = vst.msk [vmem:[%s5576_s7] sm:$0xff] %vm2958_vm7, %v2942_v14  ;;  %v2858_v16 = vsel %vm2828_vm6, %v5250_v20, %v2842_v55 }
 0x6e6   :  { %v2880_v4 = vpop.permute.xlu1 %2879 }
 0x6e7   :  { %v2945_v35 = vmul.f32 %v2880_v4, %v2849_v38  ;;  %v2844_v38 = vsel %vm2829_vm3, %v5379_v10, %v5402_v42 }
 0x6e8   :  { %v2860_v4 = vsel %vm2828_vm6, %v5275_v34, %v2844_v38 }
 0x6e9   :  { %2962 = vst.msk [vmem:[%s5576_s7 + $0x18] sm:$0xff] %vm2958_vm7, %v2945_v35 }
 0x6ea   :  { %v2875_v27 = vpop.permute.xlu1 %2874 }
 0x6eb   :  { %v2944_v39 = vmul.f32 %v2875_v27, %v2848_v36 }
 0x6ed   :  { %2961 = vst.msk [vmem:[%s5576_s7 + $0x10] sm:$0xff] %vm2958_vm7, %v2944_v39 }
 0x6ee   :  { %v2890_v29 = vpop.permute.xlu1 %2889 }
 0x6ef   :  { %v2947_v6 = vmul.f32 %v2890_v29, %v2851_v37 }
 0x6f1   :  { %2964 = vst.msk [vmem:[%s5576_s7 + $0x28] sm:$0xff] %vm2958_vm7, %v2947_v6 }
 0x6f2   :  { %v2885_v58 = vpop.permute.xlu1 %2884  ;;  %v2910_v59 = vpop.permute.xlu0 %2909 }
 0x6f3   :  { %v2946_v8 = vmul.f32 %v2885_v58, %v2850_v24  ;;  %v2951_v13 = vmul.f32 %v2910_v59, %v2855_v44 }
 0x6f5   :  { %2963 = vst.msk [vmem:[%s5576_s7 + $0x20] sm:$0xff] %vm2958_vm7, %v2946_v8  ;;  %2968 = vst.msk [vmem:[%s5576_s7 + $0x48] sm:$0xff] %vm2958_vm7, %v2951_v13 }
 0x6f6   :  { %v2900_v11 = vpop.permute.xlu1 %2899  ;;  %v2920_v12 = vpop.permute.xlu0 %2919 }
 0x6f7   :  { %v2949_v30 = vmul.f32 %v2900_v11, %v2853_v49  ;;  %v2953_v50 = vmul.f32 %v2920_v12, %v2857_v2 }
 0x6f9   :  { %2966 = vst.msk [vmem:[%s5576_s7 + $0x38] sm:$0xff] %vm2958_vm7, %v2949_v30  ;;  %2970 = vst.msk [vmem:[%s5576_s7 + $0x58] sm:$0xff] %vm2958_vm7, %v2953_v50 }
 0x6fa   :  { %v2895_v28 = vpop.permute.xlu1 %2894  ;;  %v2930_v63 = vpop.permute.xlu0 %2929 }
 0x6fb   :  { %v2948_v53 = vmul.f32 %v2895_v28, %v2852_v0  ;;  %v2955_v19 = vmul.f32 %v2930_v63, %v2859_v17 }
 0x6fd   :  { %2965 = vst.msk [vmem:[%s5576_s7 + $0x30] sm:$0xff] %vm2958_vm7, %v2948_v53  ;;  %2972 = vst.msk [vmem:[%s5576_s7 + $0x68] sm:$0xff] %vm2958_vm7, %v2955_v19 }
 0x6fe   :  { %v2905_v52 = vpop.permute.xlu1 %2904  ;;  %v2940_v54 = vpop.permute.xlu0 %2939 }
 0x6ff   :  { %v2950_v47 = vmul.f32 %v2905_v52, %v2854_v57  ;;  %v2957_v48 = vmul.f32 %v2940_v54, %v2861_v32 }
 0x701   :  { %2967 = vst.msk [vmem:[%s5576_s7 + $0x40] sm:$0xff] %vm2958_vm7, %v2950_v47  ;;  %2974 = vst.msk [vmem:[%s5576_s7 + $0x78] sm:$0xff] %vm2958_vm7, %v2957_v48 }
 0x702   :  { %v2915_v9 = vpop.permute.xlu1 %2914 }
 0x703   :  { %v2952_v62 = vmul.f32 %v2915_v9, %v2856_v56 }
 0x705   :  { %2969 = vst.msk [vmem:[%s5576_s7 + $0x50] sm:$0xff] %vm2958_vm7, %v2952_v62 }
 0x706   :  { %v2925_v15 = vpop.permute.xlu1 %2924 }
 0x707   :  { %v2954_v14 = vmul.f32 %v2925_v15, %v2858_v16 }
 0x709   :  { %2971 = vst.msk [vmem:[%s5576_s7 + $0x60] sm:$0xff] %vm2958_vm7, %v2954_v14 }
 0x70b   :  { %v2935_v60 = vpop.permute.xlu1 %2934 }
 0x70c   :  { %v2956_v7 = vmul.f32 %v2935_v60, %v2860_v4 }
 0x70e   :  { %2973 = vst.msk [vmem:[%s5576_s7 + $0x70] sm:$0xff] %vm2958_vm7, %v2956_v7 }

</bundles_post_ra>
